<compile_context>
chip_gen: v5e
topology: v5e:2x2
jax: 0.10.0
libtpu: 0.0.40
codegen_flags: <defaults>
</compile_context>

<pallas_src>
import functools

import jax
import jax.numpy as jnp
from jax.experimental import pallas as pl
from jax.experimental.pallas import tpu as pltpu

EPS = 1e-5


# ----------------------------- Pallas kernels ------------------------------

def _convT_kernel(w_ref, b_ref, x_ref, o_ref, *, relu):
    # out = act(W @ cols^T + b); lane axis = flattened output spatial dim.
    acc = jnp.dot(w_ref[...], x_ref[...], preferred_element_type=jnp.float32)
    acc = acc + b_ref[...]                       # (Cout,1) broadcast over lanes
    if relu:
        acc = jnp.maximum(acc, 0.0)
    o_ref[...] = acc


def _convT_pool_kernel(w_ref, b_ref, p0_ref, p1_ref, p2_ref, p3_ref, o_ref):
    # out = relu(max_q(W @ cols_q^T) + b)  ==  relu(maxpool2(conv(x) + b))
    w = w_ref[...]
    m = jnp.dot(w, p0_ref[...], preferred_element_type=jnp.float32)
    for p_ref in (p1_ref, p2_ref, p3_ref):
        m = jnp.maximum(m, jnp.dot(w, p_ref[...],
                                   preferred_element_type=jnp.float32))
    o_ref[...] = jnp.maximum(m + b_ref[...], 0.0)


def _fc_tail_kernel(x_ref, w1_ref, b1_ref, w2_ref, b2_ref,
                    w3_ref, b3_ref, w4_ref, b4_ref, o_ref):
    # fc1(+bn2 folded) -> relu -> fc2 -> relu -> [bn3 folded into fc3]
    # -> fc3 -> relu -> fc4; all intermediates stay in VMEM/vregs.
    h = jnp.dot(x_ref[...], w1_ref[...], preferred_element_type=jnp.float32)
    h = jnp.maximum(h + b1_ref[...], 0.0)
    h = jnp.dot(h, w2_ref[...], preferred_element_type=jnp.float32)
    h = jnp.maximum(h + b2_ref[...], 0.0)
    # TODO(synk): f.dropout(0.5) after (folded) norm3 is identity (inference).
    h = jnp.dot(h, w3_ref[...], preferred_element_type=jnp.float32)
    h = jnp.maximum(h + b3_ref[...], 0.0)
    o_ref[...] = jnp.dot(h, w4_ref[...],
                         preferred_element_type=jnp.float32) + b4_ref[...]


# ------------------------------ spec helpers --------------------------------

def _const_spec(shape):
    # same (whole) block for every grid step
    return pl.BlockSpec(shape, lambda n: (0,) * len(shape))


def _batch_spec(shape2d):
    # (None, R, C) block over a (N, R, C) array: kernel sees a 2-D (R, C) ref.
    return pl.BlockSpec((None,) + tuple(shape2d), lambda n: (n, 0, 0))


# ------------------------------ im2col glue ---------------------------------

def _im2col_T(x_nchw, kh, kw):
    """(N,C,H,W) -> (N, kh*kw*C, Ho*Wo); row order (tap-major, cin-minor)."""
    N, C, H, W = x_nchw.shape
    Ho, Wo = H - kh + 1, W - kw + 1
    taps = [x_nchw[:, :, i:i + Ho, j:j + Wo]
            for i in range(kh) for j in range(kw)]        # each (N,C,Ho,Wo)
    p = jnp.stack(taps, axis=1)                           # (N, kh*kw, C, Ho, Wo)
    return p.reshape(N, kh * kw * C, Ho * Wo)


def _im2col_T_quadrants(x_nchw, kh, kw):
    """Four im2col^T matrices, one per 2x2-pool quadrant of the conv output."""
    N, C, H, W = x_nchw.shape
    Ho, Wo = H - kh + 1, W - kw + 1
    Hp, Wp = Ho // 2, Wo // 2
    taps = [x_nchw[:, :, i:i + Ho, j:j + Wo]
            for i in range(kh) for j in range(kw)]
    p = jnp.stack(taps, axis=1).reshape(N, kh * kw * C, Ho, Wo)
    parts = [p[:, :, di::2, dj::2].reshape(N, kh * kw * C, Hp * Wp)
             for di in (0, 1) for dj in (0, 1)]
    return parts, (Hp, Wp)


# ------------------------------ fused layers ---------------------------------

def conv_relu(x_nchw, wmat, bcol, kh, kw, relu=True):
    """Valid NCHW conv + bias (+ReLU) as one transposed-matmul kernel."""
    N, C, H, W = x_nchw.shape
    Ho, Wo = H - kh + 1, W - kw + 1
    cols = _im2col_T(x_nchw, kh, kw)                      # (N, K, Ho*Wo)
    K, M = cols.shape[1], cols.shape[2]
    Cout = wmat.shape[0]
    out = pl.pallas_call(
        functools.partial(_convT_kernel, relu=relu),
        grid=(N,),
        in_specs=[_const_spec((Cout, K)), _const_spec((Cout, 1)),
                  _batch_spec((K, M))],
        out_specs=_batch_spec((Cout, M)),
        out_shape=jax.ShapeDtypeStruct((N, Cout, M), jnp.float32),
        compiler_params=pltpu.CompilerParams(
            dimension_semantics=("parallel",)),
    )(wmat, bcol, cols)
    return out.reshape(N, Cout, Ho, Wo)


def conv_pool_relu(x_nchw, wmat, bcol, kh, kw):
    """relu(MaxPool2d(2)(conv(x))) fused in one kernel (4 quadrant matmuls)."""
    N = x_nchw.shape[0]
    parts, (Hp, Wp) = _im2col_T_quadrants(x_nchw, kh, kw)
    K, M = parts[0].shape[1], parts[0].shape[2]
    Cout = wmat.shape[0]
    out = pl.pallas_call(
        _convT_pool_kernel,
        grid=(N,),
        in_specs=[_const_spec((Cout, K)), _const_spec((Cout, 1))]
                 + [_batch_spec((K, M))] * 4,
        out_specs=_batch_spec((Cout, M)),
        out_shape=jax.ShapeDtypeStruct((N, Cout, M), jnp.float32),
        compiler_params=pltpu.CompilerParams(
            dimension_semantics=("parallel",)),
    )(wmat, bcol, *parts)
    return out.reshape(N, Cout, Hp, Wp)


def fc_tail(x, q):
    """fc1 -> relu -> fc2 -> relu -> (bn3 folded) fc3 -> relu -> fc4."""
    args = (x, q["fc1_w"], q["fc1_b"], q["fc2_w"], q["fc2_b"],
            q["fc3_w"], q["fc3_b"], q["fc4_w"], q["fc4_b"])
    M, Nout = x.shape[0], q["fc4_b"].shape[1]
    return pl.pallas_call(
        _fc_tail_kernel,
        grid=(1,),
        in_specs=[_const_spec(a.shape) for a in args],
        out_specs=_const_spec((M, Nout)),
        out_shape=jax.ShapeDtypeStruct((M, Nout), jnp.float32),
        compiler_params=pltpu.CompilerParams(
            dimension_semantics=("arbitrary",)),
    )(*args)


# ------------------------------ parameters ----------------------------------

def init_params(key):
    """Raw PyTorch-layout parameters (deterministic stand-ins)."""
    ks = iter(jax.random.split(key, 32))

    def conv_w(cout, cin, kh, kw):
        fan = cin * kh * kw
        return jax.random.normal(next(ks), (cout, cin, kh, kw),
                                 jnp.float32) / jnp.sqrt(fan)

    def lin_w(fin, fout):  # stored as (in, out) for direct matmul
        return jax.random.normal(next(ks), (fin, fout),
                                 jnp.float32) / jnp.sqrt(fin)

    def bias(n):
        return jax.random.normal(next(ks), (n,), jnp.float32) * 0.05

    def bn(n):
        return dict(
            g=jax.random.uniform(next(ks), (n,), jnp.float32, 0.5, 1.5),
            b=jax.random.normal(next(ks), (n,), jnp.float32) * 0.1,
            m=jax.random.normal(next(ks), (n,), jnp.float32) * 0.1,
            v=jax.random.uniform(next(ks), (n,), jnp.float32, 0.5, 1.5),
        )

    p = {
        "conv1_w": conv_w(10, 3, 3, 3),   "conv1_b": bias(10),
        "conv2_w": conv_w(10, 10, 3, 3),  "conv2_b": bias(10),
        "conv3_w": conv_w(40, 10, 3, 3),  "conv3_b": bias(40),
        "conv4_w": conv_w(40, 40, 3, 3),  "conv4_b": bias(40),
        "fc1_w": lin_w(1000, 500), "fc1_b": bias(500),
        "fc2_w": lin_w(500, 250),  "fc2_b": bias(250),
        "fc3_w": lin_w(250, 100),  "fc3_b": bias(100),
        "fc4_w": lin_w(100, 10),   "fc4_b": bias(10),
    }
    p["bn1"] = bn(10)
    p["bn2"] = bn(40)
    p["bn3"] = bn(250)
    return p


def _conv_wmat(w):
    # (Cout, Cin, kh, kw) -> (Cout, kh*kw*Cin); column order (ki, kj, cin)
    cout, cin, kh, kw = w.shape
    return jnp.transpose(w, (0, 2, 3, 1)).reshape(cout, kh * kw * cin)


def _bn_scale_shift(bn):
    scale = bn["g"] / jnp.sqrt(bn["v"] + EPS)
    shift = bn["b"] - bn["m"] * scale
    return scale, shift


def prepare_params(p):
    """One-time weight reshape + eval-mode BatchNorm folding (all in f32)."""
    q = {}
    # conv1 / conv2: plain reshape to (Cout, K) + column bias
    q["c1_w"] = _conv_wmat(p["conv1_w"]); q["c1_b"] = p["conv1_b"].reshape(-1, 1)
    q["c2_w"] = _conv_wmat(p["conv2_w"]); q["c2_b"] = p["conv2_b"].reshape(-1, 1)

    # bn1 folds into conv3 (per input channel; K columns ordered (tap, cin))
    s1, t1 = _bn_scale_shift(p["bn1"])
    w3 = _conv_wmat(p["conv3_w"])                           # (40, 90)
    q["c3_w"] = w3 * jnp.tile(s1, 9)[None, :]
    q["c3_b"] = (p["conv3_b"] + w3 @ jnp.tile(t1, 9)).reshape(-1, 1)

    # conv4: plain
    q["c4_w"] = _conv_wmat(p["conv4_w"]); q["c4_b"] = p["conv4_b"].reshape(-1, 1)

    # bn2 folds into fc1: NCHW flatten of (40,5,5) -> channel = k // 25
    s2, t2 = _bn_scale_shift(p["bn2"])
    sv, tv = jnp.repeat(s2, 25), jnp.repeat(t2, 25)
    q["fc1_w"] = p["fc1_w"] * sv[:, None]
    q["fc1_b"] = (p["fc1_b"] + tv @ p["fc1_w"]).reshape(1, -1)

    # fc2: plain
    q["fc2_w"] = p["fc2_w"]; q["fc2_b"] = p["fc2_b"].reshape(1, -1)

    # bn3 folds into fc3
    s3, t3 = _bn_scale_shift(p["bn3"])
    q["fc3_w"] = p["fc3_w"] * s3[:, None]
    q["fc3_b"] = (p["fc3_b"] + t3 @ p["fc3_w"]).reshape(1, -1)

    # fc4: plain
    q["fc4_w"] = p["fc4_w"]; q["fc4_b"] = p["fc4_b"].reshape(1, -1)
    return q


# ------------------------------- forward -------------------------------------

@jax.jit
def net_forward(x_nchw, q):
    x = x_nchw.astype(jnp.float32)                           # NCHW throughout

    x = conv_relu(x, q["c1_w"], q["c1_b"], 3, 3, relu=True)  # (N,10,30,30)
    x = conv_pool_relu(x, q["c2_w"], q["c2_b"], 3, 3)        # (N,10,14,14)
    # TODO(synk): Dropout2d(0.2) is identity (inference); bn1 folded into conv3.

    x = conv_relu(x, q["c3_w"], q["c3_b"], 3, 3, relu=True)  # (N,40,12,12)
    x = conv_pool_relu(x, q["c4_w"], q["c4_b"], 3, 3)        # (N,40,5,5)
    # TODO(synk): Dropout2d(0.2) is identity (inference); bn2 folded into fc1.

    N = x.shape[0]
    x = x.reshape(N, 40 * 5 * 5)                             # == .view(-1, 1000)
    return fc_tail(x, q)                                     # (N, 10)


if __name__ == "__main__":
    key = jax.random.PRNGKey(0)
    k_x, k_p = jax.random.split(key)
    # CIFAR-10 geometry is forced by fc1 (40*5*5 = 1000): batch=2, 3x32x32
    x = jax.random.normal(k_x, (2, 3, 32, 32), jnp.float32)
    raw_params = init_params(k_p)
    params = prepare_params(raw_params)        # one-time reshape + BN folding

    out = net_forward(x, params)
    out = jax.block_until_ready(out)
    assert out.shape == (2, 10) and out.dtype == jnp.float32
    print("KERNEL_OK")
</pallas_src>

<mosaic_0001>
module attributes {stable_mosaic.version = 11 : i64} {
  func.func @_convT_kernel(%arg0: i32, %arg1: memref<10x27xf32, #tpu.memory_space<vmem>>, %arg2: memref<10x1xf32, #tpu.memory_space<vmem>>, %arg3: memref<1x27x900xf32, #tpu.memory_space<vmem>>, %arg4: memref<1x10x900xf32, #tpu.memory_space<vmem>>) attributes {dimension_semantics = [#tpu.dimension_semantics<parallel>], iteration_bounds = array<i64: 2>, scalar_prefetch = 0 : i64, scratch_operands = 0 : i64, tpu.core_type = #tpu.core_type<tc>, window_params = [{pipeline_mode = #tpu.pipeline_mode<synchronous>, transform_indices = @transform_0, window_bounds = array<i64: 10, 27>}, {pipeline_mode = #tpu.pipeline_mode<synchronous>, transform_indices = @transform_1, window_bounds = array<i64: 10, 1>}, {transform_indices = @transform_2, window_bounds = array<i64: 1, 27, 900>}, {transform_indices = @transform_3, window_bounds = array<i64: 1, 10, 900>}]} {
    %c0 = arith.constant 0 : index
    %c0_0 = arith.constant 0 : index
    %0 = vector.load %arg1[%c0, %c0_0] : memref<10x27xf32, #tpu.memory_space<vmem>>, vector<10x27xf32>
    %c0_1 = arith.constant 0 : index
    %c0_2 = arith.constant 0 : index
    %c0_3 = arith.constant 0 : index
    %1 = vector.load %arg3[%c0_1, %c0_2, %c0_3] : memref<1x27x900xf32, #tpu.memory_space<vmem>>, vector<1x27x900xf32>
    %2 = vector.shape_cast %1 : vector<1x27x900xf32> to vector<27x900xf32>
    %cst = arith.constant dense<0.000000e+00> : vector<10x900xf32>
    %3 = tpu.matmul %0, %2, %cst {dimension_numbers = #tpu.dot_dimension_numbers<[1], [0], [0], [1], [0, 0, 1, 1], [], []>} : vector<10x27xf32>, vector<27x900xf32>, vector<10x900xf32> -> vector<10x900xf32>
    %c0_4 = arith.constant 0 : index
    %c0_5 = arith.constant 0 : index
    %4 = vector.load %arg2[%c0_4, %c0_5] : memref<10x1xf32, #tpu.memory_space<vmem>>, vector<10x1xf32>
    %5 = vector.broadcast %4 : vector<10x1xf32> to vector<10x900xf32>
    %6 = arith.addf %3, %5 : vector<10x900xf32>
    %cst_6 = arith.constant 0.000000e+00 : f32
    %7 = vector.broadcast %cst_6 : f32 to vector<10x900xf32>
    %8 = arith.maximumf %6, %7 : vector<10x900xf32>
    %c0_7 = arith.constant 0 : index
    %c0_8 = arith.constant 0 : index
    %c0_9 = arith.constant 0 : index
    %9 = vector.load %arg4[%c0_7, %c0_8, %c0_9] : memref<1x10x900xf32, #tpu.memory_space<vmem>>, vector<1x10x900xf32>
    %10 = vector.shape_cast %9 : vector<1x10x900xf32> to vector<10x900xf32>
    %11 = vector.shape_cast %8 : vector<10x900xf32> to vector<1x10x900xf32>
    tpu.vector_store %arg4[%c0_7, %c0_8, %c0_9], %11 {strides = array<i32>} : memref<1x10x900xf32, #tpu.memory_space<vmem>>, vector<1x10x900xf32>,
    return
  }
  func.func @transform_0(%arg0: i32) -> (i32, i32) {
    %c0_i32 = arith.constant 0 : i32
    %c0_i32_0 = arith.constant 0 : i32
    %c0_i32_1 = arith.constant 0 : i32
    return %c0_i32, %c0_i32_0 : i32, i32
  }
  func.func @transform_1(%arg0: i32) -> (i32, i32) {
    %c0_i32 = arith.constant 0 : i32
    %c0_i32_0 = arith.constant 0 : i32
    %c0_i32_1 = arith.constant 0 : i32
    return %c0_i32, %c0_i32_0 : i32, i32
  }
  func.func @transform_2(%arg0: i32) -> (i32, i32, i32) {
    %c0_i32 = arith.constant 0 : i32
    %c0_i32_0 = arith.constant 0 : i32
    %c0_i32_1 = arith.constant 0 : i32
    return %arg0, %c0_i32, %c0_i32_0 : i32, i32, i32
  }
  func.func @transform_3(%arg0: i32) -> (i32, i32, i32) {
    %c0_i32 = arith.constant 0 : i32
    %c0_i32_0 = arith.constant 0 : i32
    %c0_i32_1 = arith.constant 0 : i32
    return %arg0, %c0_i32, %c0_i32_0 : i32, i32, i32
  }
}

module attributes {stable_mosaic.version = 11 : i64} {
  func.func @_convT_pool_kernel(%arg0: i32, %arg1: memref<10x90xf32, #tpu.memory_space<vmem>>, %arg2: memref<10x1xf32, #tpu.memory_space<vmem>>, %arg3: memref<1x90x196xf32, #tpu.memory_space<vmem>>, %arg4: memref<1x90x196xf32, #tpu.memory_space<vmem>>, %arg5: memref<1x90x196xf32, #tpu.memory_space<vmem>>, %arg6: memref<1x90x196xf32, #tpu.memory_space<vmem>>, %arg7: memref<1x10x196xf32, #tpu.memory_space<vmem>>) attributes {dimension_semantics = [#tpu.dimension_semantics<parallel>], iteration_bounds = array<i64: 2>, scalar_prefetch = 0 : i64, scratch_operands = 0 : i64, tpu.core_type = #tpu.core_type<tc>, window_params = [{pipeline_mode = #tpu.pipeline_mode<synchronous>, transform_indices = @transform_0, window_bounds = array<i64: 10, 90>}, {pipeline_mode = #tpu.pipeline_mode<synchronous>, transform_indices = @transform_1, window_bounds = array<i64: 10, 1>}, {transform_indices = @transform_2, window_bounds = array<i64: 1, 90, 196>}, {transform_indices = @transform_3, window_bounds = array<i64: 1, 90, 196>}, {transform_indices = @transform_4, window_bounds = array<i64: 1, 90, 196>}, {transform_indices = @transform_5, window_bounds = array<i64: 1, 90, 196>}, {transform_indices = @transform_6, window_bounds = array<i64: 1, 10, 196>}]} {
    %c0 = arith.constant 0 : index
    %c0_0 = arith.constant 0 : index
    %0 = vector.load %arg1[%c0, %c0_0] : memref<10x90xf32, #tpu.memory_space<vmem>>, vector<10x90xf32>
    %c0_1 = arith.constant 0 : index
    %c0_2 = arith.constant 0 : index
    %c0_3 = arith.constant 0 : index
    %1 = vector.load %arg3[%c0_1, %c0_2, %c0_3] : memref<1x90x196xf32, #tpu.memory_space<vmem>>, vector<1x90x196xf32>
    %2 = vector.shape_cast %1 : vector<1x90x196xf32> to vector<90x196xf32>
    %cst = arith.constant dense<0.000000e+00> : vector<10x196xf32>
    %3 = tpu.matmul %0, %2, %cst {dimension_numbers = #tpu.dot_dimension_numbers<[1], [0], [0], [1], [0, 0, 1, 1], [], []>} : vector<10x90xf32>, vector<90x196xf32>, vector<10x196xf32> -> vector<10x196xf32>
    %c0_4 = arith.constant 0 : index
    %c0_5 = arith.constant 0 : index
    %c0_6 = arith.constant 0 : index
    %4 = vector.load %arg4[%c0_4, %c0_5, %c0_6] : memref<1x90x196xf32, #tpu.memory_space<vmem>>, vector<1x90x196xf32>
    %5 = vector.shape_cast %4 : vector<1x90x196xf32> to vector<90x196xf32>
    %cst_7 = arith.constant dense<0.000000e+00> : vector<10x196xf32>
    %6 = tpu.matmul %0, %5, %cst_7 {dimension_numbers = #tpu.dot_dimension_numbers<[1], [0], [0], [1], [0, 0, 1, 1], [], []>} : vector<10x90xf32>, vector<90x196xf32>, vector<10x196xf32> -> vector<10x196xf32>
    %7 = arith.maximumf %3, %6 : vector<10x196xf32>
    %c0_8 = arith.constant 0 : index
    %c0_9 = arith.constant 0 : index
    %c0_10 = arith.constant 0 : index
    %8 = vector.load %arg5[%c0_8, %c0_9, %c0_10] : memref<1x90x196xf32, #tpu.memory_space<vmem>>, vector<1x90x196xf32>
    %9 = vector.shape_cast %8 : vector<1x90x196xf32> to vector<90x196xf32>
    %cst_11 = arith.constant dense<0.000000e+00> : vector<10x196xf32>
    %10 = tpu.matmul %0, %9, %cst_11 {dimension_numbers = #tpu.dot_dimension_numbers<[1], [0], [0], [1], [0, 0, 1, 1], [], []>} : vector<10x90xf32>, vector<90x196xf32>, vector<10x196xf32> -> vector<10x196xf32>
    %11 = arith.maximumf %7, %10 : vector<10x196xf32>
    %c0_12 = arith.constant 0 : index
    %c0_13 = arith.constant 0 : index
    %c0_14 = arith.constant 0 : index
    %12 = vector.load %arg6[%c0_12, %c0_13, %c0_14] : memref<1x90x196xf32, #tpu.memory_space<vmem>>, vector<1x90x196xf32>
    %13 = vector.shape_cast %12 : vector<1x90x196xf32> to vector<90x196xf32>
    %cst_15 = arith.constant dense<0.000000e+00> : vector<10x196xf32>
    %14 = tpu.matmul %0, %13, %cst_15 {dimension_numbers = #tpu.dot_dimension_numbers<[1], [0], [0], [1], [0, 0, 1, 1], [], []>} : vector<10x90xf32>, vector<90x196xf32>, vector<10x196xf32> -> vector<10x196xf32>
    %15 = arith.maximumf %11, %14 : vector<10x196xf32>
    %c0_16 = arith.constant 0 : index
    %c0_17 = arith.constant 0 : index
    %16 = vector.load %arg2[%c0_16, %c0_17] : memref<10x1xf32, #tpu.memory_space<vmem>>, vector<10x1xf32>
    %17 = vector.broadcast %16 : vector<10x1xf32> to vector<10x196xf32>
    %18 = arith.addf %15, %17 : vector<10x196xf32>
    %cst_18 = arith.constant 0.000000e+00 : f32
    %19 = vector.broadcast %cst_18 : f32 to vector<10x196xf32>
    %20 = arith.maximumf %18, %19 : vector<10x196xf32>
    %c0_19 = arith.constant 0 : index
    %c0_20 = arith.constant 0 : index
    %c0_21 = arith.constant 0 : index
    %21 = vector.load %arg7[%c0_19, %c0_20, %c0_21] : memref<1x10x196xf32, #tpu.memory_space<vmem>>, vector<1x10x196xf32>
    %22 = vector.shape_cast %21 : vector<1x10x196xf32> to vector<10x196xf32>
    %23 = vector.shape_cast %20 : vector<10x196xf32> to vector<1x10x196xf32>
    tpu.vector_store %arg7[%c0_19, %c0_20, %c0_21], %23 {strides = array<i32>} : memref<1x10x196xf32, #tpu.memory_space<vmem>>, vector<1x10x196xf32>,
    return
  }
  func.func @transform_0(%arg0: i32) -> (i32, i32) {
    %c0_i32 = arith.constant 0 : i32
    %c0_i32_0 = arith.constant 0 : i32
    %c0_i32_1 = arith.constant 0 : i32
    return %c0_i32, %c0_i32_0 : i32, i32
  }
  func.func @transform_1(%arg0: i32) -> (i32, i32) {
    %c0_i32 = arith.constant 0 : i32
    %c0_i32_0 = arith.constant 0 : i32
    %c0_i32_1 = arith.constant 0 : i32
    return %c0_i32, %c0_i32_0 : i32, i32
  }
  func.func @transform_2(%arg0: i32) -> (i32, i32, i32) {
    %c0_i32 = arith.constant 0 : i32
    %c0_i32_0 = arith.constant 0 : i32
    %c0_i32_1 = arith.constant 0 : i32
    return %arg0, %c0_i32, %c0_i32_0 : i32, i32, i32
  }
  func.func @transform_3(%arg0: i32) -> (i32, i32, i32) {
    %c0_i32 = arith.constant 0 : i32
    %c0_i32_0 = arith.constant 0 : i32
    %c0_i32_1 = arith.constant 0 : i32
    return %arg0, %c0_i32, %c0_i32_0 : i32, i32, i32
  }
  func.func @transform_4(%arg0: i32) -> (i32, i32, i32) {
    %c0_i32 = arith.constant 0 : i32
    %c0_i32_0 = arith.constant 0 : i32
    %c0_i32_1 = arith.constant 0 : i32
    return %arg0, %c0_i32, %c0_i32_0 : i32, i32, i32
  }
  func.func @transform_5(%arg0: i32) -> (i32, i32, i32) {
    %c0_i32 = arith.constant 0 : i32
    %c0_i32_0 = arith.constant 0 : i32
    %c0_i32_1 = arith.constant 0 : i32
    return %arg0, %c0_i32, %c0_i32_0 : i32, i32, i32
  }
  func.func @transform_6(%arg0: i32) -> (i32, i32, i32) {
    %c0_i32 = arith.constant 0 : i32
    %c0_i32_0 = arith.constant 0 : i32
    %c0_i32_1 = arith.constant 0 : i32
    return %arg0, %c0_i32, %c0_i32_0 : i32, i32, i32
  }
}

module attributes {stable_mosaic.version = 11 : i64} {
  func.func @_convT_kernel(%arg0: i32, %arg1: memref<40x90xf32, #tpu.memory_space<vmem>>, %arg2: memref<40x1xf32, #tpu.memory_space<vmem>>, %arg3: memref<1x90x144xf32, #tpu.memory_space<vmem>>, %arg4: memref<1x40x144xf32, #tpu.memory_space<vmem>>) attributes {dimension_semantics = [#tpu.dimension_semantics<parallel>], iteration_bounds = array<i64: 2>, scalar_prefetch = 0 : i64, scratch_operands = 0 : i64, tpu.core_type = #tpu.core_type<tc>, window_params = [{pipeline_mode = #tpu.pipeline_mode<synchronous>, transform_indices = @transform_0, window_bounds = array<i64: 40, 90>}, {pipeline_mode = #tpu.pipeline_mode<synchronous>, transform_indices = @transform_1, window_bounds = array<i64: 40, 1>}, {transform_indices = @transform_2, window_bounds = array<i64: 1, 90, 144>}, {transform_indices = @transform_3, window_bounds = array<i64: 1, 40, 144>}]} {
    %c0 = arith.constant 0 : index
    %c0_0 = arith.constant 0 : index
    %0 = vector.load %arg1[%c0, %c0_0] : memref<40x90xf32, #tpu.memory_space<vmem>>, vector<40x90xf32>
    %c0_1 = arith.constant 0 : index
    %c0_2 = arith.constant 0 : index
    %c0_3 = arith.constant 0 : index
    %1 = vector.load %arg3[%c0_1, %c0_2, %c0_3] : memref<1x90x144xf32, #tpu.memory_space<vmem>>, vector<1x90x144xf32>
    %2 = vector.shape_cast %1 : vector<1x90x144xf32> to vector<90x144xf32>
    %cst = arith.constant dense<0.000000e+00> : vector<40x144xf32>
    %3 = tpu.matmul %0, %2, %cst {dimension_numbers = #tpu.dot_dimension_numbers<[1], [0], [0], [1], [0, 0, 1, 1], [], []>} : vector<40x90xf32>, vector<90x144xf32>, vector<40x144xf32> -> vector<40x144xf32>
    %c0_4 = arith.constant 0 : index
    %c0_5 = arith.constant 0 : index
    %4 = vector.load %arg2[%c0_4, %c0_5] : memref<40x1xf32, #tpu.memory_space<vmem>>, vector<40x1xf32>
    %5 = vector.broadcast %4 : vector<40x1xf32> to vector<40x144xf32>
    %6 = arith.addf %3, %5 : vector<40x144xf32>
    %cst_6 = arith.constant 0.000000e+00 : f32
    %7 = vector.broadcast %cst_6 : f32 to vector<40x144xf32>
    %8 = arith.maximumf %6, %7 : vector<40x144xf32>
    %c0_7 = arith.constant 0 : index
    %c0_8 = arith.constant 0 : index
    %c0_9 = arith.constant 0 : index
    %9 = vector.load %arg4[%c0_7, %c0_8, %c0_9] : memref<1x40x144xf32, #tpu.memory_space<vmem>>, vector<1x40x144xf32>
    %10 = vector.shape_cast %9 : vector<1x40x144xf32> to vector<40x144xf32>
    %11 = vector.shape_cast %8 : vector<40x144xf32> to vector<1x40x144xf32>
    tpu.vector_store %arg4[%c0_7, %c0_8, %c0_9], %11 {strides = array<i32>} : memref<1x40x144xf32, #tpu.memory_space<vmem>>, vector<1x40x144xf32>,
    return
  }
  func.func @transform_0(%arg0: i32) -> (i32, i32) {
    %c0_i32 = arith.constant 0 : i32
    %c0_i32_0 = arith.constant 0 : i32
    %c0_i32_1 = arith.constant 0 : i32
    return %c0_i32, %c0_i32_0 : i32, i32
  }
  func.func @transform_1(%arg0: i32) -> (i32, i32) {
    %c0_i32 = arith.constant 0 : i32
    %c0_i32_0 = arith.constant 0 : i32
    %c0_i32_1 = arith.constant 0 : i32
    return %c0_i32, %c0_i32_0 : i32, i32
  }
  func.func @transform_2(%arg0: i32) -> (i32, i32, i32) {
    %c0_i32 = arith.constant 0 : i32
    %c0_i32_0 = arith.constant 0 : i32
    %c0_i32_1 = arith.constant 0 : i32
    return %arg0, %c0_i32, %c0_i32_0 : i32, i32, i32
  }
  func.func @transform_3(%arg0: i32) -> (i32, i32, i32) {
    %c0_i32 = arith.constant 0 : i32
    %c0_i32_0 = arith.constant 0 : i32
    %c0_i32_1 = arith.constant 0 : i32
    return %arg0, %c0_i32, %c0_i32_0 : i32, i32, i32
  }
}

module attributes {stable_mosaic.version = 11 : i64} {
  func.func @_convT_pool_kernel(%arg0: i32, %arg1: memref<40x360xf32, #tpu.memory_space<vmem>>, %arg2: memref<40x1xf32, #tpu.memory_space<vmem>>, %arg3: memref<1x360x25xf32, #tpu.memory_space<vmem>>, %arg4: memref<1x360x25xf32, #tpu.memory_space<vmem>>, %arg5: memref<1x360x25xf32, #tpu.memory_space<vmem>>, %arg6: memref<1x360x25xf32, #tpu.memory_space<vmem>>, %arg7: memref<1x40x25xf32, #tpu.memory_space<vmem>>) attributes {dimension_semantics = [#tpu.dimension_semantics<parallel>], iteration_bounds = array<i64: 2>, scalar_prefetch = 0 : i64, scratch_operands = 0 : i64, tpu.core_type = #tpu.core_type<tc>, window_params = [{pipeline_mode = #tpu.pipeline_mode<synchronous>, transform_indices = @transform_0, window_bounds = array<i64: 40, 360>}, {pipeline_mode = #tpu.pipeline_mode<synchronous>, transform_indices = @transform_1, window_bounds = array<i64: 40, 1>}, {transform_indices = @transform_2, window_bounds = array<i64: 1, 360, 25>}, {transform_indices = @transform_3, window_bounds = array<i64: 1, 360, 25>}, {transform_indices = @transform_4, window_bounds = array<i64: 1, 360, 25>}, {transform_indices = @transform_5, window_bounds = array<i64: 1, 360, 25>}, {transform_indices = @transform_6, window_bounds = array<i64: 1, 40, 25>}]} {
    %c0 = arith.constant 0 : index
    %c0_0 = arith.constant 0 : index
    %0 = vector.load %arg1[%c0, %c0_0] : memref<40x360xf32, #tpu.memory_space<vmem>>, vector<40x360xf32>
    %c0_1 = arith.constant 0 : index
    %c0_2 = arith.constant 0 : index
    %c0_3 = arith.constant 0 : index
    %1 = vector.load %arg3[%c0_1, %c0_2, %c0_3] : memref<1x360x25xf32, #tpu.memory_space<vmem>>, vector<1x360x25xf32>
    %2 = vector.shape_cast %1 : vector<1x360x25xf32> to vector<360x25xf32>
    %cst = arith.constant dense<0.000000e+00> : vector<40x25xf32>
    %3 = tpu.matmul %0, %2, %cst {dimension_numbers = #tpu.dot_dimension_numbers<[1], [0], [0], [1], [0, 0, 1, 1], [], []>} : vector<40x360xf32>, vector<360x25xf32>, vector<40x25xf32> -> vector<40x25xf32>
    %c0_4 = arith.constant 0 : index
    %c0_5 = arith.constant 0 : index
    %c0_6 = arith.constant 0 : index
    %4 = vector.load %arg4[%c0_4, %c0_5, %c0_6] : memref<1x360x25xf32, #tpu.memory_space<vmem>>, vector<1x360x25xf32>
    %5 = vector.shape_cast %4 : vector<1x360x25xf32> to vector<360x25xf32>
    %cst_7 = arith.constant dense<0.000000e+00> : vector<40x25xf32>
    %6 = tpu.matmul %0, %5, %cst_7 {dimension_numbers = #tpu.dot_dimension_numbers<[1], [0], [0], [1], [0, 0, 1, 1], [], []>} : vector<40x360xf32>, vector<360x25xf32>, vector<40x25xf32> -> vector<40x25xf32>
    %7 = arith.maximumf %3, %6 : vector<40x25xf32>
    %c0_8 = arith.constant 0 : index
    %c0_9 = arith.constant 0 : index
    %c0_10 = arith.constant 0 : index
    %8 = vector.load %arg5[%c0_8, %c0_9, %c0_10] : memref<1x360x25xf32, #tpu.memory_space<vmem>>, vector<1x360x25xf32>
    %9 = vector.shape_cast %8 : vector<1x360x25xf32> to vector<360x25xf32>
    %cst_11 = arith.constant dense<0.000000e+00> : vector<40x25xf32>
    %10 = tpu.matmul %0, %9, %cst_11 {dimension_numbers = #tpu.dot_dimension_numbers<[1], [0], [0], [1], [0, 0, 1, 1], [], []>} : vector<40x360xf32>, vector<360x25xf32>, vector<40x25xf32> -> vector<40x25xf32>
    %11 = arith.maximumf %7, %10 : vector<40x25xf32>
    %c0_12 = arith.constant 0 : index
    %c0_13 = arith.constant 0 : index
    %c0_14 = arith.constant 0 : index
    %12 = vector.load %arg6[%c0_12, %c0_13, %c0_14] : memref<1x360x25xf32, #tpu.memory_space<vmem>>, vector<1x360x25xf32>
    %13 = vector.shape_cast %12 : vector<1x360x25xf32> to vector<360x25xf32>
    %cst_15 = arith.constant dense<0.000000e+00> : vector<40x25xf32>
    %14 = tpu.matmul %0, %13, %cst_15 {dimension_numbers = #tpu.dot_dimension_numbers<[1], [0], [0], [1], [0, 0, 1, 1], [], []>} : vector<40x360xf32>, vector<360x25xf32>, vector<40x25xf32> -> vector<40x25xf32>
    %15 = arith.maximumf %11, %14 : vector<40x25xf32>
    %c0_16 = arith.constant 0 : index
    %c0_17 = arith.constant 0 : index
    %16 = vector.load %arg2[%c0_16, %c0_17] : memref<40x1xf32, #tpu.memory_space<vmem>>, vector<40x1xf32>
    %17 = vector.broadcast %16 : vector<40x1xf32> to vector<40x25xf32>
    %18 = arith.addf %15, %17 : vector<40x25xf32>
    %cst_18 = arith.constant 0.000000e+00 : f32
    %19 = vector.broadcast %cst_18 : f32 to vector<40x25xf32>
    %20 = arith.maximumf %18, %19 : vector<40x25xf32>
    %c0_19 = arith.constant 0 : index
    %c0_20 = arith.constant 0 : index
    %c0_21 = arith.constant 0 : index
    %21 = vector.load %arg7[%c0_19, %c0_20, %c0_21] : memref<1x40x25xf32, #tpu.memory_space<vmem>>, vector<1x40x25xf32>
    %22 = vector.shape_cast %21 : vector<1x40x25xf32> to vector<40x25xf32>
    %23 = vector.shape_cast %20 : vector<40x25xf32> to vector<1x40x25xf32>
    tpu.vector_store %arg7[%c0_19, %c0_20, %c0_21], %23 {strides = array<i32>} : memref<1x40x25xf32, #tpu.memory_space<vmem>>, vector<1x40x25xf32>,
    return
  }
  func.func @transform_0(%arg0: i32) -> (i32, i32) {
    %c0_i32 = arith.constant 0 : i32
    %c0_i32_0 = arith.constant 0 : i32
    %c0_i32_1 = arith.constant 0 : i32
    return %c0_i32, %c0_i32_0 : i32, i32
  }
  func.func @transform_1(%arg0: i32) -> (i32, i32) {
    %c0_i32 = arith.constant 0 : i32
    %c0_i32_0 = arith.constant 0 : i32
    %c0_i32_1 = arith.constant 0 : i32
    return %c0_i32, %c0_i32_0 : i32, i32
  }
  func.func @transform_2(%arg0: i32) -> (i32, i32, i32) {
    %c0_i32 = arith.constant 0 : i32
    %c0_i32_0 = arith.constant 0 : i32
    %c0_i32_1 = arith.constant 0 : i32
    return %arg0, %c0_i32, %c0_i32_0 : i32, i32, i32
  }
  func.func @transform_3(%arg0: i32) -> (i32, i32, i32) {
    %c0_i32 = arith.constant 0 : i32
    %c0_i32_0 = arith.constant 0 : i32
    %c0_i32_1 = arith.constant 0 : i32
    return %arg0, %c0_i32, %c0_i32_0 : i32, i32, i32
  }
  func.func @transform_4(%arg0: i32) -> (i32, i32, i32) {
    %c0_i32 = arith.constant 0 : i32
    %c0_i32_0 = arith.constant 0 : i32
    %c0_i32_1 = arith.constant 0 : i32
    return %arg0, %c0_i32, %c0_i32_0 : i32, i32, i32
  }
  func.func @transform_5(%arg0: i32) -> (i32, i32, i32) {
    %c0_i32 = arith.constant 0 : i32
    %c0_i32_0 = arith.constant 0 : i32
    %c0_i32_1 = arith.constant 0 : i32
    return %arg0, %c0_i32, %c0_i32_0 : i32, i32, i32
  }
  func.func @transform_6(%arg0: i32) -> (i32, i32, i32) {
    %c0_i32 = arith.constant 0 : i32
    %c0_i32_0 = arith.constant 0 : i32
    %c0_i32_1 = arith.constant 0 : i32
    return %arg0, %c0_i32, %c0_i32_0 : i32, i32, i32
  }
}

module attributes {stable_mosaic.version = 11 : i64} {
  func.func @_fc_tail_kernel(%arg0: i32, %arg1: memref<2x1000xf32, #tpu.memory_space<vmem>>, %arg2: memref<1000x500xf32, #tpu.memory_space<vmem>>, %arg3: memref<1x500xf32, #tpu.memory_space<vmem>>, %arg4: memref<500x250xf32, #tpu.memory_space<vmem>>, %arg5: memref<1x250xf32, #tpu.memory_space<vmem>>, %arg6: memref<250x100xf32, #tpu.memory_space<vmem>>, %arg7: memref<1x100xf32, #tpu.memory_space<vmem>>, %arg8: memref<100x10xf32, #tpu.memory_space<vmem>>, %arg9: memref<1x10xf32, #tpu.memory_space<vmem>>, %arg10: memref<2x10xf32, #tpu.memory_space<vmem>>) attributes {dimension_semantics = [#tpu.dimension_semantics<arbitrary>], iteration_bounds = array<i64: 1>, scalar_prefetch = 0 : i64, scratch_operands = 0 : i64, tpu.core_type = #tpu.core_type<tc>, window_params = [{pipeline_mode = #tpu.pipeline_mode<synchronous>, transform_indices = @transform_0, window_bounds = array<i64: 2, 1000>}, {pipeline_mode = #tpu.pipeline_mode<synchronous>, transform_indices = @transform_1, window_bounds = array<i64: 1000, 500>}, {pipeline_mode = #tpu.pipeline_mode<synchronous>, transform_indices = @transform_2, window_bounds = array<i64: 1, 500>}, {pipeline_mode = #tpu.pipeline_mode<synchronous>, transform_indices = @transform_3, window_bounds = array<i64: 500, 250>}, {pipeline_mode = #tpu.pipeline_mode<synchronous>, transform_indices = @transform_4, window_bounds = array<i64: 1, 250>}, {pipeline_mode = #tpu.pipeline_mode<synchronous>, transform_indices = @transform_5, window_bounds = array<i64: 250, 100>}, {pipeline_mode = #tpu.pipeline_mode<synchronous>, transform_indices = @transform_6, window_bounds = array<i64: 1, 100>}, {pipeline_mode = #tpu.pipeline_mode<synchronous>, transform_indices = @transform_7, window_bounds = array<i64: 100, 10>}, {pipeline_mode = #tpu.pipeline_mode<synchronous>, transform_indices = @transform_8, window_bounds = array<i64: 1, 10>}, {pipeline_mode = #tpu.pipeline_mode<synchronous>, transform_indices = @transform_9, window_bounds = array<i64: 2, 10>}]} {
    %c0 = arith.constant 0 : index
    %c0_0 = arith.constant 0 : index
    %0 = vector.load %arg1[%c0, %c0_0] : memref<2x1000xf32, #tpu.memory_space<vmem>>, vector<2x1000xf32>
    %c0_1 = arith.constant 0 : index
    %c0_2 = arith.constant 0 : index
    %1 = vector.load %arg2[%c0_1, %c0_2] : memref<1000x500xf32, #tpu.memory_space<vmem>>, vector<1000x500xf32>
    %cst = arith.constant dense<0.000000e+00> : vector<2x500xf32>
    %2 = tpu.matmul %0, %1, %cst {dimension_numbers = #tpu.dot_dimension_numbers<[1], [0], [0], [1], [0, 0, 1, 1], [], []>} : vector<2x1000xf32>, vector<1000x500xf32>, vector<2x500xf32> -> vector<2x500xf32>
    %c0_3 = arith.constant 0 : index
    %c0_4 = arith.constant 0 : index
    %3 = vector.load %arg3[%c0_3, %c0_4] : memref<1x500xf32, #tpu.memory_space<vmem>>, vector<1x500xf32>
    %4 = vector.broadcast %3 : vector<1x500xf32> to vector<2x500xf32>
    %5 = arith.addf %2, %4 : vector<2x500xf32>
    %cst_5 = arith.constant 0.000000e+00 : f32
    %6 = vector.broadcast %cst_5 : f32 to vector<2x500xf32>
    %7 = arith.maximumf %5, %6 : vector<2x500xf32>
    %c0_6 = arith.constant 0 : index
    %c0_7 = arith.constant 0 : index
    %8 = vector.load %arg4[%c0_6, %c0_7] : memref<500x250xf32, #tpu.memory_space<vmem>>, vector<500x250xf32>
    %cst_8 = arith.constant dense<0.000000e+00> : vector<2x250xf32>
    %9 = tpu.matmul %7, %8, %cst_8 {dimension_numbers = #tpu.dot_dimension_numbers<[1], [0], [0], [1], [0, 0, 1, 1], [], []>} : vector<2x500xf32>, vector<500x250xf32>, vector<2x250xf32> -> vector<2x250xf32>
    %c0_9 = arith.constant 0 : index
    %c0_10 = arith.constant 0 : index
    %10 = vector.load %arg5[%c0_9, %c0_10] : memref<1x250xf32, #tpu.memory_space<vmem>>, vector<1x250xf32>
    %11 = vector.broadcast %10 : vector<1x250xf32> to vector<2x250xf32>
    %12 = arith.addf %9, %11 : vector<2x250xf32>
    %cst_11 = arith.constant 0.000000e+00 : f32
    %13 = vector.broadcast %cst_11 : f32 to vector<2x250xf32>
    %14 = arith.maximumf %12, %13 : vector<2x250xf32>
    %c0_12 = arith.constant 0 : index
    %c0_13 = arith.constant 0 : index
    %15 = vector.load %arg6[%c0_12, %c0_13] : memref<250x100xf32, #tpu.memory_space<vmem>>, vector<250x100xf32>
    %cst_14 = arith.constant dense<0.000000e+00> : vector<2x100xf32>
    %16 = tpu.matmul %14, %15, %cst_14 {dimension_numbers = #tpu.dot_dimension_numbers<[1], [0], [0], [1], [0, 0, 1, 1], [], []>} : vector<2x250xf32>, vector<250x100xf32>, vector<2x100xf32> -> vector<2x100xf32>
    %c0_15 = arith.constant 0 : index
    %c0_16 = arith.constant 0 : index
    %17 = vector.load %arg7[%c0_15, %c0_16] : memref<1x100xf32, #tpu.memory_space<vmem>>, vector<1x100xf32>
    %18 = vector.broadcast %17 : vector<1x100xf32> to vector<2x100xf32>
    %19 = arith.addf %16, %18 : vector<2x100xf32>
    %cst_17 = arith.constant 0.000000e+00 : f32
    %20 = vector.broadcast %cst_17 : f32 to vector<2x100xf32>
    %21 = arith.maximumf %19, %20 : vector<2x100xf32>
    %c0_18 = arith.constant 0 : index
    %c0_19 = arith.constant 0 : index
    %22 = vector.load %arg8[%c0_18, %c0_19] : memref<100x10xf32, #tpu.memory_space<vmem>>, vector<100x10xf32>
    %cst_20 = arith.constant dense<0.000000e+00> : vector<2x10xf32>
    %23 = tpu.matmul %21, %22, %cst_20 {dimension_numbers = #tpu.dot_dimension_numbers<[1], [0], [0], [1], [0, 0, 1, 1], [], []>} : vector<2x100xf32>, vector<100x10xf32>, vector<2x10xf32> -> vector<2x10xf32>
    %c0_21 = arith.constant 0 : index
    %c0_22 = arith.constant 0 : index
    %24 = vector.load %arg9[%c0_21, %c0_22] : memref<1x10xf32, #tpu.memory_space<vmem>>, vector<1x10xf32>
    %25 = vector.broadcast %24 : vector<1x10xf32> to vector<2x10xf32>
    %26 = arith.addf %23, %25 : vector<2x10xf32>
    %c0_23 = arith.constant 0 : index
    %c0_24 = arith.constant 0 : index
    %27 = vector.load %arg10[%c0_23, %c0_24] : memref<2x10xf32, #tpu.memory_space<vmem>>, vector<2x10xf32>
    tpu.vector_store %arg10[%c0_23, %c0_24], %26 {strides = array<i32>} : memref<2x10xf32, #tpu.memory_space<vmem>>, vector<2x10xf32>,
    return
  }
  func.func @transform_0(%arg0: i32) -> (i32, i32) {
    %c0_i32 = arith.constant 0 : i32
    %c0_i32_0 = arith.constant 0 : i32
    %c0_i32_1 = arith.constant 0 : i32
    return %c0_i32, %c0_i32_0 : i32, i32
  }
  func.func @transform_1(%arg0: i32) -> (i32, i32) {
    %c0_i32 = arith.constant 0 : i32
    %c0_i32_0 = arith.constant 0 : i32
    %c0_i32_1 = arith.constant 0 : i32
    return %c0_i32, %c0_i32_0 : i32, i32
  }
  func.func @transform_2(%arg0: i32) -> (i32, i32) {
    %c0_i32 = arith.constant 0 : i32
    %c0_i32_0 = arith.constant 0 : i32
    %c0_i32_1 = arith.constant 0 : i32
    return %c0_i32, %c0_i32_0 : i32, i32
  }
  func.func @transform_3(%arg0: i32) -> (i32, i32) {
    %c0_i32 = arith.constant 0 : i32
    %c0_i32_0 = arith.constant 0 : i32
    %c0_i32_1 = arith.constant 0 : i32
    return %c0_i32, %c0_i32_0 : i32, i32
  }
  func.func @transform_4(%arg0: i32) -> (i32, i32) {
    %c0_i32 = arith.constant 0 : i32
    %c0_i32_0 = arith.constant 0 : i32
    %c0_i32_1 = arith.constant 0 : i32
    return %c0_i32, %c0_i32_0 : i32, i32
  }
  func.func @transform_5(%arg0: i32) -> (i32, i32) {
    %c0_i32 = arith.constant 0 : i32
    %c0_i32_0 = arith.constant 0 : i32
    %c0_i32_1 = arith.constant 0 : i32
    return %c0_i32, %c0_i32_0 : i32, i32
  }
  func.func @transform_6(%arg0: i32) -> (i32, i32) {
    %c0_i32 = arith.constant 0 : i32
    %c0_i32_0 = arith.constant 0 : i32
    %c0_i32_1 = arith.constant 0 : i32
    return %c0_i32, %c0_i32_0 : i32, i32
  }
  func.func @transform_7(%arg0: i32) -> (i32, i32) {
    %c0_i32 = arith.constant 0 : i32
    %c0_i32_0 = arith.constant 0 : i32
    %c0_i32_1 = arith.constant 0 : i32
    return %c0_i32, %c0_i32_0 : i32, i32
  }
  func.func @transform_8(%arg0: i32) -> (i32, i32) {
    %c0_i32 = arith.constant 0 : i32
    %c0_i32_0 = arith.constant 0 : i32
    %c0_i32_1 = arith.constant 0 : i32
    return %c0_i32, %c0_i32_0 : i32, i32
  }
  func.func @transform_9(%arg0: i32) -> (i32, i32) {
    %c0_i32 = arith.constant 0 : i32
    %c0_i32_0 = arith.constant 0 : i32
    %c0_i32_1 = arith.constant 0 : i32
    return %c0_i32, %c0_i32_0 : i32, i32
  }
}

</mosaic_0001>

<bundles_post_ra>
// kernel: net_forward.5
= control target key start
LH: loop header
LB: loop body
LE: loop exit
PB: predicated region body
PF: predicated region fallthrough
CT: control target
= control target key end

     0   :  { %s598_s12 = smov 0   ;;  %s707_s0 = inlined_call_operand.vmem [shape: f32[10,27], index: 0, kind: input, shape index: {}]   ;;  %s708_s1 = inlined_call_operand.vmem [shape: f32[10,1], index: 1, kind: input, shape index: {}]   ;;  %s709_s2 = inlined_call_operand.vmem [shape: f32[2,27,900], index: 2, kind: input, shape index: {}]   ;;  %s710_s3 = inlined_call_operand.vmem [shape: f32[2,10,900], index: 3, kind: output, shape index: {}]  }
   0x1 LB: > { %s522_s13 = sadd.s32 4294967295, %s575_s12   ;;  %p526_p0 = scmp.ge.s32.totalorder %s575_s12, 1  ;;  %s575_s12 = sphi %s598_s12, %s13_s12  }
   0x2   : > { %p137_p1 = scmp.lt.s32.totalorder %s575_s12, 3 }
   0x4   : > { %p138_p2 = pnand %p526_p0, %p137_p1 }
   0x5   : > { %p161_p3 = scmp.lt.s32.totalorder (!%p138_p2), %s522_s13, 1 }
   0x6   : > { %141 = sbr.rel (%p138_p2) target bundleno = 186 (0xba), region = 32 }
   0xb   : > { %v205_v0 = vld [vmem:[%s708_s1] sm:$0xff]  ;;  %s712_s13 = smov (!%p161_p3, %s522_s13), 1  ;;  %v577_v1 = vmov 0   ;;  %vm224_vm0 = vcmask 1042432   ;;  %vm217_vm1 = vcmask 220160   ;;  %vm456_vm2 = vcmask 31744  }
   0xc   : > { %568 = vset.pattern.permute.xlu0 %v577_v1  ;;  %s557_s16 = sshll.u32 %s712_s13, 8  ;;  %v171_v18 = vld [vmem:[%s707_s0] sm:$0xff]  ;;  %v172_v31 = vld [vmem:[%s707_s0 + $0x8] sm:$0x3]  ;;  %s558_s26 = sshll.u32 %s712_s13, 7  ;;  %vm465_vm3 = vcmask 25600  }
   0xd   : > { %209 = vperm.xlu0 %568, %v205_v0   ;;  %s615_s19 = scalar_lea.vmem %s709_s2, %s557_s16  ;;  %v206_v36 = vld [vmem:[%s708_s1 + $0x8] sm:$0x3]  ;;  %s686_s29 = scalar_lea.vmem %s710_s3, %s558_s26 }
   0xe   : > { %v197_v2 = vld [vmem:[%s615_s19 + $0xc0] sm:$0x7]  ;;  %v198_v3 = vld [vmem:[%s615_s19 + $0xc8] sm:$0x7]  ;;  %v199_v4 = vld [vmem:[%s615_s19 + $0xd0] sm:$0x7] }
   0xf   : > { %531 = vmatpush.msk.msra.mxu0 %vm224_vm0, %v197_v2  ;;  %534 = vmatpush.msk.msra.mxu1 %vm224_vm0, %v198_v3  ;;  %v200_v5 = vld [vmem:[%s615_s19 + $0xd8] sm:$0x7]  ;;  %v189_v6 = vld [vmem:[%s615_s19 + $0x80] sm:$0xff]  ;;  %v190_v7 = vld [vmem:[%s615_s19 + $0x88] sm:$0xff] }
  0x10   : > { %537 = vmatpush.msk.msra.mxu2 %vm224_vm0, %v199_v4  ;;  %540 = vmatpush.msk.msra.mxu3 %vm224_vm0, %v200_v5  ;;  %v191_v8 = vld [vmem:[%s615_s19 + $0x90] sm:$0xff]  ;;  %v192_v9 = vld [vmem:[%s615_s19 + $0x98] sm:$0xff]  ;;  %v181_v10 = vld [vmem:[%s615_s19 + $0x40] sm:$0xff] }
  0x11   : > { %262 = vmatpush.msra.mxu0 %v189_v6  ;;  %285 = vmatpush.msra.mxu1 %v190_v7  ;;  %v182_v11 = vld [vmem:[%s615_s19 + $0x48] sm:$0xff]  ;;  %v183_v12 = vld [vmem:[%s615_s19 + $0x50] sm:$0xff]  ;;  %v184_v13 = vld [vmem:[%s615_s19 + $0x58] sm:$0xff] }
  0x12   : > { %308 = vmatpush.msra.mxu2 %v191_v8  ;;  %331 = vmatpush.msra.mxu3 %v192_v9  ;;  %v173_v14 = vld [vmem:[%s615_s19] sm:$0xff]  ;;  %v174_v15 = vld [vmem:[%s615_s19 + $0x8] sm:$0xff]  ;;  %v175_v16 = vld [vmem:[%s615_s19 + $0x10] sm:$0xff] }
  0x13   : > { %263 = vmatpush.msra.mxu0 %v181_v10  ;;  %286 = vmatpush.msra.mxu1 %v182_v11  ;;  %v176_v17 = vld [vmem:[%s615_s19 + $0x18] sm:$0xff]  ;;  %v203_v19 = vld [vmem:[%s615_s19 + $0xf0] sm:$0x7]  ;;  %v201_v21 = vld [vmem:[%s615_s19 + $0xe0] sm:$0x7] }
  0x14   : > { %309 = vmatpush.msra.mxu2 %v183_v12  ;;  %332 = vmatpush.msra.mxu3 %v184_v13  ;;  %v204_v20 = vld [vmem:[%s615_s19 + $0xf8] sm:$0x7]  ;;  %v202_v22 = vld [vmem:[%s615_s19 + $0xe8] sm:$0x7]  ;;  %v195_v23 = vld [vmem:[%s615_s19 + $0xb0] sm:$0xff] }
  0x15   : > { %264 = vmatpush.msra.mxu0 %v173_v14  ;;  %287 = vmatpush.msra.mxu1 %v174_v15  ;;  %v196_v24 = vld [vmem:[%s615_s19 + $0xb8] sm:$0xff]  ;;  %v193_v25 = vld [vmem:[%s615_s19 + $0xa0] sm:$0xff]  ;;  %v194_v26 = vld [vmem:[%s615_s19 + $0xa8] sm:$0xff] }
  0x16   : > { %310 = vmatpush.msra.mxu2 %v175_v16  ;;  %333 = vmatpush.msra.mxu3 %v176_v17  ;;  %v187_v27 = vld [vmem:[%s615_s19 + $0x70] sm:$0xff]  ;;  %v188_v28 = vld [vmem:[%s615_s19 + $0x78] sm:$0xff]  ;;  %v185_v29 = vld [vmem:[%s615_s19 + $0x60] sm:$0xff] }
  0x17   : > { %532 = vmatmul.msk.f32.vlgmr.msra.gmra.mxu0 %vm217_vm1, %v171_v18  ;;  %535 = vmatmul.msk.f32.vlgmr.msra.gmra.mxu1 %vm217_vm1, %v171_v18  ;;  %v186_v30 = vld [vmem:[%s615_s19 + $0x68] sm:$0xff]  ;;  %v179_v32 = vld [vmem:[%s615_s19 + $0x30] sm:$0xff]  ;;  %v180_v33 = vld [vmem:[%s615_s19 + $0x38] sm:$0xff] }
  0x18   : > { %538 = vmatmul.msk.f32.vlgmr.msra.gmra.mxu2 %vm217_vm1, %v171_v18  ;;  %541 = vmatmul.msk.f32.vlgmr.msra.gmra.mxu3 %vm217_vm1, %v171_v18  ;;  %v177_v34 = vld [vmem:[%s615_s19 + $0x20] sm:$0xff]  ;;  %v178_v35 = vld [vmem:[%s615_s19 + $0x28] sm:$0xff] }
  0x19   : > { %549 = vmatpush.msk.msrb.mxu2 %vm224_vm0, %v203_v19  ;;  %552 = vmatpush.msk.msrb.mxu3 %vm224_vm0, %v204_v20 }
  0x1a   : > { %543 = vmatpush.msk.msrb.mxu0 %vm224_vm0, %v201_v21  ;;  %546 = vmatpush.msk.msrb.mxu1 %vm224_vm0, %v202_v22 }
  0x1b   : > { %400 = vmatpush.msrb.mxu2 %v195_v23  ;;  %423 = vmatpush.msrb.mxu3 %v196_v24 }
  0x1c   : > { %354 = vmatpush.msrb.mxu0 %v193_v25  ;;  %377 = vmatpush.msrb.mxu1 %v194_v26 }
  0x1d   : > { %401 = vmatpush.msrb.mxu2 %v187_v27  ;;  %424 = vmatpush.msrb.mxu3 %v188_v28 }
  0x1e   : > { %355 = vmatpush.msrb.mxu0 %v185_v29  ;;  %378 = vmatpush.msrb.mxu1 %v186_v30 }
  0x1f   : > { %533 = vmatmul.msk.f32.gmra.mxu0 %vm217_vm1, %v172_v31  ;;  %536 = vmatmul.msk.f32.gmra.mxu1 %vm217_vm1, %v172_v31 }
  0x20   : > { %539 = vmatmul.msk.f32.gmra.mxu2 %vm217_vm1, %v172_v31  ;;  %542 = vmatmul.msk.f32.gmra.mxu3 %vm217_vm1, %v172_v31 }
  0x21   : > { %402 = vmatpush.msrb.mxu2 %v179_v32  ;;  %425 = vmatpush.msrb.mxu3 %v180_v33 }
  0x22   : > { %356 = vmatpush.msrb.mxu0 %v177_v34  ;;  %379 = vmatpush.msrb.mxu1 %v178_v35 }
  0x23   : > { %214 = vperm.xlu0 %568, %v206_v36  }
  0x27   : > { %544 = vmatmul.msk.f32.vlgmr.msrb.gmra.mxu0 %vm217_vm1, %v171_v18  ;;  %547 = vmatmul.msk.f32.vlgmr.msrb.gmra.mxu1 %vm217_vm1, %v171_v18 }
  0x28   : > { %550 = vmatmul.msk.f32.vlgmr.msrb.gmra.mxu2 %vm217_vm1, %v171_v18  ;;  %553 = vmatmul.msk.f32.vlgmr.msrb.gmra.mxu3 %vm217_vm1, %v171_v18 }
  0x2f   : > { %545 = vmatmul.msk.f32.gmra.mxu0 %vm217_vm1, %v172_v31  ;;  %548 = vmatmul.msk.f32.gmra.mxu1 %vm217_vm1, %v172_v31 }
  0x30   : > { %551 = vmatmul.msk.f32.gmra.mxu2 %vm217_vm1, %v172_v31  ;;  %554 = vmatmul.msk.f32.gmra.mxu3 %vm217_vm1, %v172_v31 }
  0x7f   : > { %v210_v37 = vpop.permute.xlu0 %209 }
  0x94   : > { %v266_v38 = vpop.f32.mrf.mxu0  ;;  %v289_v39 = vpop.f32.mrf.mxu1 }
  0x95   : > { %v267_v40 = vadd.f32 %v266_v38, %v210_v37  ;;  %v290_v41 = vadd.f32 %v289_v39, %v210_v37  ;;  %v215_v44 = vpop.permute.xlu0 %214 }
  0x97   : > { %v433_v42 = vmax.f32 %v267_v40, 0.0  ;;  %v434_v43 = vmax.f32 %v290_v41, 0.0 }
  0x99   : > { %449 = vst [vmem:[%s686_s29] sm:$0xff] %v433_v42 }
  0x9a   : > { %450 = vst [vmem:[%s686_s29 + $0x8] sm:$0xff] %v434_v43 }
  0x9b   : > { %v312_v45 = vpop.f32.mrf.mxu2  ;;  %v335_v46 = vpop.f32.mrf.mxu3 }
  0x9c   : > { %v313_v47 = vadd.f32 %v312_v45, %v210_v37  ;;  %v336_v48 = vadd.f32 %v335_v46, %v210_v37  ;;  %v269_v49 = vpop.f32.mrf.mxu0  ;;  %v292_v50 = vpop.f32.mrf.mxu1 }
  0x9d   : > { %v270_v51 = vadd.f32 %v269_v49, %v215_v44  ;;  %v293_v52 = vadd.f32 %v292_v50, %v215_v44 }
  0x9e   : > { %v435_v53 = vmax.f32 %v313_v47, 0.0  ;;  %v436_v54 = vmax.f32 %v336_v48, 0.0 }
  0x9f   : > { %v441_v55 = vmax.f32 %v270_v51, 0.0  ;;  %v442_v56 = vmax.f32 %v293_v52, 0.0 }
  0xa0   : > { %451 = vst [vmem:[%s686_s29 + $0x10] sm:$0xff] %v435_v53 }
  0xa1   : > { %452 = vst [vmem:[%s686_s29 + $0x18] sm:$0xff] %v436_v54 }
  0xa2   : > { %458 = vst [vmem:[%s686_s29 + $0x40] sm:$0x3] %v441_v55 }
  0xa3   : > { %459 = vst [vmem:[%s686_s29 + $0x48] sm:$0x3] %v442_v56  ;;  %v315_v57 = vpop.f32.mrf.mxu2  ;;  %v338_v58 = vpop.f32.mrf.mxu3 }
  0xa4   : > { %v316_v59 = vadd.f32 %v315_v57, %v215_v44  ;;  %v339_v60 = vadd.f32 %v338_v58, %v215_v44  ;;  %v358_v61 = vpop.f32.mrf.mxu0  ;;  %v381_v62 = vpop.f32.mrf.mxu1 }
  0xa5   : > { %v359_v63 = vadd.f32 %v358_v61, %v210_v37  ;;  %v382_v0 = vadd.f32 %v381_v62, %v210_v37 }
  0xa6   : > { %v443_v1 = vmax.f32 %v316_v59, 0.0  ;;  %v444_v2 = vmax.f32 %v339_v60, 0.0 }
  0xa7   : > { %v437_v3 = vmax.f32 %v359_v63, 0.0  ;;  %v438_v4 = vmax.f32 %v382_v0, 0.0 }
  0xa8   : > { %460 = vst [vmem:[%s686_s29 + $0x50] sm:$0x3] %v443_v1 }
  0xa9   : > { %461 = vst [vmem:[%s686_s29 + $0x58] sm:$0x3] %v444_v2 }
  0xaa   : > { %453 = vst [vmem:[%s686_s29 + $0x20] sm:$0xff] %v437_v3 }
  0xab   : > { %454 = vst [vmem:[%s686_s29 + $0x28] sm:$0xff] %v438_v4  ;;  %v404_v5 = vpop.f32.mrf.mxu2  ;;  %v427_v6 = vpop.f32.mrf.mxu3 }
  0xac   : > { %v405_v7 = vadd.f32 %v404_v5, %v210_v37  ;;  %v428_v8 = vadd.f32 %v427_v6, %v210_v37  ;;  %v361_v9 = vpop.f32.mrf.mxu0  ;;  %v384_v10 = vpop.f32.mrf.mxu1 }
  0xad   : > { %v362_v11 = vadd.f32 %v361_v9, %v215_v44  ;;  %v385_v12 = vadd.f32 %v384_v10, %v215_v44 }
  0xae   : > { %v439_v13 = vmax.f32 %v405_v7, 0.0  ;;  %v440_v14 = vmax.f32 %v428_v8, 0.0 }
  0xaf   : > { %v445_v15 = vmax.f32 %v362_v11, 0.0  ;;  %v446_v16 = vmax.f32 %v385_v12, 0.0 }
  0xb0   : > { %455 = vst [vmem:[%s686_s29 + $0x30] sm:$0xff] %v439_v13 }
  0xb1   : > { %457 = vst.msk [vmem:[%s686_s29 + $0x38] sm:$0xff] %vm456_vm2, %v440_v14 }
  0xb2   : > { %462 = vst [vmem:[%s686_s29 + $0x60] sm:$0x3] %v445_v15 }
  0xb3   : > { %463 = vst [vmem:[%s686_s29 + $0x68] sm:$0x3] %v446_v16  ;;  %v407_v17 = vpop.f32.mrf.mxu2  ;;  %v430_v18 = vpop.f32.mrf.mxu3 }
  0xb4   : > { %v408_v19 = vadd.f32 %v407_v17, %v215_v44  ;;  %v431_v20 = vadd.f32 %v430_v18, %v215_v44 }
  0xb6   : > { %v447_v21 = vmax.f32 %v408_v19, 0.0  ;;  %v448_v22 = vmax.f32 %v431_v20, 0.0 }
  0xb8   : > { %464 = vst [vmem:[%s686_s29 + $0x70] sm:$0x3] %v447_v21 }
  0xb9   : > { %466 = vst.msk [vmem:[%s686_s29 + $0x78] sm:$0x3] %vm465_vm3, %v448_v22 }
  0xba PF: > { %s13_s12 = sadd.s32 1, %s575_s12  }
  0xbb   : > { %p10_p4 = scmp.ge.s32.totalorder %s13_s12, 4  }
  0xbd   :  { %12 = sbr.rel (!%p10_p4) target bundleno = 1 (0x1), region = 62 }

// kernel: net_forward.6
= control target key start
LH: loop header
LB: loop body
LE: loop exit
PB: predicated region body
PF: predicated region fallthrough
CT: control target
= control target key end

     0   :  { %s848_s21 = smov 0   ;;  %s1034_s0 = inlined_call_operand.vmem [shape: f32[10,90], index: 0, kind: input, shape index: {}]   ;;  %s1035_s1 = inlined_call_operand.vmem [shape: f32[10,1], index: 1, kind: input, shape index: {}]   ;;  %s1036_s2 = inlined_call_operand.vmem [shape: f32[2,90,196], index: 2, kind: input, shape index: {}]   ;;  %s1037_s3 = inlined_call_operand.vmem [shape: f32[2,90,196], index: 3, kind: input, shape index: {}]   ;;  %s1038_s4 = inlined_call_operand.vmem [shape: f32[2,90,196], index: 4, kind: input, shape index: {}]   ;;  %s1039_s5 = inlined_call_operand.vmem [shape: f32[2,90,196], index: 5, kind: input, shape index: {}]   ;;  %s1040_s6 = inlined_call_operand.vmem [shape: f32[2,10,196], index: 6, kind: output, shape index: {}]  }
   0x1 LB: > { %s755_s22 = sadd.s32 4294967295, %s810_s21   ;;  %p759_p0 = scmp.ge.s32.totalorder %s810_s21, 1  ;;  %s810_s21 = sphi %s848_s21, %s16_s21  }
   0x2   : > { %p242_p1 = scmp.lt.s32.totalorder %s810_s21, 3 }
   0x4   : > { %p243_p2 = pnand %p759_p0, %p242_p1 }
   0x5   : > { %p287_p3 = scmp.lt.s32.totalorder (!%p243_p2), %s755_s22, 1 }
   0x6   : > { %246 = sbr.rel (%p243_p2) target bundleno = 217 (0xd9), region = 44 }
   0xb   : > { %s1042_s22 = smov (!%p287_p3, %s755_s22), 1  ;;  %vm345_vm0 = vcmask 1041408   ;;  %v956_v60 = vld [vmem:[%s1034_s0] sm:$0xff]  ;;  %vm338_vm1 = vcmask 736256   ;;  %vm659_vm2 = vcmask 556032   ;;  %vm662_vm3 = vcmask 549888  }
   0xc   : > { %s859_s23 = smul.u32 192, %s1042_s22  ;;  %s792_s20 = sshll.u32 %s1042_s22, 5 }
   0xd   : > { %s311_s25 = scalar_lea.vmem %s1040_s6, %s792_s20 }
   0xe   : > { %s865_s26 = scalar_lea.vmem %s1036_s2, %s859_s23  ;;  %s871_s29 = scalar_lea.vmem %s1037_s3, %s859_s23 }
   0xf   : > { %v336_v0 = vld [vmem:[%s865_s26 + $0xb0] sm:$0x3]  ;;  %v337_v1 = vld [vmem:[%s865_s26 + $0xb8] sm:$0x3]  ;;  %v334_v4 = vld [vmem:[%s865_s26 + $0xa0] sm:$0xff]  ;;  %s925_s8 = scalar_lea.vmem %s1038_s4, %s859_s23  ;;  %s933_s11 = scalar_lea.vmem %s1039_s5, %s859_s23 }
  0x10   : > { %v420_v2 = vld [vmem:[%s871_s29 + $0xb0] sm:$0x3]  ;;  %766 = vmatpush.msk.msra.mxu0 %vm345_vm0, %v336_v0  ;;  %769 = vmatpush.msk.msra.mxu1 %vm345_vm0, %v337_v1  ;;  %v421_v3 = vld [vmem:[%s871_s29 + $0xb8] sm:$0x3]  ;;  %v335_v5 = vld [vmem:[%s865_s26 + $0xa8] sm:$0xff] }
  0x11   : > { %772 = vmatpush.msk.msra.mxu2 %vm345_vm0, %v420_v2  ;;  %775 = vmatpush.msk.msra.mxu3 %vm345_vm0, %v421_v3  ;;  %v418_v6 = vld [vmem:[%s871_s29 + $0xa0] sm:$0xff]  ;;  %v419_v7 = vld [vmem:[%s871_s29 + $0xa8] sm:$0xff]  ;;  %v332_v8 = vld [vmem:[%s865_s26 + $0x90] sm:$0xff] }
  0x12   : > { %357 = vmatpush.msra.mxu0 %v334_v4  ;;  %380 = vmatpush.msra.mxu1 %v335_v5  ;;  %v333_v9 = vld [vmem:[%s865_s26 + $0x98] sm:$0xff]  ;;  %v416_v10 = vld [vmem:[%s871_s29 + $0x90] sm:$0xff]  ;;  %v330_v12 = vld [vmem:[%s865_s26 + $0x80] sm:$0xff] }
  0x13   : > { %v417_v11 = vld [vmem:[%s871_s29 + $0x98] sm:$0xff]  ;;  %433 = vmatpush.msra.mxu2 %v418_v6  ;;  %456 = vmatpush.msra.mxu3 %v419_v7  ;;  %v331_v13 = vld [vmem:[%s865_s26 + $0x88] sm:$0xff]  ;;  %v414_v14 = vld [vmem:[%s871_s29 + $0x80] sm:$0xff] }
  0x14   : > { %358 = vmatpush.msra.mxu0 %v332_v8  ;;  %381 = vmatpush.msra.mxu1 %v333_v9  ;;  %v415_v15 = vld [vmem:[%s871_s29 + $0x88] sm:$0xff]  ;;  %v328_v16 = vld [vmem:[%s865_s26 + $0x70] sm:$0xff]  ;;  %v329_v17 = vld [vmem:[%s865_s26 + $0x78] sm:$0xff] }
  0x15   : > { %434 = vmatpush.msra.mxu2 %v416_v10  ;;  %457 = vmatpush.msra.mxu3 %v417_v11  ;;  %v412_v18 = vld [vmem:[%s871_s29 + $0x70] sm:$0xff]  ;;  %v413_v19 = vld [vmem:[%s871_s29 + $0x78] sm:$0xff]  ;;  %v326_v20 = vld [vmem:[%s865_s26 + $0x60] sm:$0xff] }
  0x16   : > { %359 = vmatpush.msra.mxu0 %v330_v12  ;;  %382 = vmatpush.msra.mxu1 %v331_v13  ;;  %v327_v21 = vld [vmem:[%s865_s26 + $0x68] sm:$0xff]  ;;  %v410_v22 = vld [vmem:[%s871_s29 + $0x60] sm:$0xff]  ;;  %v324_v24 = vld [vmem:[%s865_s26 + $0x50] sm:$0xff] }
  0x17   : > { %435 = vmatpush.msra.mxu2 %v414_v14  ;;  %458 = vmatpush.msra.mxu3 %v415_v15  ;;  %v411_v23 = vld [vmem:[%s871_s29 + $0x68] sm:$0xff]  ;;  %v325_v25 = vld [vmem:[%s865_s26 + $0x58] sm:$0xff]  ;;  %v408_v26 = vld [vmem:[%s871_s29 + $0x50] sm:$0xff] }
  0x18   : > { %360 = vmatpush.msra.mxu0 %v328_v16  ;;  %383 = vmatpush.msra.mxu1 %v329_v17  ;;  %v409_v27 = vld [vmem:[%s871_s29 + $0x58] sm:$0xff]  ;;  %v322_v28 = vld [vmem:[%s865_s26 + $0x40] sm:$0xff]  ;;  %v323_v29 = vld [vmem:[%s865_s26 + $0x48] sm:$0xff] }
  0x19   : > { %436 = vmatpush.msra.mxu2 %v412_v18  ;;  %459 = vmatpush.msra.mxu3 %v413_v19  ;;  %v406_v30 = vld [vmem:[%s871_s29 + $0x40] sm:$0xff]  ;;  %v407_v31 = vld [vmem:[%s871_s29 + $0x48] sm:$0xff]  ;;  %v320_v32 = vld [vmem:[%s865_s26 + $0x30] sm:$0xff] }
  0x1a   : > { %361 = vmatpush.msra.mxu0 %v326_v20  ;;  %384 = vmatpush.msra.mxu1 %v327_v21  ;;  %v321_v33 = vld [vmem:[%s865_s26 + $0x38] sm:$0xff]  ;;  %v404_v34 = vld [vmem:[%s871_s29 + $0x30] sm:$0xff]  ;;  %v318_v36 = vld [vmem:[%s865_s26 + $0x20] sm:$0xff] }
  0x1b   : > { %437 = vmatpush.msra.mxu2 %v410_v22  ;;  %460 = vmatpush.msra.mxu3 %v411_v23  ;;  %v405_v35 = vld [vmem:[%s871_s29 + $0x38] sm:$0xff]  ;;  %v319_v37 = vld [vmem:[%s865_s26 + $0x28] sm:$0xff]  ;;  %v402_v38 = vld [vmem:[%s871_s29 + $0x20] sm:$0xff] }
  0x1c   : > { %362 = vmatpush.msra.mxu0 %v324_v24  ;;  %385 = vmatpush.msra.mxu1 %v325_v25  ;;  %v403_v39 = vld [vmem:[%s871_s29 + $0x28] sm:$0xff]  ;;  %v316_v40 = vld [vmem:[%s865_s26 + $0x10] sm:$0xff]  ;;  %v317_v41 = vld [vmem:[%s865_s26 + $0x18] sm:$0xff] }
  0x1d   : > { %438 = vmatpush.msra.mxu2 %v408_v26  ;;  %461 = vmatpush.msra.mxu3 %v409_v27  ;;  %v400_v42 = vld [vmem:[%s871_s29 + $0x10] sm:$0xff]  ;;  %v401_v43 = vld [vmem:[%s871_s29 + $0x18] sm:$0xff]  ;;  %v314_v44 = vld [vmem:[%s865_s26] sm:$0xff] }
  0x1e   : > { %363 = vmatpush.msra.mxu0 %v322_v28  ;;  %386 = vmatpush.msra.mxu1 %v323_v29  ;;  %v315_v45 = vld [vmem:[%s865_s26 + $0x8] sm:$0xff]  ;;  %v398_v46 = vld [vmem:[%s871_s29] sm:$0xff]  ;;  %v500_v48 = vld [vmem:[%s925_s8 + $0xb0] sm:$0x3] }
  0x1f   : > { %439 = vmatpush.msra.mxu2 %v406_v30  ;;  %462 = vmatpush.msra.mxu3 %v407_v31  ;;  %v399_v47 = vld [vmem:[%s871_s29 + $0x8] sm:$0xff]  ;;  %v501_v49 = vld [vmem:[%s925_s8 + $0xb8] sm:$0x3]  ;;  %v580_v50 = vld [vmem:[%s933_s11 + $0xb0] sm:$0x3] }
  0x20   : > { %364 = vmatpush.msra.mxu0 %v320_v32  ;;  %387 = vmatpush.msra.mxu1 %v321_v33  ;;  %v581_v51 = vld [vmem:[%s933_s11 + $0xb8] sm:$0x3]  ;;  %v498_v52 = vld [vmem:[%s925_s8 + $0xa0] sm:$0xff]  ;;  %v499_v53 = vld [vmem:[%s925_s8 + $0xa8] sm:$0xff] }
  0x21   : > { %440 = vmatpush.msra.mxu2 %v404_v34  ;;  %463 = vmatpush.msra.mxu3 %v405_v35  ;;  %v578_v54 = vld [vmem:[%s933_s11 + $0xa0] sm:$0xff]  ;;  %v579_v55 = vld [vmem:[%s933_s11 + $0xa8] sm:$0xff]  ;;  %v496_v56 = vld [vmem:[%s925_s8 + $0x90] sm:$0xff]  ;;  %v812_v35 = vmov 0  }
  0x22   : > { %365 = vmatpush.msra.mxu0 %v318_v36  ;;  %388 = vmatpush.msra.mxu1 %v319_v37  ;;  %v497_v57 = vld [vmem:[%s925_s8 + $0x98] sm:$0xff]  ;;  %v576_v58 = vld [vmem:[%s933_s11 + $0x90] sm:$0xff]  ;;  %v494_v61 = vld [vmem:[%s925_s8 + $0x80] sm:$0xff] }
  0x23   : > { %441 = vmatpush.msra.mxu2 %v402_v38  ;;  %464 = vmatpush.msra.mxu3 %v403_v39  ;;  %v577_v59 = vld [vmem:[%s933_s11 + $0x98] sm:$0xff]  ;;  %v495_v62 = vld [vmem:[%s925_s8 + $0x88] sm:$0xff]  ;;  %v574_v63 = vld [vmem:[%s933_s11 + $0x80] sm:$0xff] }
  0x24   : > { %366 = vmatpush.msra.mxu0 %v316_v40  ;;  %389 = vmatpush.msra.mxu1 %v317_v41  ;;  %v575_v0 = vld [vmem:[%s933_s11 + $0x88] sm:$0xff]  ;;  %v492_v1 = vld [vmem:[%s925_s8 + $0x70] sm:$0xff]  ;;  %v493_v2 = vld [vmem:[%s925_s8 + $0x78] sm:$0xff] }
  0x25   : > { %442 = vmatpush.msra.mxu2 %v400_v42  ;;  %465 = vmatpush.msra.mxu3 %v401_v43  ;;  %v572_v3 = vld [vmem:[%s933_s11 + $0x70] sm:$0xff]  ;;  %v573_v4 = vld [vmem:[%s933_s11 + $0x78] sm:$0xff]  ;;  %v490_v5 = vld [vmem:[%s925_s8 + $0x60] sm:$0xff] }
  0x26   : > { %367 = vmatpush.msra.mxu0 %v314_v44  ;;  %390 = vmatpush.msra.mxu1 %v315_v45  ;;  %v491_v6 = vld [vmem:[%s925_s8 + $0x68] sm:$0xff]  ;;  %v570_v7 = vld [vmem:[%s933_s11 + $0x60] sm:$0xff]  ;;  %v488_v9 = vld [vmem:[%s925_s8 + $0x50] sm:$0xff] }
  0x27   : > { %443 = vmatpush.msra.mxu2 %v398_v46  ;;  %466 = vmatpush.msra.mxu3 %v399_v47  ;;  %v571_v8 = vld [vmem:[%s933_s11 + $0x68] sm:$0xff]  ;;  %v489_v10 = vld [vmem:[%s925_s8 + $0x58] sm:$0xff]  ;;  %v568_v11 = vld [vmem:[%s933_s11 + $0x50] sm:$0xff] }
  0x28   : > { %778 = vmatpush.msk.msrb.mxu0 %vm345_vm0, %v500_v48  ;;  %781 = vmatpush.msk.msrb.mxu1 %vm345_vm0, %v501_v49  ;;  %v569_v12 = vld [vmem:[%s933_s11 + $0x58] sm:$0xff]  ;;  %v313_v13 = vld [vmem:[%s1034_s0 + $0x8] sm:$0x3]  ;;  %v486_v14 = vld [vmem:[%s925_s8 + $0x40] sm:$0xff] }
  0x29   : > { %784 = vmatpush.msk.msrb.mxu2 %vm345_vm0, %v580_v50  ;;  %787 = vmatpush.msk.msrb.mxu3 %vm345_vm0, %v581_v51  ;;  %v487_v15 = vld [vmem:[%s925_s8 + $0x48] sm:$0xff]  ;;  %v566_v16 = vld [vmem:[%s933_s11 + $0x40] sm:$0xff]  ;;  %v484_v18 = vld [vmem:[%s925_s8 + $0x30] sm:$0xff] }
  0x2a   : > { %513 = vmatpush.msrb.mxu0 %v498_v52  ;;  %536 = vmatpush.msrb.mxu1 %v499_v53  ;;  %v567_v17 = vld [vmem:[%s933_s11 + $0x48] sm:$0xff]  ;;  %v485_v19 = vld [vmem:[%s925_s8 + $0x38] sm:$0xff]  ;;  %v564_v20 = vld [vmem:[%s933_s11 + $0x30] sm:$0xff] }
  0x2b   : > { %593 = vmatpush.msrb.mxu2 %v578_v54  ;;  %616 = vmatpush.msrb.mxu3 %v579_v55  ;;  %v565_v21 = vld [vmem:[%s933_s11 + $0x38] sm:$0xff]  ;;  %v482_v22 = vld [vmem:[%s925_s8 + $0x20] sm:$0xff]  ;;  %v483_v23 = vld [vmem:[%s925_s8 + $0x28] sm:$0xff] }
  0x2c   : > { %514 = vmatpush.msrb.mxu0 %v496_v56  ;;  %537 = vmatpush.msrb.mxu1 %v497_v57  ;;  %v562_v24 = vld [vmem:[%s933_s11 + $0x20] sm:$0xff]  ;;  %v563_v25 = vld [vmem:[%s933_s11 + $0x28] sm:$0xff]  ;;  %v480_v26 = vld [vmem:[%s925_s8 + $0x10] sm:$0xff] }
  0x2d   : > { %594 = vmatpush.msrb.mxu2 %v576_v58  ;;  %617 = vmatpush.msrb.mxu3 %v577_v59  ;;  %v481_v27 = vld [vmem:[%s925_s8 + $0x18] sm:$0xff]  ;;  %v560_v28 = vld [vmem:[%s933_s11 + $0x10] sm:$0xff]  ;;  %v478_v30 = vld [vmem:[%s925_s8] sm:$0xff] }
  0x2e   : > { %773 = vmatmul.msk.f32.vlgmr.msra.gmra.mxu2 %vm338_vm1, %v956_v60  ;;  %776 = vmatmul.msk.f32.vlgmr.msra.gmra.mxu3 %vm338_vm1, %v956_v60  ;;  %v561_v29 = vld [vmem:[%s933_s11 + $0x18] sm:$0xff]  ;;  %v479_v31 = vld [vmem:[%s925_s8 + $0x8] sm:$0xff]  ;;  %v558_v32 = vld [vmem:[%s933_s11] sm:$0xff] }
  0x2f   : > { %515 = vmatpush.msrb.mxu0 %v494_v61  ;;  %538 = vmatpush.msrb.mxu1 %v495_v62  ;;  %v559_v33 = vld [vmem:[%s933_s11 + $0x8] sm:$0xff]  ;;  %v638_v34 = vld [vmem:[%s1035_s1] sm:$0xff] }
  0x30   : > { %595 = vmatpush.msrb.mxu2 %v574_v63  ;;  %618 = vmatpush.msrb.mxu3 %v575_v0  ;;  %v639_v36 = vld [vmem:[%s1035_s1 + $0x8] sm:$0x3] }
  0x31   : > { %767 = vmatmul.msk.f32.vlgmr.msra.gmra.mxu0 %vm338_vm1, %v956_v60  ;;  %770 = vmatmul.msk.f32.vlgmr.msra.gmra.mxu1 %vm338_vm1, %v956_v60 }
  0x32   : > { %516 = vmatpush.msrb.mxu0 %v492_v1  ;;  %539 = vmatpush.msrb.mxu1 %v493_v2 }
  0x33   : > { %596 = vmatpush.msrb.mxu2 %v572_v3  ;;  %619 = vmatpush.msrb.mxu3 %v573_v4 }
  0x34   : > { %517 = vmatpush.msrb.mxu0 %v490_v5  ;;  %540 = vmatpush.msrb.mxu1 %v491_v6 }
  0x35   : > { %597 = vmatpush.msrb.mxu2 %v570_v7  ;;  %620 = vmatpush.msrb.mxu3 %v571_v8 }
  0x36   : > { %518 = vmatpush.msrb.mxu0 %v488_v9  ;;  %541 = vmatpush.msrb.mxu1 %v489_v10 }
  0x37   : > { %598 = vmatpush.msrb.mxu2 %v568_v11  ;;  %621 = vmatpush.msrb.mxu3 %v569_v12 }
  0x38   : > { %774 = vmatmul.msk.f32.gmra.mxu2 %vm338_vm1, %v313_v13  ;;  %777 = vmatmul.msk.f32.gmra.mxu3 %vm338_vm1, %v313_v13 }
  0x39   : > { %519 = vmatpush.msrb.mxu0 %v486_v14  ;;  %542 = vmatpush.msrb.mxu1 %v487_v15 }
  0x3a   : > { %599 = vmatpush.msrb.mxu2 %v566_v16  ;;  %622 = vmatpush.msrb.mxu3 %v567_v17 }
  0x3b   : > { %768 = vmatmul.msk.f32.gmra.mxu0 %vm338_vm1, %v313_v13  ;;  %771 = vmatmul.msk.f32.gmra.mxu1 %vm338_vm1, %v313_v13 }
  0x3c   : > { %520 = vmatpush.msrb.mxu0 %v484_v18  ;;  %543 = vmatpush.msrb.mxu1 %v485_v19 }
  0x3d   : > { %600 = vmatpush.msrb.mxu2 %v564_v20  ;;  %623 = vmatpush.msrb.mxu3 %v565_v21 }
  0x3e   : > { %521 = vmatpush.msrb.mxu0 %v482_v22  ;;  %544 = vmatpush.msrb.mxu1 %v483_v23 }
  0x3f   : > { %601 = vmatpush.msrb.mxu2 %v562_v24  ;;  %624 = vmatpush.msrb.mxu3 %v563_v25 }
  0x40   : > { %522 = vmatpush.msrb.mxu0 %v480_v26  ;;  %545 = vmatpush.msrb.mxu1 %v481_v27 }
  0x41   : > { %602 = vmatpush.msrb.mxu2 %v560_v28  ;;  %625 = vmatpush.msrb.mxu3 %v561_v29 }
  0x42   : > { %523 = vmatpush.msrb.mxu0 %v478_v30  ;;  %546 = vmatpush.msrb.mxu1 %v479_v31 }
  0x43   : > { %603 = vmatpush.msrb.mxu2 %v558_v32  ;;  %626 = vmatpush.msrb.mxu3 %v559_v33 }
  0x44   : > { %779 = vmatmul.msk.f32.vlgmr.msrb.gmra.mxu0 %vm338_vm1, %v956_v60  ;;  %782 = vmatmul.msk.f32.vlgmr.msrb.gmra.mxu1 %vm338_vm1, %v956_v60 }
  0x45   : > { %785 = vmatmul.msk.f32.vlgmr.msrb.gmra.mxu2 %vm338_vm1, %v956_v60  ;;  %788 = vmatmul.msk.f32.vlgmr.msrb.gmra.mxu3 %vm338_vm1, %v956_v60 }
  0x46   : > { %803 = vset.pattern.permute.xlu0 %v812_v35 }
  0x47   : > { %642 = vperm.xlu0 %803, %v638_v34  }
  0x4c   : > { %780 = vmatmul.msk.f32.gmra.mxu0 %vm338_vm1, %v313_v13  ;;  %783 = vmatmul.msk.f32.gmra.mxu1 %vm338_vm1, %v313_v13 }
  0x4d   : > { %786 = vmatmul.msk.f32.gmra.mxu2 %vm338_vm1, %v313_v13  ;;  %789 = vmatmul.msk.f32.gmra.mxu3 %vm338_vm1, %v313_v13 }
  0x4f   : > { %647 = vperm.xlu0 %803, %v639_v36  }
  0xae   : > { %v369_v37 = vpop.f32.mrf.mxu0  ;;  %v392_v38 = vpop.f32.mrf.mxu1 }
  0xb1   : > { %v445_v39 = vpop.f32.mrf.mxu2  ;;  %v468_v40 = vpop.f32.mrf.mxu3 }
  0xb2   : > { %v474_v47 = vmax.f32 %v369_v37, %v445_v39  ;;  %v475_v48 = vmax.f32 %v392_v38, %v468_v40 }
  0xb8   : > { %v372_v41 = vpop.f32.mrf.mxu0  ;;  %v395_v42 = vpop.f32.mrf.mxu1 }
  0xb9   : > { %v643_v49 = vpop.permute.xlu0 %642 }
  0xbb   : > { %v448_v43 = vpop.f32.mrf.mxu2  ;;  %v471_v44 = vpop.f32.mrf.mxu3 }
  0xbc   : > { %v476_v60 = vmax.f32 %v372_v41, %v448_v43  ;;  %v477_v61 = vmax.f32 %v395_v42, %v471_v44 }
  0xc1   : > { %v525_v45 = vpop.f32.mrf.mxu0  ;;  %v548_v46 = vpop.f32.mrf.mxu1 }
  0xc2   : > { %v554_v50 = vmax.f32 %v474_v47, %v525_v45  ;;  %v555_v51 = vmax.f32 %v475_v48, %v548_v46  ;;  %v648_v6 = vpop.permute.xlu0 %647 }
  0xc8   : > { %v605_v52 = vpop.f32.mrf.mxu2  ;;  %v628_v53 = vpop.f32.mrf.mxu3 }
  0xc9   : > { %v634_v54 = vmax.f32 %v554_v50, %v605_v52  ;;  %v635_v55 = vmax.f32 %v555_v51, %v628_v53  ;;  %v528_v58 = vpop.f32.mrf.mxu0  ;;  %v551_v59 = vpop.f32.mrf.mxu1 }
  0xca   : > { %v556_v0 = vmax.f32 %v476_v60, %v528_v58  ;;  %v557_v1 = vmax.f32 %v477_v61, %v551_v59 }
  0xcb   : > { %v650_v56 = vadd.f32 %v643_v49, %v634_v54  ;;  %v651_v57 = vadd.f32 %v643_v49, %v635_v55 }
  0xcd   : > { %v654_v62 = vmax.f32 %v650_v56, 0.0  ;;  %v655_v63 = vmax.f32 %v651_v57, 0.0 }
  0xcf   : > { %658 = vst [vmem:[%s311_s25] sm:$0xff] %v654_v62 }
  0xd0   : > { %660 = vst.msk [vmem:[%s311_s25 + $0x8] sm:$0xff] %vm659_vm2, %v655_v63  ;;  %v608_v2 = vpop.f32.mrf.mxu2  ;;  %v631_v3 = vpop.f32.mrf.mxu3 }
  0xd1   : > { %v636_v4 = vmax.f32 %v556_v0, %v608_v2  ;;  %v637_v5 = vmax.f32 %v557_v1, %v631_v3 }
  0xd3   : > { %v652_v7 = vadd.f32 %v648_v6, %v636_v4  ;;  %v653_v8 = vadd.f32 %v648_v6, %v637_v5 }
  0xd5   : > { %v656_v9 = vmax.f32 %v652_v7, 0.0  ;;  %v657_v10 = vmax.f32 %v653_v8, 0.0 }
  0xd7   : > { %661 = vst [vmem:[%s311_s25 + $0x10] sm:$0x3] %v656_v9 }
  0xd8   : > { %663 = vst.msk [vmem:[%s311_s25 + $0x18] sm:$0x3] %vm662_vm3, %v657_v10 }
  0xd9 PF: > { %s16_s21 = sadd.s32 1, %s810_s21  }
  0xda   : > { %p13_p4 = scmp.ge.s32.totalorder %s16_s21, 4  }
  0xdc   :  { %15 = sbr.rel (!%p13_p4) target bundleno = 1 (0x1), region = 83 }

// kernel: net_forward.7
= control target key start
LH: loop header
LB: loop body
LE: loop exit
PB: predicated region body
PF: predicated region fallthrough
CT: control target
= control target key end

     0   :  { %s481_s12 = smov 0   ;;  %s585_s0 = inlined_call_operand.vmem [shape: f32[40,90], index: 0, kind: input, shape index: {}]   ;;  %s586_s1 = inlined_call_operand.vmem [shape: f32[40,1], index: 1, kind: input, shape index: {}]   ;;  %s587_s2 = inlined_call_operand.vmem [shape: f32[2,90,144], index: 2, kind: input, shape index: {}]   ;;  %s588_s3 = inlined_call_operand.vmem [shape: f32[2,40,144], index: 3, kind: output, shape index: {}]  }
   0x1 LB: > { %s393_s13 = sadd.s32 4294967295, %s458_s12   ;;  %p397_p0 = scmp.ge.s32.totalorder %s458_s12, 1  ;;  %s458_s12 = sphi %s481_s12, %s13_s12  }
   0x2   : > { %p137_p1 = scmp.lt.s32.totalorder %s458_s12, 3 }
   0x4   : > { %p138_p2 = pnand %p397_p0, %p137_p1 }
   0x5   : > { %p161_p3 = scmp.lt.s32.totalorder (!%p138_p2), %s393_s13, 1 }
   0x6   : > { %141 = sbr.rel (%p138_p2) target bundleno = 192 (0xc0), region = 32 }
   0xb   : > { %s590_s13 = smov (!%p161_p3, %s393_s13), 1  ;;  %vm246_vm0 = vcmask 1041408   ;;  %v173_v24 = vld [vmem:[%s585_s0 + $0x10] sm:$0xff]  ;;  %vm230_vm1 = vcmask 736256   ;;  %v171_v25 = vld [vmem:[%s585_s0] sm:$0xff]  ;;  %v174_v26 = vld [vmem:[%s585_s0 + $0x18] sm:$0xff] }
   0xc   : > { %s438_s14 = smul.u32 192, %s590_s13  ;;  %v202_v27 = vld [vmem:[%s586_s1 + $0x10] sm:$0xff]  ;;  %v200_v28 = vld [vmem:[%s586_s1] sm:$0xff]  ;;  %v460_v29 = vmov 0   ;;  %v172_v31 = vld [vmem:[%s585_s0 + $0x8] sm:$0xff]  ;;  %vm328_vm2 = vcmask 130048  }
   0xd   : > { %450 = vset.pattern.permute.xlu1 %v460_v29  ;;  %449 = vset.pattern.permute.xlu0 %v460_v29  ;;  %v204_v30 = vld [vmem:[%s586_s1 + $0x20] sm:$0xff]  ;;  %v203_v33 = vld [vmem:[%s586_s1 + $0x18] sm:$0xff]  ;;  %v201_v34 = vld [vmem:[%s586_s1 + $0x8] sm:$0xff]  ;;  %s439_s11 = smul.u32 80, %s590_s13 }
   0xe   : > { %s495_s17 = scalar_lea.vmem %s587_s2, %s438_s14  ;;  %217 = vperm.xlu1 %450, %v202_v27   ;;  %207 = vperm.xlu0 %449, %v200_v28   ;;  %v175_v32 = vld [vmem:[%s585_s0 + $0x20] sm:$0xff] }
   0xf   : > { %v198_v0 = vld [vmem:[%s495_s17 + $0xb0] sm:$0x3]  ;;  %v199_v1 = vld [vmem:[%s495_s17 + $0xb8] sm:$0x3]  ;;  %v196_v2 = vld [vmem:[%s495_s17 + $0xa0] sm:$0xff]  ;;  %451 = vset.pattern.permute.xlu2 %v460_v29  ;;  %s565_s16 = scalar_lea.vmem %s588_s3, %s439_s11 }
  0x10   : > { %414 = vmatpush.msk.msra.mxu2 %vm246_vm0, %v198_v0  ;;  %406 = vmatpush.msk.msra.mxu1 %vm246_vm0, %v199_v1  ;;  %v197_v3 = vld [vmem:[%s495_s17 + $0xa8] sm:$0xff]  ;;  %v194_v4 = vld [vmem:[%s495_s17 + $0x90] sm:$0xff]  ;;  %v195_v5 = vld [vmem:[%s495_s17 + $0x98] sm:$0xff] }
  0x11   : > { %400 = vmatpush.msk.msra.mxu0 %vm246_vm0, %v198_v0  ;;  %426 = vmatpush.msk.msra.mxu3 %vm246_vm0, %v199_v1  ;;  %v192_v6 = vld [vmem:[%s495_s17 + $0x80] sm:$0xff]  ;;  %v193_v7 = vld [vmem:[%s495_s17 + $0x88] sm:$0xff]  ;;  %v190_v8 = vld [vmem:[%s495_s17 + $0x70] sm:$0xff] }
  0x12   : > { %415 = vmatpush.msra.mxu2 %v196_v2  ;;  %290 = vmatpush.msra.mxu1 %v197_v3  ;;  %v191_v9 = vld [vmem:[%s495_s17 + $0x78] sm:$0xff]  ;;  %v188_v10 = vld [vmem:[%s495_s17 + $0x60] sm:$0xff]  ;;  %v189_v11 = vld [vmem:[%s495_s17 + $0x68] sm:$0xff] }
  0x13   : > { %258 = vmatpush.msra.mxu0 %v196_v2  ;;  %427 = vmatpush.msra.mxu3 %v197_v3  ;;  %v186_v12 = vld [vmem:[%s495_s17 + $0x50] sm:$0xff]  ;;  %v187_v13 = vld [vmem:[%s495_s17 + $0x58] sm:$0xff]  ;;  %v184_v14 = vld [vmem:[%s495_s17 + $0x40] sm:$0xff] }
  0x14   : > { %416 = vmatpush.msra.mxu2 %v194_v4  ;;  %291 = vmatpush.msra.mxu1 %v195_v5  ;;  %v185_v15 = vld [vmem:[%s495_s17 + $0x48] sm:$0xff]  ;;  %v182_v16 = vld [vmem:[%s495_s17 + $0x30] sm:$0xff]  ;;  %v183_v17 = vld [vmem:[%s495_s17 + $0x38] sm:$0xff] }
  0x15   : > { %259 = vmatpush.msra.mxu0 %v194_v4  ;;  %428 = vmatpush.msra.mxu3 %v195_v5  ;;  %v180_v18 = vld [vmem:[%s495_s17 + $0x20] sm:$0xff]  ;;  %v181_v19 = vld [vmem:[%s495_s17 + $0x28] sm:$0xff]  ;;  %v178_v20 = vld [vmem:[%s495_s17 + $0x10] sm:$0xff] }
  0x16   : > { %417 = vmatpush.msra.mxu2 %v192_v6  ;;  %292 = vmatpush.msra.mxu1 %v193_v7  ;;  %v179_v21 = vld [vmem:[%s495_s17 + $0x18] sm:$0xff]  ;;  %v176_v22 = vld [vmem:[%s495_s17] sm:$0xff]  ;;  %v177_v23 = vld [vmem:[%s495_s17 + $0x8] sm:$0xff] }
  0x17   : > { %260 = vmatpush.msra.mxu0 %v192_v6  ;;  %429 = vmatpush.msra.mxu3 %v193_v7 }
  0x18   : > { %418 = vmatpush.msra.mxu2 %v190_v8  ;;  %293 = vmatpush.msra.mxu1 %v191_v9 }
  0x19   : > { %261 = vmatpush.msra.mxu0 %v190_v8  ;;  %430 = vmatpush.msra.mxu3 %v191_v9 }
  0x1a   : > { %419 = vmatpush.msra.mxu2 %v188_v10  ;;  %294 = vmatpush.msra.mxu1 %v189_v11 }
  0x1b   : > { %262 = vmatpush.msra.mxu0 %v188_v10  ;;  %431 = vmatpush.msra.mxu3 %v189_v11 }
  0x1c   : > { %420 = vmatpush.msra.mxu2 %v186_v12  ;;  %295 = vmatpush.msra.mxu1 %v187_v13 }
  0x1d   : > { %263 = vmatpush.msra.mxu0 %v186_v12  ;;  %432 = vmatpush.msra.mxu3 %v187_v13 }
  0x1e   : > { %421 = vmatpush.msra.mxu2 %v184_v14  ;;  %296 = vmatpush.msra.mxu1 %v185_v15 }
  0x1f   : > { %264 = vmatpush.msra.mxu0 %v184_v14  ;;  %433 = vmatpush.msra.mxu3 %v185_v15 }
  0x20   : > { %422 = vmatpush.msra.mxu2 %v182_v16  ;;  %297 = vmatpush.msra.mxu1 %v183_v17 }
  0x21   : > { %265 = vmatpush.msra.mxu0 %v182_v16  ;;  %434 = vmatpush.msra.mxu3 %v183_v17 }
  0x22   : > { %423 = vmatpush.msra.mxu2 %v180_v18  ;;  %298 = vmatpush.msra.mxu1 %v181_v19 }
  0x23   : > { %266 = vmatpush.msra.mxu0 %v180_v18  ;;  %435 = vmatpush.msra.mxu3 %v181_v19 }
  0x24   : > { %424 = vmatpush.msra.mxu2 %v178_v20  ;;  %299 = vmatpush.msra.mxu1 %v179_v21 }
  0x25   : > { %267 = vmatpush.msra.mxu0 %v178_v20  ;;  %436 = vmatpush.msra.mxu3 %v179_v21 }
  0x26   : > { %425 = vmatpush.msra.mxu2 %v176_v22  ;;  %300 = vmatpush.msra.mxu1 %v177_v23 }
  0x27   : > { %403 = vmatmul.msk.f32.vlgmr.msra.gmra.mxu2 %vm230_vm1, %v173_v24  ;;  %407 = vmatmul.msk.f32.vlgmr.msra.gmra.mxu1 %vm230_vm1, %v171_v25 }
  0x28   : > { %268 = vmatpush.msra.mxu0 %v176_v22  ;;  %437 = vmatpush.msra.mxu3 %v177_v23 }
  0x29   : > { %401 = vmatmul.msk.f32.vlgmr.msra.gmra.mxu0 %vm230_vm1, %v171_v25  ;;  %410 = vmatmul.msk.f32.vlgmr.msra.gmra.mxu3 %vm230_vm1, %v174_v26 }
  0x2a   : > { %227 = vperm.xlu2 %451, %v204_v30   ;;  %222 = vperm.xlu1 %450, %v203_v33  }
  0x2b   : > { %212 = vperm.xlu0 %449, %v201_v34  }
  0x2f   : > { %404 = vmatmul.msk.f32.gmra.mxu2 %vm230_vm1, %v174_v26  ;;  %408 = vmatmul.msk.f32.gmra.mxu1 %vm230_vm1, %v172_v31 }
  0x31   : > { %402 = vmatmul.msk.f32.gmra.mxu0 %vm230_vm1, %v172_v31  ;;  %411 = vmatmul.msk.f32.gmra.mxu3 %vm230_vm1, %v175_v32 }
  0x37   : > { %405 = vmatmul.msk.f32.gmra.mxu2 %vm230_vm1, %v175_v32  ;;  %409 = vmatmul.msk.f32.gmra.mxu1 %vm230_vm1, %v173_v24 }
  0x80   : > { %v218_v35 = vpop.permute.xlu1 %217  ;;  %v208_v36 = vpop.permute.xlu0 %207 }
  0x84   : > { %v228_v58 = vpop.permute.xlu2 %227 }
  0x9c   : > { %v223_v43 = vpop.permute.xlu1 %222 }
  0x9d   : > { %v213_v45 = vpop.permute.xlu0 %212 }
  0xa4   : > { %v302_v37 = vpop.f32.mrf.mxu1 }
  0xa5   : > { %v303_v38 = vadd.f32 %v302_v37, %v208_v36 }
  0xa6   : > { %v270_v39 = vpop.f32.mrf.mxu0 }
  0xa7   : > { %v318_v40 = vmax.f32 %v303_v38, 0.0  ;;  %v271_v41 = vadd.f32 %v270_v39, %v208_v36 }
  0xa9   : > { %329 = vst.msk [vmem:[%s565_s16 + $0x8] sm:$0xff] %vm328_vm2, %v318_v40  ;;  %v317_v42 = vmax.f32 %v271_v41, 0.0 }
  0xaa   : > { %v276_v44 = vpop.f32.mrf.mxu2 }
  0xab   : > { %327 = vst [vmem:[%s565_s16] sm:$0xff] %v317_v42  ;;  %v277_v46 = vadd.f32 %v276_v44, %v218_v35 }
  0xac   : > { %v305_v47 = vpop.f32.mrf.mxu1  ;;  %v311_v48 = vpop.f32.mrf.mxu3 }
  0xad   : > { %v321_v49 = vmax.f32 %v277_v46, 0.0  ;;  %v306_v50 = vadd.f32 %v305_v47, %v213_v45  ;;  %v312_v51 = vadd.f32 %v311_v48, %v223_v43 }
  0xae   : > { %v273_v52 = vpop.f32.mrf.mxu0 }
  0xaf   : > { %332 = vst [vmem:[%s565_s16 + $0x20] sm:$0xff] %v321_v49  ;;  %v320_v53 = vmax.f32 %v306_v50, 0.0  ;;  %v274_v54 = vadd.f32 %v273_v52, %v213_v45  ;;  %v324_v55 = vmax.f32 %v312_v51, 0.0 }
  0xb1   : > { %331 = vst.msk [vmem:[%s565_s16 + $0x18] sm:$0xff] %vm328_vm2, %v320_v53  ;;  %v319_v56 = vmax.f32 %v274_v54, 0.0 }
  0xb2   : > { %v279_v57 = vpop.f32.mrf.mxu2  ;;  %335 = vst.msk [vmem:[%s565_s16 + $0x38] sm:$0xff] %vm328_vm2, %v324_v55 }
  0xb3   : > { %330 = vst [vmem:[%s565_s16 + $0x10] sm:$0xff] %v319_v56  ;;  %v280_v59 = vadd.f32 %v279_v57, %v223_v43 }
  0xb4   : > { %v308_v60 = vpop.f32.mrf.mxu1  ;;  %v314_v61 = vpop.f32.mrf.mxu3 }
  0xb5   : > { %v323_v62 = vmax.f32 %v280_v59, 0.0  ;;  %v309_v63 = vadd.f32 %v308_v60, %v218_v35  ;;  %v315_v0 = vadd.f32 %v314_v61, %v228_v58 }
  0xb7   : > { %334 = vst [vmem:[%s565_s16 + $0x30] sm:$0xff] %v323_v62  ;;  %v322_v1 = vmax.f32 %v309_v63, 0.0  ;;  %v326_v2 = vmax.f32 %v315_v0, 0.0 }
  0xb9   : > { %333 = vst.msk [vmem:[%s565_s16 + $0x28] sm:$0xff] %vm328_vm2, %v322_v1 }
  0xba   : > { %v282_v3 = vpop.f32.mrf.mxu2  ;;  %337 = vst.msk [vmem:[%s565_s16 + $0x48] sm:$0xff] %vm328_vm2, %v326_v2 }
  0xbb   : > { %v283_v4 = vadd.f32 %v282_v3, %v228_v58 }
  0xbd   : > { %v325_v5 = vmax.f32 %v283_v4, 0.0 }
  0xbf   : > { %336 = vst [vmem:[%s565_s16 + $0x40] sm:$0xff] %v325_v5 }
  0xc0 PF: > { %s13_s12 = sadd.s32 1, %s458_s12  }
  0xc1   : > { %p10_p4 = scmp.ge.s32.totalorder %s13_s12, 4  }
  0xc3   :  { %12 = sbr.rel (!%p10_p4) target bundleno = 1 (0x1), region = 62 }

// kernel: net_forward.8
= control target key start
LH: loop header
LB: loop body
LE: loop exit
PB: predicated region body
PF: predicated region fallthrough
CT: control target
= control target key end

     0   :  { %s1149_s21 = smov 0   ;;  %s1579_s0 = inlined_call_operand.vmem [shape: f32[40,360], index: 0, kind: input, shape index: {}]   ;;  %s1580_s1 = inlined_call_operand.vmem [shape: f32[40,1], index: 1, kind: input, shape index: {}]   ;;  %s1581_s2 = inlined_call_operand.vmem [shape: f32[2,360,25], index: 2, kind: input, shape index: {}]   ;;  %s1582_s3 = inlined_call_operand.vmem [shape: f32[2,360,25], index: 3, kind: input, shape index: {}]   ;;  %s1583_s4 = inlined_call_operand.vmem [shape: f32[2,360,25], index: 4, kind: input, shape index: {}]   ;;  %s1584_s5 = inlined_call_operand.vmem [shape: f32[2,360,25], index: 5, kind: input, shape index: {}]   ;;  %s1585_s6 = inlined_call_operand.vmem [shape: f32[2,40,25], index: 6, kind: output, shape index: {}]  }
   0x1 LB: > { %s1059_s22 = sadd.s32 4294967295, %s1111_s21   ;;  %p1063_p0 = scmp.ge.s32.totalorder %s1111_s21, 1  ;;  %s1111_s21 = sphi %s1149_s21, %s16_s21  }
   0x2   : > { %p242_p1 = scmp.lt.s32.totalorder %s1111_s21, 3 }
   0x4   : > { %p243_p2 = pnand %p1063_p0, %p242_p1 }
   0x5   : > { %p287_p3 = scmp.lt.s32.totalorder (!%p243_p2), %s1059_s22, 1 }
   0x6   : > { %246 = sbr.rel (%p243_p2) target bundleno = 302 (0x12e), region = 44 }
   0xb   : > { %s1587_s22 = smov (!%p287_p3, %s1059_s22), 1  ;;  %v1227_v50 = vld [vmem:[%s1579_s0 + $0x10] sm:$0xff]  ;;  %vm372_vm0 = vcmask 850944   ;;  %v1251_v62 = vld [vmem:[%s1579_s0] sm:$0xff]  ;;  %vm962_vm1 = vcmask 203776  }
   0xc   : > { %s1160_s23 = smul.u32 360, %s1587_s22 }
   0xd   : > { %s1092_s11 = smul.u32 40, %s1587_s22 }
   0xe   : > { %s1166_s26 = scalar_lea.vmem %s1581_s2, %s1160_s23  ;;  %s1172_s29 = scalar_lea.vmem %s1582_s3, %s1160_s23 }
   0xf   : > { %v371_v0 = vld [vmem:[%s1166_s26 + $0x160] sm:$0xff]  ;;  %v499_v1 = vld [vmem:[%s1172_s29 + $0x78] sm:$0xff]  ;;  %v498_v5 = vld [vmem:[%s1172_s29 + $0x70] sm:$0xff]  ;;  %s1243_s10 = scalar_lea.vmem %s1583_s4, %s1160_s23  ;;  %s1407_s25 = scalar_lea.vmem %s1584_s5, %s1160_s23 }
  0x10   : > { %v342_v2 = vld [vmem:[%s1166_s26 + $0x78] sm:$0xff]  ;;  %455 = vmatpush.msra.mxu2 %v371_v0  ;;  %529 = vmatpush.msra.mxu3 %v499_v1  ;;  %v341_v6 = vld [vmem:[%s1166_s26 + $0x70] sm:$0xff]  ;;  %v497_v9 = vld [vmem:[%s1172_s29 + $0x68] sm:$0xff]  ;;  %s1561_s14 = scalar_lea.vmem %s1585_s6, %s1092_s11 }
  0x11   : > { %v358_v3 = vld [vmem:[%s1166_s26 + $0xf8] sm:$0xff]  ;;  %388 = vmatpush.msra.mxu0 %v342_v2  ;;  %v357_v7 = vld [vmem:[%s1166_s26 + $0xf0] sm:$0xff]  ;;  %v340_v10 = vld [vmem:[%s1166_s26 + $0x68] sm:$0xff] }
  0x12   : > { %v370_v4 = vld [vmem:[%s1166_s26 + $0x158] sm:$0xff]  ;;  %420 = vmatpush.msra.mxu1 %v358_v3  ;;  %v369_v8 = vld [vmem:[%s1166_s26 + $0x150] sm:$0xff]  ;;  %530 = vmatpush.msra.mxu3 %v498_v5  ;;  %v356_v11 = vld [vmem:[%s1166_s26 + $0xe8] sm:$0xff] }
  0x13   : > { %456 = vmatpush.msra.mxu2 %v370_v4  ;;  %389 = vmatpush.msra.mxu0 %v341_v6  ;;  %v368_v12 = vld [vmem:[%s1166_s26 + $0x148] sm:$0xff]  ;;  %v496_v13 = vld [vmem:[%s1172_s29 + $0x60] sm:$0xff]  ;;  %v495_v17 = vld [vmem:[%s1172_s29 + $0x58] sm:$0xff] }
  0x14   : > { %421 = vmatpush.msra.mxu1 %v357_v7  ;;  %531 = vmatpush.msra.mxu3 %v497_v9  ;;  %v339_v14 = vld [vmem:[%s1166_s26 + $0x60] sm:$0xff]  ;;  %v338_v18 = vld [vmem:[%s1166_s26 + $0x58] sm:$0xff]  ;;  %v494_v21 = vld [vmem:[%s1172_s29 + $0x50] sm:$0xff] }
  0x15   : > { %457 = vmatpush.msra.mxu2 %v369_v8  ;;  %v355_v15 = vld [vmem:[%s1166_s26 + $0xe0] sm:$0xff]  ;;  %390 = vmatpush.msra.mxu0 %v340_v10  ;;  %v354_v19 = vld [vmem:[%s1166_s26 + $0xd8] sm:$0xff]  ;;  %v337_v22 = vld [vmem:[%s1166_s26 + $0x50] sm:$0xff] }
  0x16   : > { %422 = vmatpush.msra.mxu1 %v356_v11  ;;  %v367_v16 = vld [vmem:[%s1166_s26 + $0x140] sm:$0xff]  ;;  %532 = vmatpush.msra.mxu3 %v496_v13  ;;  %v366_v20 = vld [vmem:[%s1166_s26 + $0x138] sm:$0xff]  ;;  %v353_v23 = vld [vmem:[%s1166_s26 + $0xd0] sm:$0xff] }
  0x17   : > { %458 = vmatpush.msra.mxu2 %v368_v12  ;;  %391 = vmatpush.msra.mxu0 %v339_v14  ;;  %v365_v24 = vld [vmem:[%s1166_s26 + $0x130] sm:$0xff]  ;;  %v493_v25 = vld [vmem:[%s1172_s29 + $0x48] sm:$0xff]  ;;  %v492_v29 = vld [vmem:[%s1172_s29 + $0x40] sm:$0xff] }
  0x18   : > { %423 = vmatpush.msra.mxu1 %v355_v15  ;;  %533 = vmatpush.msra.mxu3 %v495_v17  ;;  %v336_v26 = vld [vmem:[%s1166_s26 + $0x48] sm:$0xff]  ;;  %v335_v30 = vld [vmem:[%s1166_s26 + $0x40] sm:$0xff]  ;;  %v491_v33 = vld [vmem:[%s1172_s29 + $0x38] sm:$0xff] }
  0x19   : > { %459 = vmatpush.msra.mxu2 %v367_v16  ;;  %392 = vmatpush.msra.mxu0 %v338_v18  ;;  %v352_v27 = vld [vmem:[%s1166_s26 + $0xc8] sm:$0xff]  ;;  %v351_v31 = vld [vmem:[%s1166_s26 + $0xc0] sm:$0xff]  ;;  %v334_v34 = vld [vmem:[%s1166_s26 + $0x38] sm:$0xff] }
  0x1a   : > { %424 = vmatpush.msra.mxu1 %v354_v19  ;;  %534 = vmatpush.msra.mxu3 %v494_v21  ;;  %v364_v28 = vld [vmem:[%s1166_s26 + $0x128] sm:$0xff]  ;;  %v363_v32 = vld [vmem:[%s1166_s26 + $0x120] sm:$0xff]  ;;  %v350_v35 = vld [vmem:[%s1166_s26 + $0xb8] sm:$0xff] }
  0x1b   : > { %460 = vmatpush.msra.mxu2 %v366_v20  ;;  %393 = vmatpush.msra.mxu0 %v337_v22  ;;  %v362_v36 = vld [vmem:[%s1166_s26 + $0x118] sm:$0xff]  ;;  %v490_v37 = vld [vmem:[%s1172_s29 + $0x30] sm:$0xff]  ;;  %v489_v41 = vld [vmem:[%s1172_s29 + $0x28] sm:$0xff] }
  0x1c   : > { %425 = vmatpush.msra.mxu1 %v353_v23  ;;  %535 = vmatpush.msra.mxu3 %v493_v25  ;;  %v333_v38 = vld [vmem:[%s1166_s26 + $0x30] sm:$0xff]  ;;  %v332_v42 = vld [vmem:[%s1166_s26 + $0x28] sm:$0xff]  ;;  %v488_v45 = vld [vmem:[%s1172_s29 + $0x20] sm:$0xff] }
  0x1d   : > { %461 = vmatpush.msra.mxu2 %v365_v24  ;;  %394 = vmatpush.msra.mxu0 %v336_v26  ;;  %v349_v39 = vld [vmem:[%s1166_s26 + $0xb0] sm:$0xff]  ;;  %v348_v43 = vld [vmem:[%s1166_s26 + $0xa8] sm:$0xff]  ;;  %v331_v46 = vld [vmem:[%s1166_s26 + $0x20] sm:$0xff] }
  0x1e   : > { %426 = vmatpush.msra.mxu1 %v352_v27  ;;  %536 = vmatpush.msra.mxu3 %v492_v29  ;;  %v361_v40 = vld [vmem:[%s1166_s26 + $0x110] sm:$0xff]  ;;  %v360_v44 = vld [vmem:[%s1166_s26 + $0x108] sm:$0xff]  ;;  %v347_v47 = vld [vmem:[%s1166_s26 + $0xa0] sm:$0xff] }
  0x1f   : > { %462 = vmatpush.msra.mxu2 %v364_v28  ;;  %395 = vmatpush.msra.mxu0 %v335_v30  ;;  %v359_v48 = vld [vmem:[%s1166_s26 + $0x100] sm:$0xff]  ;;  %v487_v49 = vld [vmem:[%s1172_s29 + $0x18] sm:$0xff]  ;;  %v486_v53 = vld [vmem:[%s1172_s29 + $0x10] sm:$0xff] }
  0x20   : > { %427 = vmatpush.msra.mxu1 %v351_v31  ;;  %537 = vmatpush.msra.mxu3 %v491_v33  ;;  %v330_v51 = vld [vmem:[%s1166_s26 + $0x18] sm:$0xff]  ;;  %v329_v54 = vld [vmem:[%s1166_s26 + $0x10] sm:$0xff]  ;;  %v485_v57 = vld [vmem:[%s1172_s29 + $0x8] sm:$0xff] }
  0x21   : > { %463 = vmatpush.msra.mxu2 %v363_v32  ;;  %396 = vmatpush.msra.mxu0 %v334_v34  ;;  %v346_v52 = vld [vmem:[%s1166_s26 + $0x98] sm:$0xff]  ;;  %v345_v56 = vld [vmem:[%s1166_s26 + $0x90] sm:$0xff]  ;;  %v328_v58 = vld [vmem:[%s1166_s26 + $0x8] sm:$0xff] }
  0x22   : > { %428 = vmatpush.msra.mxu1 %v350_v35  ;;  %538 = vmatpush.msra.mxu3 %v490_v37  ;;  %v515_v55 = vld [vmem:[%s1172_s29 + $0xf8] sm:$0xff]  ;;  %v514_v59 = vld [vmem:[%s1172_s29 + $0xf0] sm:$0xff]  ;;  %v344_v60 = vld [vmem:[%s1166_s26 + $0x88] sm:$0xff] }
  0x23   : > { %464 = vmatpush.msra.mxu2 %v362_v36  ;;  %397 = vmatpush.msra.mxu0 %v333_v38  ;;  %v484_v61 = vld [vmem:[%s1172_s29] sm:$0xff]  ;;  %v661_v0 = vld [vmem:[%s1243_s10 + $0xf8] sm:$0xff]  ;;  %v1259_v2 = vld [vmem:[%s1579_s0 + $0x8] sm:$0xff] }
  0x24   : > { %429 = vmatpush.msra.mxu1 %v349_v39  ;;  %539 = vmatpush.msra.mxu3 %v489_v41  ;;  %v327_v63 = vld [vmem:[%s1166_s26] sm:$0xff]  ;;  %v1265_v3 = vld [vmem:[%s1579_s0 + $0x28] sm:$0xff]  ;;  %v660_v4 = vld [vmem:[%s1243_s10 + $0xf0] sm:$0xff] }
  0x25   : > { %465 = vmatpush.msra.mxu2 %v361_v40  ;;  %398 = vmatpush.msra.mxu0 %v332_v42  ;;  %v343_v1 = vld [vmem:[%s1166_s26 + $0x80] sm:$0xff]  ;;  %v513_v5 = vld [vmem:[%s1172_s29 + $0xe8] sm:$0xff]  ;;  %v645_v7 = vld [vmem:[%s1243_s10 + $0x78] sm:$0xff] }
  0x26   : > { %430 = vmatpush.msra.mxu1 %v348_v43  ;;  %540 = vmatpush.msra.mxu3 %v488_v45  ;;  %v528_v6 = vld [vmem:[%s1172_s29 + $0x160] sm:$0xff]  ;;  %v659_v8 = vld [vmem:[%s1243_s10 + $0xe8] sm:$0xff]  ;;  %v527_v10 = vld [vmem:[%s1172_s29 + $0x158] sm:$0xff] }
  0x27   : > { %466 = vmatpush.msra.mxu2 %v360_v44  ;;  %399 = vmatpush.msra.mxu0 %v331_v46  ;;  %v512_v9 = vld [vmem:[%s1172_s29 + $0xe0] sm:$0xff]  ;;  %v644_v11 = vld [vmem:[%s1243_s10 + $0x70] sm:$0xff]  ;;  %v1283_v13 = vld [vmem:[%s1579_s0 + $0x18] sm:$0xff] }
  0x28   : > { %431 = vmatpush.msra.mxu1 %v347_v47  ;;  %541 = vmatpush.msra.mxu3 %v487_v49  ;;  %v658_v12 = vld [vmem:[%s1243_s10 + $0xe0] sm:$0xff]  ;;  %v511_v14 = vld [vmem:[%s1172_s29 + $0xd8] sm:$0xff]  ;;  %v643_v15 = vld [vmem:[%s1243_s10 + $0x68] sm:$0xff] }
  0x29   : > { %467 = vmatpush.msra.mxu2 %v359_v48  ;;  %400 = vmatpush.msra.mxu0 %v330_v51  ;;  %v657_v16 = vld [vmem:[%s1243_s10 + $0xd8] sm:$0xff]  ;;  %v1291_v17 = vld [vmem:[%s1579_s0 + $0x20] sm:$0xff]  ;;  %v526_v19 = vld [vmem:[%s1172_s29 + $0x150] sm:$0xff] }
  0x2a   : > { %1069 = vmatmul.msk.f32.vlgmr.msra.gmra.mxu2 %vm372_vm0, %v1227_v50  ;;  %432 = vmatpush.msra.mxu1 %v346_v52  ;;  %v1297_v18 = vld [vmem:[%s1579_s0 + $0x40] sm:$0xff]  ;;  %v510_v20 = vld [vmem:[%s1172_s29 + $0xd0] sm:$0xff]  ;;  %v525_v23 = vld [vmem:[%s1172_s29 + $0x148] sm:$0xff] }
  0x2b   : > { %542 = vmatpush.msra.mxu3 %v486_v53  ;;  %401 = vmatpush.msra.mxu0 %v329_v54  ;;  %v642_v21 = vld [vmem:[%s1243_s10 + $0x60] sm:$0xff]  ;;  %v656_v22 = vld [vmem:[%s1243_s10 + $0xd0] sm:$0xff]  ;;  %v509_v24 = vld [vmem:[%s1172_s29 + $0xc8] sm:$0xff] }
  0x2c   : > { %561 = vmatpush.msrb.mxu2 %v515_v55  ;;  %433 = vmatpush.msra.mxu1 %v345_v56  ;;  %v641_v25 = vld [vmem:[%s1243_s10 + $0x58] sm:$0xff]  ;;  %v655_v26 = vld [vmem:[%s1243_s10 + $0xc8] sm:$0xff]  ;;  %v524_v27 = vld [vmem:[%s1172_s29 + $0x140] sm:$0xff] }
  0x2d   : > { %543 = vmatpush.msra.mxu3 %v485_v57  ;;  %402 = vmatpush.msra.mxu0 %v328_v58  ;;  %v1315_v28 = vld [vmem:[%s1579_s0 + $0x30] sm:$0xff]  ;;  %v508_v29 = vld [vmem:[%s1172_s29 + $0xc0] sm:$0xff]  ;;  %v1323_v32 = vld [vmem:[%s1579_s0 + $0x38] sm:$0xff] }
  0x2e   : > { %562 = vmatpush.msrb.mxu2 %v514_v59  ;;  %434 = vmatpush.msra.mxu1 %v344_v60  ;;  %v640_v30 = vld [vmem:[%s1243_s10 + $0x50] sm:$0xff]  ;;  %v654_v31 = vld [vmem:[%s1243_s10 + $0xc0] sm:$0xff]  ;;  %v1329_v33 = vld [vmem:[%s1579_s0 + $0x58] sm:$0xff] }
  0x2f   : > { %544 = vmatpush.msra.mxu3 %v484_v61  ;;  %403 = vmatpush.msra.mxu0 %v327_v63  ;;  %v639_v34 = vld [vmem:[%s1243_s10 + $0x48] sm:$0xff]  ;;  %v507_v35 = vld [vmem:[%s1172_s29 + $0xb8] sm:$0xff]  ;;  %v638_v38 = vld [vmem:[%s1243_s10 + $0x40] sm:$0xff] }
  0x30   : > { %545 = vmatmul.f32.vlgmr.msra.gmra.mxu3 %v1251_v62  ;;  %435 = vmatpush.msra.mxu1 %v343_v1  ;;  %v523_v36 = vld [vmem:[%s1172_s29 + $0x138] sm:$0xff]  ;;  %v506_v39 = vld [vmem:[%s1172_s29 + $0xb0] sm:$0xff]  ;;  %v505_v43 = vld [vmem:[%s1172_s29 + $0xa8] sm:$0xff] }
  0x31   : > { %707 = vmatpush.msrb.mxu3 %v661_v0  ;;  %404 = vmatmul.f32.vlgmr.msra.gmra.mxu0 %v1251_v62  ;;  %v653_v37 = vld [vmem:[%s1243_s10 + $0xb8] sm:$0xff]  ;;  %v522_v40 = vld [vmem:[%s1172_s29 + $0x130] sm:$0xff]  ;;  %v1348_v44 = vld [vmem:[%s1579_s0 + $0x48] sm:$0xff] }
  0x32   : > { %436 = vmatmul.f32.vlgmr.msra.gmra.mxu1 %v1259_v2  ;;  %1070 = vmatmul.msk.f32.gmra.mxu2 %vm372_vm0, %v1265_v3  ;;  %v652_v41 = vld [vmem:[%s1243_s10 + $0xb0] sm:$0xff]  ;;  %v637_v42 = vld [vmem:[%s1243_s10 + $0x38] sm:$0xff]  ;;  %v651_v45 = vld [vmem:[%s1243_s10 + $0xa8] sm:$0xff] }
  0x33   : > { %708 = vmatpush.msrb.mxu3 %v660_v4  ;;  %563 = vmatpush.msrb.mxu2 %v513_v5  ;;  %v521_v46 = vld [vmem:[%s1172_s29 + $0x128] sm:$0xff]  ;;  %v504_v47 = vld [vmem:[%s1172_s29 + $0xa0] sm:$0xff]  ;;  %v1357_v48 = vld [vmem:[%s1579_s0 + $0x50] sm:$0xff] }
  0x34   : > { %596 = vmatpush.msrb.mxu0 %v528_v6  ;;  %675 = vmatpush.msrb.mxu1 %v645_v7  ;;  %v1362_v49 = vld [vmem:[%s1579_s0 + $0x70] sm:$0xff]  ;;  %v503_v51 = vld [vmem:[%s1172_s29 + $0x98] sm:$0xff]  ;;  %v650_v53 = vld [vmem:[%s1243_s10 + $0xa0] sm:$0xff] }
  0x35   : > { %709 = vmatpush.msrb.mxu3 %v659_v8  ;;  %564 = vmatpush.msrb.mxu2 %v512_v9  ;;  %v636_v52 = vld [vmem:[%s1243_s10 + $0x30] sm:$0xff]  ;;  %v520_v54 = vld [vmem:[%s1172_s29 + $0x120] sm:$0xff]  ;;  %v635_v56 = vld [vmem:[%s1243_s10 + $0x28] sm:$0xff] }
  0x36   : > { %597 = vmatpush.msrb.mxu0 %v527_v10  ;;  %676 = vmatpush.msrb.mxu1 %v644_v11  ;;  %v502_v55 = vld [vmem:[%s1172_s29 + $0x90] sm:$0xff]  ;;  %v649_v57 = vld [vmem:[%s1243_s10 + $0x98] sm:$0xff]  ;;  %v501_v59 = vld [vmem:[%s1172_s29 + $0x88] sm:$0xff] }
  0x37   : > { %710 = vmatpush.msrb.mxu3 %v658_v12  ;;  %565 = vmatpush.msrb.mxu2 %v511_v14  ;;  %v519_v58 = vld [vmem:[%s1172_s29 + $0x118] sm:$0xff]  ;;  %v1380_v60 = vld [vmem:[%s1579_s0 + $0x60] sm:$0xff]  ;;  %v648_v63 = vld [vmem:[%s1243_s10 + $0x90] sm:$0xff] }
  0x38   : > { %548 = vmatmul.f32.gmra.mxu3 %v1283_v13  ;;  %677 = vmatpush.msrb.mxu1 %v643_v15  ;;  %v634_v61 = vld [vmem:[%s1243_s10 + $0x20] sm:$0xff]  ;;  %v1389_v1 = vld [vmem:[%s1579_s0 + $0x68] sm:$0xff]  ;;  %v633_v4 = vld [vmem:[%s1243_s10 + $0x18] sm:$0xff] }
  0x39   : > { %711 = vmatpush.msrb.mxu3 %v657_v16  ;;  %407 = vmatmul.f32.gmra.mxu0 %v1283_v13  ;;  %v500_v0 = vld [vmem:[%s1172_s29 + $0x80] sm:$0xff]  ;;  %v518_v5 = vld [vmem:[%s1172_s29 + $0x110] sm:$0xff]  ;;  %v647_v6 = vld [vmem:[%s1243_s10 + $0x88] sm:$0xff] }
  0x3a   : > { %439 = vmatmul.f32.gmra.mxu1 %v1291_v17  ;;  %1071 = vmatmul.msk.f32.gmra.mxu2 %vm372_vm0, %v1297_v18  ;;  %v674_v7 = vld [vmem:[%s1243_s10 + $0x160] sm:$0xff]  ;;  %v632_v8 = vld [vmem:[%s1243_s10 + $0x10] sm:$0xff]  ;;  %v517_v9 = vld [vmem:[%s1172_s29 + $0x108] sm:$0xff] }
  0x3b   : > { %598 = vmatpush.msrb.mxu0 %v526_v19  ;;  %566 = vmatpush.msrb.mxu2 %v510_v20  ;;  %v646_v10 = vld [vmem:[%s1243_s10 + $0x80] sm:$0xff]  ;;  %v673_v11 = vld [vmem:[%s1243_s10 + $0x158] sm:$0xff]  ;;  %v631_v12 = vld [vmem:[%s1243_s10 + $0x8] sm:$0xff] }
  0x3c   : > { %678 = vmatpush.msrb.mxu1 %v642_v21  ;;  %712 = vmatpush.msrb.mxu3 %v656_v22  ;;  %v820_v14 = vld [vmem:[%s1407_s25 + $0x160] sm:$0xff]  ;;  %v791_v19 = vld [vmem:[%s1407_s25 + $0x78] sm:$0xff]  ;;  %v672_v22 = vld [vmem:[%s1243_s10 + $0x150] sm:$0xff] }
  0x3d   : > { %599 = vmatpush.msrb.mxu0 %v525_v23  ;;  %567 = vmatpush.msrb.mxu2 %v509_v24  ;;  %v516_v15 = vld [vmem:[%s1172_s29 + $0x100] sm:$0xff]  ;;  %v807_v20 = vld [vmem:[%s1407_s25 + $0xf8] sm:$0xff]  ;;  %v790_v23 = vld [vmem:[%s1407_s25 + $0x70] sm:$0xff] }
  0x3e   : > { %679 = vmatpush.msrb.mxu1 %v641_v25  ;;  %713 = vmatpush.msrb.mxu3 %v655_v26  ;;  %v630_v16 = vld [vmem:[%s1243_s10] sm:$0xff]  ;;  %v819_v21 = vld [vmem:[%s1407_s25 + $0x158] sm:$0xff]  ;;  %v806_v24 = vld [vmem:[%s1407_s25 + $0xf0] sm:$0xff] }
  0x3f   : > { %600 = vmatpush.msrb.mxu0 %v524_v27  ;;  %568 = vmatpush.msrb.mxu2 %v508_v29  ;;  %v818_v25 = vld [vmem:[%s1407_s25 + $0x150] sm:$0xff]  ;;  %v671_v26 = vld [vmem:[%s1243_s10 + $0x148] sm:$0xff] }
  0x40   : > { %551 = vmatmul.f32.gmra.mxu3 %v1315_v28  ;;  %680 = vmatpush.msrb.mxu1 %v640_v30  ;;  %v789_v27 = vld [vmem:[%s1407_s25 + $0x68] sm:$0xff] }
  0x41   : > { %714 = vmatpush.msrb.mxu3 %v654_v31  ;;  %410 = vmatmul.f32.gmra.mxu0 %v1315_v28  ;;  %v805_v29 = vld [vmem:[%s1407_s25 + $0xe8] sm:$0xff]  ;;  %v670_v31 = vld [vmem:[%s1243_s10 + $0x140] sm:$0xff] }
  0x42   : > { %442 = vmatmul.f32.gmra.mxu1 %v1323_v32  ;;  %1072 = vmatmul.msk.f32.gmra.mxu2 %vm372_vm0, %v1329_v33  ;;  %v817_v30 = vld [vmem:[%s1407_s25 + $0x148] sm:$0xff] }
  0x43   : > { %681 = vmatpush.msrb.mxu1 %v639_v34  ;;  %569 = vmatpush.msrb.mxu2 %v507_v35  ;;  %v788_v34 = vld [vmem:[%s1407_s25 + $0x60] sm:$0xff] }
  0x44   : > { %601 = vmatpush.msrb.mxu0 %v523_v36  ;;  %715 = vmatpush.msrb.mxu3 %v653_v37  ;;  %v804_v35 = vld [vmem:[%s1407_s25 + $0xe0] sm:$0xff]  ;;  %v669_v37 = vld [vmem:[%s1243_s10 + $0x138] sm:$0xff] }
  0x45   : > { %682 = vmatpush.msrb.mxu1 %v638_v38  ;;  %570 = vmatpush.msrb.mxu2 %v506_v39  ;;  %v816_v36 = vld [vmem:[%s1407_s25 + $0x140] sm:$0xff]  ;;  %v787_v38 = vld [vmem:[%s1407_s25 + $0x58] sm:$0xff] }
  0x46   : > { %602 = vmatpush.msrb.mxu0 %v522_v40  ;;  %716 = vmatpush.msrb.mxu3 %v652_v41  ;;  %v803_v39 = vld [vmem:[%s1407_s25 + $0xd8] sm:$0xff]  ;;  %v668_v41 = vld [vmem:[%s1243_s10 + $0x130] sm:$0xff] }
  0x47   : > { %683 = vmatpush.msrb.mxu1 %v637_v42  ;;  %571 = vmatpush.msrb.mxu2 %v505_v43  ;;  %v815_v40 = vld [vmem:[%s1407_s25 + $0x138] sm:$0xff]  ;;  %v786_v42 = vld [vmem:[%s1407_s25 + $0x50] sm:$0xff] }
  0x48   : > { %554 = vmatmul.f32.gmra.mxu3 %v1348_v44  ;;  %603 = vmatpush.msrb.mxu0 %v521_v46  ;;  %v802_v43 = vld [vmem:[%s1407_s25 + $0xd0] sm:$0xff]  ;;  %v667_v46 = vld [vmem:[%s1243_s10 + $0x128] sm:$0xff] }
  0x49   : > { %717 = vmatpush.msrb.mxu3 %v651_v45  ;;  %572 = vmatpush.msrb.mxu2 %v504_v47  ;;  %v814_v45 = vld [vmem:[%s1407_s25 + $0x130] sm:$0xff]  ;;  %v785_v47 = vld [vmem:[%s1407_s25 + $0x48] sm:$0xff] }
  0x4a   : > { %413 = vmatmul.f32.gmra.mxu0 %v1348_v44  ;;  %445 = vmatmul.f32.gmra.mxu1 %v1357_v48 }
  0x4b   : > { %1073 = vmatmul.msk.f32.gmra.mxu2 %vm372_vm0, %v1362_v49  ;;  %684 = vmatpush.msrb.mxu1 %v636_v52  ;;  %v813_v52 = vld [vmem:[%s1407_s25 + $0x128] sm:$0xff] }
  0x4c   : > { %573 = vmatpush.msrb.mxu2 %v503_v51  ;;  %718 = vmatpush.msrb.mxu3 %v650_v53  ;;  %v801_v51 = vld [vmem:[%s1407_s25 + $0xc8] sm:$0xff]  ;;  %v784_v53 = vld [vmem:[%s1407_s25 + $0x40] sm:$0xff] }
  0x4d   : > { %604 = vmatpush.msrb.mxu0 %v520_v54  ;;  %685 = vmatpush.msrb.mxu1 %v635_v56  ;;  %v800_v54 = vld [vmem:[%s1407_s25 + $0xc0] sm:$0xff]  ;;  %v783_v56 = vld [vmem:[%s1407_s25 + $0x38] sm:$0xff] }
  0x4e   : > { %574 = vmatpush.msrb.mxu2 %v502_v55  ;;  %719 = vmatpush.msrb.mxu3 %v649_v57  ;;  %v666_v55 = vld [vmem:[%s1243_s10 + $0x120] sm:$0xff] }
  0x4f   : > { %605 = vmatpush.msrb.mxu0 %v519_v58  ;;  %686 = vmatpush.msrb.mxu1 %v634_v61  ;;  %v812_v57 = vld [vmem:[%s1407_s25 + $0x120] sm:$0xff]  ;;  %v799_v58 = vld [vmem:[%s1407_s25 + $0xb8] sm:$0xff]  ;;  %v782_v61 = vld [vmem:[%s1407_s25 + $0x30] sm:$0xff] }
  0x50   : > { %575 = vmatpush.msrb.mxu2 %v501_v59  ;;  %557 = vmatmul.f32.gmra.mxu3 %v1380_v60  ;;  %v665_v59 = vld [vmem:[%s1243_s10 + $0x118] sm:$0xff] }
  0x51   : > { %720 = vmatpush.msrb.mxu3 %v648_v63  ;;  %687 = vmatpush.msrb.mxu1 %v633_v4  ;;  %v798_v63 = vld [vmem:[%s1407_s25 + $0xb0] sm:$0xff] }
  0x52   : > { %576 = vmatpush.msrb.mxu2 %v500_v0  ;;  %416 = vmatmul.f32.gmra.mxu0 %v1380_v60  ;;  %v811_v0 = vld [vmem:[%s1407_s25 + $0x118] sm:$0xff]  ;;  %v664_v4 = vld [vmem:[%s1243_s10 + $0x110] sm:$0xff] }
  0x53   : > { %448 = vmatmul.f32.gmra.mxu1 %v1389_v1  ;;  %577 = vmatmul.f32.vlgmr.msrb.gmra.mxu2 %v1259_v2 }
  0x54   : > { %606 = vmatpush.msrb.mxu0 %v518_v5  ;;  %721 = vmatpush.msrb.mxu3 %v647_v6  ;;  %v781_v5 = vld [vmem:[%s1407_s25 + $0x28] sm:$0xff]  ;;  %v810_v6 = vld [vmem:[%s1407_s25 + $0x110] sm:$0xff] }
  0x55   : > { %742 = vmatpush.msra.mxu2 %v674_v7  ;;  %688 = vmatpush.msrb.mxu1 %v632_v8  ;;  %v797_v7 = vld [vmem:[%s1407_s25 + $0xa8] sm:$0xff] }
  0x56   : > { %607 = vmatpush.msrb.mxu0 %v517_v9  ;;  %722 = vmatpush.msrb.mxu3 %v646_v10  ;;  %v663_v8 = vld [vmem:[%s1243_s10 + $0x108] sm:$0xff]  ;;  %v780_v9 = vld [vmem:[%s1407_s25 + $0x20] sm:$0xff] }
  0x57   : > { %743 = vmatpush.msra.mxu2 %v673_v11  ;;  %689 = vmatpush.msrb.mxu1 %v631_v12  ;;  %v809_v10 = vld [vmem:[%s1407_s25 + $0x108] sm:$0xff]  ;;  %v796_v11 = vld [vmem:[%s1407_s25 + $0xa0] sm:$0xff] }
  0x58   : > { %723 = vmatmul.f32.vlgmr.msrb.gmra.mxu3 %v1259_v2  ;;  %608 = vmatpush.msrb.mxu0 %v516_v15  ;;  %v662_v12 = vld [vmem:[%s1243_s10 + $0x100] sm:$0xff]  ;;  %v795_v15 = vld [vmem:[%s1407_s25 + $0x98] sm:$0xff] }
  0x59   : > { %888 = vmatpush.msra.mxu3 %v820_v14  ;;  %690 = vmatpush.msrb.mxu1 %v630_v16  ;;  %v779_v14 = vld [vmem:[%s1407_s25 + $0x18] sm:$0xff]  ;;  %v778_v16 = vld [vmem:[%s1407_s25 + $0x10] sm:$0xff] }
  0x5a   : > { %1074 = vmatmul.msk.f32.vlgmr.msrb.gmra.mxu0 %vm372_vm0, %v1227_v50  ;;  %744 = vmatpush.msra.mxu2 %v672_v22  ;;  %v793_v22 = vld [vmem:[%s1407_s25 + $0x88] sm:$0xff] }
  0x5b   : > { %580 = vmatmul.f32.gmra.mxu2 %v1291_v17  ;;  %691 = vmatmul.f32.vlgmr.msrb.gmra.mxu1 %v1251_v62 }
  0x5c   : > { %821 = vmatpush.msra.mxu0 %v791_v19  ;;  %853 = vmatpush.msra.mxu1 %v807_v20  ;;  %v794_v19 = vld [vmem:[%s1407_s25 + $0x90] sm:$0xff]  ;;  %v808_v20 = vld [vmem:[%s1407_s25 + $0x100] sm:$0xff] }
  0x5d   : > { %889 = vmatpush.msra.mxu3 %v819_v21  ;;  %745 = vmatpush.msra.mxu2 %v671_v26  ;;  %v777_v21 = vld [vmem:[%s1407_s25 + $0x8] sm:$0xff]  ;;  %v1113_v26 = vmov 0  }
  0x5e   : > { %822 = vmatpush.msra.mxu0 %v790_v23  ;;  %854 = vmatpush.msra.mxu1 %v806_v24  ;;  %v776_v23 = vld [vmem:[%s1407_s25] sm:$0xff] }
  0x5f   : > { %890 = vmatpush.msra.mxu3 %v818_v25  ;;  %746 = vmatpush.msra.mxu2 %v670_v31  ;;  %v922_v24 = vld [vmem:[%s1580_s1] sm:$0xff] }
  0x60   : > { %726 = vmatmul.f32.gmra.mxu3 %v1291_v17  ;;  %823 = vmatpush.msra.mxu0 %v789_v27  ;;  %v792_v25 = vld [vmem:[%s1407_s25 + $0x80] sm:$0xff]  ;;  %v923_v27 = vld [vmem:[%s1580_s1 + $0x8] sm:$0xff] }
  0x61   : > { %855 = vmatpush.msra.mxu1 %v805_v29  ;;  %891 = vmatpush.msra.mxu3 %v817_v30  ;;  %v924_v29 = vld [vmem:[%s1580_s1 + $0x10] sm:$0xff] }
  0x62   : > { %1075 = vmatmul.msk.f32.gmra.mxu0 %vm372_vm0, %v1265_v3  ;;  %747 = vmatpush.msra.mxu2 %v669_v37 }
  0x63   : > { %583 = vmatmul.f32.gmra.mxu2 %v1323_v32  ;;  %694 = vmatmul.f32.gmra.mxu1 %v1283_v13 }
  0x64   : > { %824 = vmatpush.msra.mxu0 %v788_v34  ;;  %856 = vmatpush.msra.mxu1 %v804_v35 }
  0x65   : > { %892 = vmatpush.msra.mxu3 %v816_v36  ;;  %748 = vmatpush.msra.mxu2 %v668_v41 }
  0x66   : > { %825 = vmatpush.msra.mxu0 %v787_v38  ;;  %857 = vmatpush.msra.mxu1 %v803_v39 }
  0x67   : > { %893 = vmatpush.msra.mxu3 %v815_v40  ;;  %749 = vmatpush.msra.mxu2 %v667_v46 }
  0x68   : > { %729 = vmatmul.f32.gmra.mxu3 %v1323_v32  ;;  %826 = vmatpush.msra.mxu0 %v786_v42 }
  0x69   : > { %858 = vmatpush.msra.mxu1 %v802_v43  ;;  %894 = vmatpush.msra.mxu3 %v814_v45 }
  0x6a   : > { %1076 = vmatmul.msk.f32.gmra.mxu0 %vm372_vm0, %v1297_v18  ;;  %750 = vmatpush.msra.mxu2 %v666_v55 }
  0x6b   : > { %586 = vmatmul.f32.gmra.mxu2 %v1357_v48  ;;  %827 = vmatpush.msra.mxu0 %v785_v47 }
  0x6c   : > { %859 = vmatpush.msra.mxu1 %v801_v51  ;;  %895 = vmatpush.msra.mxu3 %v813_v52 }
  0x6d   : > { %697 = vmatmul.f32.gmra.mxu1 %v1315_v28  ;;  %828 = vmatpush.msra.mxu0 %v784_v53 }
  0x6e   : > { %860 = vmatpush.msra.mxu1 %v800_v54  ;;  %896 = vmatpush.msra.mxu3 %v812_v57 }
  0x6f   : > { %829 = vmatpush.msra.mxu0 %v783_v56  ;;  %751 = vmatpush.msra.mxu2 %v665_v59 }
  0x70   : > { %732 = vmatmul.f32.gmra.mxu3 %v1357_v48  ;;  %861 = vmatpush.msra.mxu1 %v799_v58 }
  0x71   : > { %830 = vmatpush.msra.mxu0 %v782_v61  ;;  %897 = vmatpush.msra.mxu3 %v811_v0 }
  0x72   : > { %1077 = vmatmul.msk.f32.gmra.mxu0 %vm372_vm0, %v1329_v33  ;;  %862 = vmatpush.msra.mxu1 %v798_v63 }
  0x73   : > { %589 = vmatmul.f32.gmra.mxu2 %v1389_v1  ;;  %831 = vmatpush.msra.mxu0 %v781_v5 }
  0x74   : > { %752 = vmatpush.msra.mxu2 %v664_v4  ;;  %898 = vmatpush.msra.mxu3 %v810_v6 }
  0x75   : > { %700 = vmatmul.f32.gmra.mxu1 %v1348_v44  ;;  %832 = vmatpush.msra.mxu0 %v780_v9 }
  0x76   : > { %863 = vmatpush.msra.mxu1 %v797_v7  ;;  %753 = vmatpush.msra.mxu2 %v663_v8 }
  0x77   : > { %899 = vmatpush.msra.mxu3 %v809_v10  ;;  %833 = vmatpush.msra.mxu0 %v779_v14 }
  0x78   : > { %735 = vmatmul.f32.gmra.mxu3 %v1389_v1  ;;  %864 = vmatpush.msra.mxu1 %v796_v11 }
  0x79   : > { %754 = vmatpush.msra.mxu2 %v662_v12  ;;  %834 = vmatpush.msra.mxu0 %v778_v16 }
  0x7a   : > { %1078 = vmatmul.msk.f32.gmra.mxu0 %vm372_vm0, %v1362_v49  ;;  %865 = vmatpush.msra.mxu1 %v795_v15 }
  0x7b   : > { %1079 = vmatmul.msk.f32.vlgmr.msra.gmra.mxu2 %vm372_vm0, %v1227_v50  ;;  %900 = vmatpush.msra.mxu3 %v808_v20 }
  0x7c   : > { %866 = vmatpush.msra.mxu1 %v794_v19  ;;  %835 = vmatpush.msra.mxu0 %v777_v21 }
  0x7d   : > { %703 = vmatmul.f32.gmra.mxu1 %v1380_v60  ;;  %1102 = vset.pattern.permute.xlu0 %v1113_v26 }
  0x7e   : > { %867 = vmatpush.msra.mxu1 %v793_v22  ;;  %836 = vmatpush.msra.mxu0 %v776_v23 }
  0x7f   : > { %929 = vperm.xlu0 %1102, %v922_v24   ;;  %1103 = vset.pattern.permute.xlu1 %v1113_v26 }
  0x80   : > { %1084 = vmatmul.msk.f32.vlgmr.msra.gmra.mxu3 %vm372_vm0, %v1227_v50  ;;  %868 = vmatpush.msra.mxu1 %v792_v25  ;;  %v925_v50 = vld [vmem:[%s1580_s1 + $0x18] sm:$0xff] }
  0x81   : > { %1104 = vset.pattern.permute.xlu2 %v1113_v26  ;;  %939 = vperm.xlu1 %1103, %v924_v29  }
  0x82   : > { %837 = vmatmul.f32.vlgmr.msra.gmra.mxu0 %v1251_v62  ;;  %v926_v62 = vld [vmem:[%s1580_s1 + $0x20] sm:$0xff] }
  0x83   : > { %1080 = vmatmul.msk.f32.gmra.mxu2 %vm372_vm0, %v1265_v3  ;;  %949 = vperm.xlu2 %1104, %v926_v62  }
  0x85   : > { %869 = vmatmul.f32.vlgmr.msra.gmra.mxu1 %v1259_v2 }
  0x87   : > { %934 = vperm.xlu0 %1102, %v923_v27  }
  0x88   : > { %1085 = vmatmul.msk.f32.gmra.mxu3 %vm372_vm0, %v1265_v3 }
  0x89   : > { %944 = vperm.xlu1 %1103, %v925_v50  }
  0x8a   : > { %840 = vmatmul.f32.gmra.mxu0 %v1283_v13 }
  0x8b   : > { %1081 = vmatmul.msk.f32.gmra.mxu2 %vm372_vm0, %v1297_v18 }
  0x8d   : > { %872 = vmatmul.f32.gmra.mxu1 %v1291_v17 }
  0x90   : > { %1086 = vmatmul.msk.f32.gmra.mxu3 %vm372_vm0, %v1297_v18 }
  0x92   : > { %843 = vmatmul.f32.gmra.mxu0 %v1315_v28 }
  0x93   : > { %1082 = vmatmul.msk.f32.gmra.mxu2 %vm372_vm0, %v1329_v33 }
  0x95   : > { %875 = vmatmul.f32.gmra.mxu1 %v1323_v32 }
  0x98   : > { %1087 = vmatmul.msk.f32.gmra.mxu3 %vm372_vm0, %v1329_v33 }
  0x9a   : > { %846 = vmatmul.f32.gmra.mxu0 %v1348_v44 }
  0x9b   : > { %1083 = vmatmul.msk.f32.gmra.mxu2 %vm372_vm0, %v1362_v49 }
  0x9d   : > { %878 = vmatmul.f32.gmra.mxu1 %v1357_v48 }
  0xa0   : > { %1088 = vmatmul.msk.f32.gmra.mxu3 %vm372_vm0, %v1362_v49 }
  0xa2   : > { %849 = vmatmul.f32.gmra.mxu0 %v1380_v60 }
  0xa5   : > { %881 = vmatmul.f32.gmra.mxu1 %v1389_v1 }
  0xad   : > { %v469_v2 = vpop.f32.mrf.mxu2 }
  0xae   : > { %v405_v3 = vpop.f32.mrf.mxu0 }
  0xaf   : > { %v437_v13 = vpop.f32.mrf.mxu1 }
  0xb0   : > { %v438_v17 = vadd.f32 %v437_v13, %v405_v3 }
  0xb2   : > { %v1536_v18 = vadd.f32 %v469_v2, %v438_v17 }
  0xb3   : > { %v546_v28 = vpop.f32.mrf.mxu3 }
  0xb5   : > { %v472_v32 = vpop.f32.mrf.mxu2 }
  0xb6   : > { %v408_v33 = vpop.f32.mrf.mxu0 }
  0xb7   : > { %v440_v44 = vpop.f32.mrf.mxu1 }
  0xb8   : > { %v441_v48 = vadd.f32 %v440_v44, %v408_v33 }
  0xba   : > { %v1538_v49 = vadd.f32 %v472_v32, %v441_v48 }
  0xbb   : > { %v549_v60 = vpop.f32.mrf.mxu3 }
  0xbd   : > { %v475_v1 = vpop.f32.mrf.mxu2 }
  0xbe   : > { %v411_v30 = vpop.f32.mrf.mxu0 }
  0xbf   : > { %v443_v31 = vpop.f32.mrf.mxu1 }
  0xc0   : > { %v444_v34 = vadd.f32 %v443_v31, %v411_v30 }
  0xc2   : > { %v1540_v35 = vadd.f32 %v475_v1, %v444_v34 }
  0xc3   : > { %v552_v36 = vpop.f32.mrf.mxu3 }
  0xc5   : > { %v478_v37 = vpop.f32.mrf.mxu2 }
  0xc7   : > { %v414_v38 = vpop.f32.mrf.mxu0  ;;  %v446_v39 = vpop.f32.mrf.mxu1 }
  0xc8   : > { %v447_v40 = vadd.f32 %v446_v39, %v414_v38 }
  0xca   : > { %v1542_v41 = vadd.f32 %v478_v37, %v447_v40 }
  0xcb   : > { %v555_v42 = vpop.f32.mrf.mxu3 }
  0xce   : > { %v481_v43 = vpop.f32.mrf.mxu2 }
  0xcf   : > { %v417_v45 = vpop.f32.mrf.mxu0 }
  0xd0   : > { %v449_v46 = vpop.f32.mrf.mxu1 }
  0xd1   : > { %v450_v47 = vadd.f32 %v449_v46, %v417_v45 }
  0xd3   : > { %v1544_v51 = vadd.f32 %v481_v43, %v450_v47  ;;  %v558_v52 = vpop.f32.mrf.mxu3 }
  0xd6   : > { %v578_v53 = vpop.f32.mrf.mxu2 }
  0xd7   : > { %v579_v54 = vadd.f32 %v578_v53, %v546_v28  ;;  %v610_v55 = vpop.f32.mrf.mxu0 }
  0xd8   : > { %v692_v56 = vpop.f32.mrf.mxu1 }
  0xd9   : > { %v611_v57 = vadd.f32 %v610_v55, %v579_v54 }
  0xdb   : > { %v625_v58 = vmax.f32 %v1536_v18, %v611_v57  ;;  %v724_v59 = vpop.f32.mrf.mxu3 }
  0xdc   : > { %v725_v13 = vadd.f32 %v724_v59, %v692_v56 }
  0xde   : > { %v581_v61 = vpop.f32.mrf.mxu2 }
  0xdf   : > { %v582_v63 = vadd.f32 %v581_v61, %v549_v60  ;;  %v613_v0 = vpop.f32.mrf.mxu0 }
  0xe0   : > { %v695_v4 = vpop.f32.mrf.mxu1 }
  0xe1   : > { %v614_v5 = vadd.f32 %v613_v0, %v582_v63 }
  0xe3   : > { %v626_v6 = vmax.f32 %v1538_v49, %v614_v5  ;;  %v727_v7 = vpop.f32.mrf.mxu3 }
  0xe4   : > { %v728_v1 = vadd.f32 %v727_v7, %v695_v4 }
  0xe6   : > { %v584_v8 = vpop.f32.mrf.mxu2 }
  0xe7   : > { %v585_v9 = vadd.f32 %v584_v8, %v552_v36  ;;  %v616_v10 = vpop.f32.mrf.mxu0 }
  0xe9   : > { %v617_v11 = vadd.f32 %v616_v10, %v585_v9 }
  0xea   : > { %v698_v12 = vpop.f32.mrf.mxu1 }
  0xeb   : > { %v627_v14 = vmax.f32 %v1540_v35, %v617_v11  ;;  %v730_v15 = vpop.f32.mrf.mxu3 }
  0xec   : > { %v731_v45 = vadd.f32 %v730_v15, %v698_v12 }
  0xee   : > { %v587_v16 = vpop.f32.mrf.mxu2 }
  0xef   : > { %v588_v19 = vadd.f32 %v587_v16, %v555_v42  ;;  %v619_v20 = vpop.f32.mrf.mxu0 }
  0xf1   : > { %v1549_v21 = vadd.f32 %v619_v20, %v588_v19  ;;  %v930_v44 = vpop.permute.xlu0 %929 }
  0xf2   : > { %v701_v22 = vpop.f32.mrf.mxu1 }
  0xf3   : > { %v628_v23 = vmax.f32 %v1542_v41, %v1549_v21  ;;  %v733_v24 = vpop.f32.mrf.mxu3 }
  0xf4   : > { %v734_v0 = vadd.f32 %v733_v24, %v701_v22 }
  0xf6   : > { %v590_v25 = vpop.f32.mrf.mxu2 }
  0xf7   : > { %v591_v26 = vadd.f32 %v590_v25, %v558_v52  ;;  %v622_v27 = vpop.f32.mrf.mxu0 }
  0xf9   : > { %v1553_v29 = vadd.f32 %v622_v27, %v591_v26  ;;  %v935_v43 = vpop.permute.xlu0 %934 }
  0xfa   : > { %v704_v50 = vpop.f32.mrf.mxu1 }
  0xfb   : > { %v629_v62 = vmax.f32 %v1544_v51, %v1553_v29  ;;  %v736_v2 = vpop.f32.mrf.mxu3 }
  0xfc   : > { %v737_v19 = vadd.f32 %v736_v2, %v704_v50 }
  0xfe   : > { %v756_v3 = vpop.f32.mrf.mxu2 }
  0xff   : > { %v838_v17 = vpop.f32.mrf.mxu0  ;;  %v757_v18 = vadd.f32 %v756_v3, %v725_v13 }
 0x101   : > { %v771_v48 = vmax.f32 %v625_v58, %v757_v18  ;;  %v940_v58 = vpop.permute.xlu1 %939 }
 0x102   : > { %v870_v28 = vpop.f32.mrf.mxu1 }
 0x103   : > { %v871_v32 = vadd.f32 %v870_v28, %v838_v17  ;;  %v902_v33 = vpop.f32.mrf.mxu3  ;;  %v950_v17 = vpop.permute.xlu2 %949 }
 0x105   : > { %v903_v49 = vadd.f32 %v902_v33, %v871_v32 }
 0x106   : > { %v759_v60 = vpop.f32.mrf.mxu2 }
 0x107   : > { %v917_v30 = vmax.f32 %v771_v48, %v903_v49  ;;  %v841_v31 = vpop.f32.mrf.mxu0  ;;  %v760_v34 = vadd.f32 %v759_v60, %v728_v1 }
 0x109   : > { %v952_v35 = vadd.f32 %v930_v44, %v917_v30  ;;  %v772_v40 = vmax.f32 %v626_v6, %v760_v34 }
 0x10a   : > { %v873_v36 = vpop.f32.mrf.mxu1 }
 0x10b   : > { %v957_v37 = vmax.f32 %v952_v35, 0.0  ;;  %v874_v38 = vadd.f32 %v873_v36, %v841_v31  ;;  %v905_v39 = vpop.f32.mrf.mxu3 }
 0x10d   : > { %963 = vst.msk [vmem:[%s1561_s14] sm:$0xff] %vm962_vm1, %v957_v37  ;;  %v906_v41 = vadd.f32 %v905_v39, %v874_v38 }
 0x10e   : > { %v762_v42 = vpop.f32.mrf.mxu2 }
 0x10f   : > { %v918_v46 = vmax.f32 %v772_v40, %v906_v41  ;;  %v844_v47 = vpop.f32.mrf.mxu0  ;;  %v763_v52 = vadd.f32 %v762_v42, %v731_v45 }
 0x111   : > { %v953_v53 = vadd.f32 %v935_v43, %v918_v46  ;;  %v773_v59 = vmax.f32 %v627_v14, %v763_v52  ;;  %v945_v14 = vpop.permute.xlu1 %944 }
 0x112   : > { %v876_v54 = vpop.f32.mrf.mxu1 }
 0x113   : > { %v958_v55 = vmax.f32 %v953_v53, 0.0  ;;  %v877_v56 = vadd.f32 %v876_v54, %v844_v47  ;;  %v908_v57 = vpop.f32.mrf.mxu3 }
 0x115   : > { %964 = vst.msk [vmem:[%s1561_s14 + $0x8] sm:$0xff] %vm962_vm1, %v958_v55  ;;  %v909_v61 = vadd.f32 %v908_v57, %v877_v56 }
 0x116   : > { %v765_v63 = vpop.f32.mrf.mxu2 }
 0x117   : > { %v919_v4 = vmax.f32 %v773_v59, %v909_v61  ;;  %v847_v5 = vpop.f32.mrf.mxu0  ;;  %v766_v6 = vadd.f32 %v765_v63, %v734_v0 }
 0x119   : > { %v954_v7 = vadd.f32 %v940_v58, %v919_v4  ;;  %v774_v12 = vmax.f32 %v628_v23, %v766_v6 }
 0x11a   : > { %v879_v8 = vpop.f32.mrf.mxu1 }
 0x11b   : > { %v959_v9 = vmax.f32 %v954_v7, 0.0  ;;  %v880_v10 = vadd.f32 %v879_v8, %v847_v5  ;;  %v911_v11 = vpop.f32.mrf.mxu3 }
 0x11d   : > { %965 = vst.msk [vmem:[%s1561_s14 + $0x10] sm:$0xff] %vm962_vm1, %v959_v9  ;;  %v912_v15 = vadd.f32 %v911_v11, %v880_v10 }
 0x11e   : > { %v768_v16 = vpop.f32.mrf.mxu2 }
 0x11f   : > { %v920_v20 = vmax.f32 %v774_v12, %v912_v15  ;;  %v850_v21 = vpop.f32.mrf.mxu0  ;;  %v769_v22 = vadd.f32 %v768_v16, %v737_v19 }
 0x121   : > { %v955_v24 = vadd.f32 %v945_v14, %v920_v20  ;;  %v775_v13 = vmax.f32 %v629_v62, %v769_v22 }
 0x122   : > { %v882_v25 = vpop.f32.mrf.mxu1 }
 0x123   : > { %v960_v26 = vmax.f32 %v955_v24, 0.0  ;;  %v883_v27 = vadd.f32 %v882_v25, %v850_v21  ;;  %v914_v3 = vpop.f32.mrf.mxu3 }
 0x125   : > { %966 = vst.msk [vmem:[%s1561_s14 + $0x18] sm:$0xff] %vm962_vm1, %v960_v26  ;;  %v915_v23 = vadd.f32 %v914_v3, %v883_v27 }
 0x127   : > { %v921_v18 = vmax.f32 %v775_v13, %v915_v23 }
 0x129   : > { %v956_v28 = vadd.f32 %v950_v17, %v921_v18 }
 0x12b   : > { %v961_v50 = vmax.f32 %v956_v28, 0.0 }
 0x12d   : > { %967 = vst.msk [vmem:[%s1561_s14 + $0x20] sm:$0xff] %vm962_vm1, %v961_v50 }
 0x12e PF: > { %s16_s21 = sadd.s32 1, %s1111_s21  }
 0x12f   : > { %p13_p4 = scmp.ge.s32.totalorder %s16_s21, 4  }
 0x131   :  { %15 = sbr.rel (!%p13_p4) target bundleno = 1 (0x1), region = 83 }

// kernel: net_forward.9
= control target key start
LH: loop header
LB: loop body
LE: loop exit
PB: predicated region body
PF: predicated region fallthrough
CT: control target
= control target key end

     0   :  { %s3867_s0 = inlined_call_operand.vmem [shape: f32[2,1000], index: 0, kind: input, shape index: {}]   ;;  %s3868_s1 = inlined_call_operand.vmem [shape: f32[1000,500], index: 1, kind: input, shape index: {}]   ;;  %s3869_s2 = inlined_call_operand.vmem [shape: f32[1,500], index: 2, kind: input, shape index: {}]   ;;  %s3870_s3 = inlined_call_operand.vmem [shape: f32[500,250], index: 3, kind: input, shape index: {}]   ;;  %s3871_s4 = inlined_call_operand.vmem [shape: f32[1,250], index: 4, kind: input, shape index: {}]   ;;  %s3872_s5 = inlined_call_operand.vmem [shape: f32[250,100], index: 5, kind: input, shape index: {}]   ;;  %s3873_s6 = inlined_call_operand.vmem [shape: f32[1,100], index: 6, kind: input, shape index: {}]   ;;  %s3874_s7 = inlined_call_operand.vmem [shape: f32[100,10], index: 7, kind: input, shape index: {}]   ;;  %s3875_s8 = inlined_call_operand.vmem [shape: f32[1,10], index: 8, kind: input, shape index: {}]   ;;  %s3876_s9 = inlined_call_operand.hbm [shape: f32[2,10], index: 9, kind: output, shape index: {}]  }
   0x1   :  { %v95_v0 = vld [vmem:[%s3868_s1 + $0x1e0] sm:$0xff] }
   0x2   :  { %v159_v1 = vld [vmem:[%s3868_s1 + $0x3e0] sm:$0xff]  ;;  %568 = vmatpush.msra.mxu0 %v95_v0 }
   0x3   :  { %v91_v2 = vld [vmem:[%s3868_s1 + $0x1c0] sm:$0xff]  ;;  %588 = vmatpush.msra.mxu1 %v159_v1 }
   0x4   :  { %v155_v3 = vld [vmem:[%s3868_s1 + $0x3c0] sm:$0xff]  ;;  %569 = vmatpush.msra.mxu0 %v91_v2 }
   0x5   :  { %v87_v4 = vld [vmem:[%s3868_s1 + $0x1a0] sm:$0xff]  ;;  %589 = vmatpush.msra.mxu1 %v155_v3 }
   0x6   :  { %v151_v5 = vld [vmem:[%s3868_s1 + $0x3a0] sm:$0xff]  ;;  %570 = vmatpush.msra.mxu0 %v87_v4 }
   0x7   :  { %v223_v6 = vld [vmem:[%s3868_s1 + $0x5e0] sm:$0xff]  ;;  %590 = vmatpush.msra.mxu1 %v151_v5 }
   0x8   :  { %v287_v7 = vld [vmem:[%s3868_s1 + $0x7e0] sm:$0xff]  ;;  %608 = vmatpush.msra.mxu2 %v223_v6 }
   0x9   :  { %v219_v8 = vld [vmem:[%s3868_s1 + $0x5c0] sm:$0xff]  ;;  %628 = vmatpush.msra.mxu3 %v287_v7 }
   0xa   :  { %v283_v9 = vld [vmem:[%s3868_s1 + $0x7c0] sm:$0xff]  ;;  %609 = vmatpush.msra.mxu2 %v219_v8 }
   0xb   :  { %v83_v10 = vld [vmem:[%s3868_s1 + $0x180] sm:$0xff]  ;;  %629 = vmatpush.msra.mxu3 %v283_v9 }
   0xc   :  { %v147_v11 = vld [vmem:[%s3868_s1 + $0x380] sm:$0xff]  ;;  %571 = vmatpush.msra.mxu0 %v83_v10 }
   0xd   :  { %v215_v12 = vld [vmem:[%s3868_s1 + $0x5a0] sm:$0xff]  ;;  %591 = vmatpush.msra.mxu1 %v147_v11 }
   0xe   :  { %v279_v13 = vld [vmem:[%s3868_s1 + $0x7a0] sm:$0xff]  ;;  %610 = vmatpush.msra.mxu2 %v215_v12 }
   0xf   :  { %v79_v14 = vld [vmem:[%s3868_s1 + $0x160] sm:$0xff]  ;;  %630 = vmatpush.msra.mxu3 %v279_v13 }
  0x10   :  { %v143_v15 = vld [vmem:[%s3868_s1 + $0x360] sm:$0xff]  ;;  %572 = vmatpush.msra.mxu0 %v79_v14 }
  0x11   :  { %v211_v16 = vld [vmem:[%s3868_s1 + $0x580] sm:$0xff]  ;;  %592 = vmatpush.msra.mxu1 %v143_v15 }
  0x12   :  { %v275_v17 = vld [vmem:[%s3868_s1 + $0x780] sm:$0xff]  ;;  %611 = vmatpush.msra.mxu2 %v211_v16 }
  0x13   :  { %v75_v18 = vld [vmem:[%s3868_s1 + $0x140] sm:$0xff]  ;;  %631 = vmatpush.msra.mxu3 %v275_v17 }
  0x14   :  { %v139_v19 = vld [vmem:[%s3868_s1 + $0x340] sm:$0xff]  ;;  %573 = vmatpush.msra.mxu0 %v75_v18 }
  0x15   :  { %v207_v20 = vld [vmem:[%s3868_s1 + $0x560] sm:$0xff]  ;;  %593 = vmatpush.msra.mxu1 %v139_v19 }
  0x16   :  { %v271_v21 = vld [vmem:[%s3868_s1 + $0x760] sm:$0xff]  ;;  %612 = vmatpush.msra.mxu2 %v207_v20 }
  0x17   :  { %v71_v22 = vld [vmem:[%s3868_s1 + $0x120] sm:$0xff]  ;;  %632 = vmatpush.msra.mxu3 %v271_v21 }
  0x18   :  { %v135_v23 = vld [vmem:[%s3868_s1 + $0x320] sm:$0xff]  ;;  %574 = vmatpush.msra.mxu0 %v71_v22 }
  0x19   :  { %v203_v24 = vld [vmem:[%s3868_s1 + $0x540] sm:$0xff]  ;;  %594 = vmatpush.msra.mxu1 %v135_v23 }
  0x1a   :  { %v267_v25 = vld [vmem:[%s3868_s1 + $0x740] sm:$0xff]  ;;  %613 = vmatpush.msra.mxu2 %v203_v24 }
  0x1b   :  { %v67_v26 = vld [vmem:[%s3868_s1 + $0x100] sm:$0xff]  ;;  %633 = vmatpush.msra.mxu3 %v267_v25 }
  0x1c   :  { %v131_v27 = vld [vmem:[%s3868_s1 + $0x300] sm:$0xff]  ;;  %575 = vmatpush.msra.mxu0 %v67_v26 }
  0x1d   :  { %v199_v28 = vld [vmem:[%s3868_s1 + $0x520] sm:$0xff]  ;;  %595 = vmatpush.msra.mxu1 %v131_v27 }
  0x1e   :  { %v263_v29 = vld [vmem:[%s3868_s1 + $0x720] sm:$0xff]  ;;  %614 = vmatpush.msra.mxu2 %v199_v28 }
  0x1f   :  { %v63_v30 = vld [vmem:[%s3868_s1 + $0xe0] sm:$0xff]  ;;  %634 = vmatpush.msra.mxu3 %v263_v29  ;;  %v34_v29 = vld [vmem:[%s3867_s0 + $0x8] sm:$0xff] }
  0x20   :  { %v127_v31 = vld [vmem:[%s3868_s1 + $0x2e0] sm:$0xff]  ;;  %576 = vmatpush.msra.mxu0 %v63_v30  ;;  %549 = vst [vmem:[#allocation1 + $0x20] ss:$4 sm:$0xff] %v34_v29 }
  0x21   :  { %v195_v32 = vld [vmem:[%s3868_s1 + $0x500] sm:$0xff]  ;;  %596 = vmatpush.msra.mxu1 %v127_v31 }
  0x22   :  { %v259_v33 = vld [vmem:[%s3868_s1 + $0x700] sm:$0xff]  ;;  %615 = vmatpush.msra.mxu2 %v195_v32 }
  0x23   :  { %v59_v34 = vld [vmem:[%s3868_s1 + $0xc0] sm:$0xff]  ;;  %635 = vmatpush.msra.mxu3 %v259_v33 }
  0x24   :  { %v123_v35 = vld [vmem:[%s3868_s1 + $0x2c0] sm:$0xff]  ;;  %577 = vmatpush.msra.mxu0 %v59_v34 }
  0x25   :  { %v191_v36 = vld [vmem:[%s3868_s1 + $0x4e0] sm:$0xff]  ;;  %597 = vmatpush.msra.mxu1 %v123_v35 }
  0x26   :  { %v255_v37 = vld [vmem:[%s3868_s1 + $0x6e0] sm:$0xff]  ;;  %616 = vmatpush.msra.mxu2 %v191_v36 }
  0x27   :  { %v55_v38 = vld [vmem:[%s3868_s1 + $0xa0] sm:$0xff]  ;;  %636 = vmatpush.msra.mxu3 %v255_v37 }
  0x28   :  { %v119_v39 = vld [vmem:[%s3868_s1 + $0x2a0] sm:$0xff]  ;;  %578 = vmatpush.msra.mxu0 %v55_v38 }
  0x29   :  { %v187_v40 = vld [vmem:[%s3868_s1 + $0x4c0] sm:$0xff]  ;;  %598 = vmatpush.msra.mxu1 %v119_v39 }
  0x2a   :  { %v251_v41 = vld [vmem:[%s3868_s1 + $0x6c0] sm:$0xff]  ;;  %617 = vmatpush.msra.mxu2 %v187_v40 }
  0x2b   :  { %v51_v42 = vld [vmem:[%s3868_s1 + $0x80] sm:$0xff]  ;;  %637 = vmatpush.msra.mxu3 %v251_v41 }
  0x2c   :  { %v115_v43 = vld [vmem:[%s3868_s1 + $0x280] sm:$0xff]  ;;  %579 = vmatpush.msra.mxu0 %v51_v42 }
  0x2d   :  { %v183_v44 = vld [vmem:[%s3868_s1 + $0x4a0] sm:$0xff]  ;;  %599 = vmatpush.msra.mxu1 %v115_v43 }
  0x2e   :  { %v247_v45 = vld [vmem:[%s3868_s1 + $0x6a0] sm:$0xff]  ;;  %618 = vmatpush.msra.mxu2 %v183_v44 }
  0x2f   :  { %v47_v46 = vld [vmem:[%s3868_s1 + $0x60] sm:$0xff]  ;;  %638 = vmatpush.msra.mxu3 %v247_v45 }
  0x30   :  { %v111_v47 = vld [vmem:[%s3868_s1 + $0x260] sm:$0xff]  ;;  %580 = vmatpush.msra.mxu0 %v47_v46 }
  0x31   :  { %v179_v48 = vld [vmem:[%s3868_s1 + $0x480] sm:$0xff]  ;;  %600 = vmatpush.msra.mxu1 %v111_v47 }
  0x32   :  { %v243_v49 = vld [vmem:[%s3868_s1 + $0x680] sm:$0xff]  ;;  %619 = vmatpush.msra.mxu2 %v179_v48 }
  0x33   :  { %v43_v50 = vld [vmem:[%s3868_s1 + $0x40] sm:$0xff]  ;;  %639 = vmatpush.msra.mxu3 %v243_v49 }
  0x34   :  { %v107_v51 = vld [vmem:[%s3868_s1 + $0x240] sm:$0xff]  ;;  %581 = vmatpush.msra.mxu0 %v43_v50 }
  0x35   :  { %v175_v52 = vld [vmem:[%s3868_s1 + $0x460] sm:$0xff]  ;;  %601 = vmatpush.msra.mxu1 %v107_v51 }
  0x36   :  { %v239_v53 = vld [vmem:[%s3868_s1 + $0x660] sm:$0xff]  ;;  %620 = vmatpush.msra.mxu2 %v175_v52 }
  0x37   :  { %v39_v54 = vld [vmem:[%s3868_s1 + $0x20] sm:$0xff]  ;;  %640 = vmatpush.msra.mxu3 %v239_v53 }
  0x38   :  { %v103_v55 = vld [vmem:[%s3868_s1 + $0x220] sm:$0xff]  ;;  %582 = vmatpush.msra.mxu0 %v39_v54 }
  0x39   :  { %v171_v56 = vld [vmem:[%s3868_s1 + $0x440] sm:$0xff]  ;;  %602 = vmatpush.msra.mxu1 %v103_v55 }
  0x3a   :  { %v235_v57 = vld [vmem:[%s3868_s1 + $0x640] sm:$0xff]  ;;  %621 = vmatpush.msra.mxu2 %v171_v56 }
  0x3b   :  { %v35_v58 = vld [vmem:[%s3868_s1] sm:$0xff]  ;;  %641 = vmatpush.msra.mxu3 %v235_v57 }
  0x3c   :  { %v99_v59 = vld [vmem:[%s3868_s1 + $0x200] sm:$0xff]  ;;  %583 = vmatpush.msra.mxu0 %v35_v58 }
  0x3d   :  { %v351_v60 = vld [vmem:[%s3868_s1 + $0x9e0] sm:$0xff]  ;;  %603 = vmatpush.msra.mxu1 %v99_v59 }
  0x3e   :  { %v415_v61 = vld [vmem:[%s3868_s1 + $0xbe0] sm:$0xff]  ;;  %648 = vmatpush.msrb.mxu0 %v351_v60 }
  0x3f   :  { %v167_v62 = vld [vmem:[%s3868_s1 + $0x420] sm:$0xff]  ;;  %668 = vmatpush.msrb.mxu1 %v415_v61 }
  0x40   :  { %v231_v63 = vld [vmem:[%s3868_s1 + $0x620] sm:$0xff]  ;;  %622 = vmatpush.msra.mxu2 %v167_v62 }
  0x41   :  { %v347_v0 = vld [vmem:[%s3868_s1 + $0x9c0] sm:$0xff]  ;;  %642 = vmatpush.msra.mxu3 %v231_v63 }
  0x42   :  { %v411_v1 = vld [vmem:[%s3868_s1 + $0xbc0] sm:$0xff]  ;;  %649 = vmatpush.msrb.mxu0 %v347_v0 }
  0x43   :  { %v163_v2 = vld [vmem:[%s3868_s1 + $0x400] sm:$0xff]  ;;  %669 = vmatpush.msrb.mxu1 %v411_v1 }
  0x44   :  { %v227_v3 = vld [vmem:[%s3868_s1 + $0x600] sm:$0xff]  ;;  %623 = vmatpush.msra.mxu2 %v163_v2 }
  0x45   :  { %v343_v4 = vld [vmem:[%s3868_s1 + $0x9a0] sm:$0xff]  ;;  %643 = vmatpush.msra.mxu3 %v227_v3 }
  0x46   :  { %v407_v5 = vld [vmem:[%s3868_s1 + $0xba0] sm:$0xff]  ;;  %650 = vmatpush.msrb.mxu0 %v343_v4 }
  0x47   :  { %v479_v6 = vld [vmem:[%s3868_s1 + $0xde0] sm:$0xff]  ;;  %670 = vmatpush.msrb.mxu1 %v407_v5 }
  0x48   :  { %v531_v7 = vld [vmem:[%s3868_s1 + $0xf80] sm:$0xff]  ;;  %688 = vmatpush.msrb.mxu2 %v479_v6 }
  0x49   :  { %v339_v8 = vld [vmem:[%s3868_s1 + $0x980] sm:$0xff]  ;;  %711 = vmatpush.msrb.mxu3 %v531_v7 }
  0x4a   :  { %v403_v9 = vld [vmem:[%s3868_s1 + $0xb80] sm:$0xff]  ;;  %651 = vmatpush.msrb.mxu0 %v339_v8 }
  0x4b   :  { %v475_v10 = vld [vmem:[%s3868_s1 + $0xdc0] sm:$0xff]  ;;  %671 = vmatpush.msrb.mxu1 %v403_v9 }
  0x4c   :  { %v527_v11 = vld [vmem:[%s3868_s1 + $0xf60] sm:$0xff]  ;;  %689 = vmatpush.msrb.mxu2 %v475_v10 }
  0x4d   :  { %v335_v12 = vld [vmem:[%s3868_s1 + $0x960] sm:$0xff]  ;;  %712 = vmatpush.msrb.mxu3 %v527_v11 }
  0x4e   :  { %v399_v13 = vld [vmem:[%s3868_s1 + $0xb60] sm:$0xff]  ;;  %652 = vmatpush.msrb.mxu0 %v335_v12 }
  0x4f   :  { %v471_v14 = vld [vmem:[%s3868_s1 + $0xda0] sm:$0xff]  ;;  %672 = vmatpush.msrb.mxu1 %v399_v13 }
  0x50   :  { %v523_v15 = vld [vmem:[%s3868_s1 + $0xf40] sm:$0xff]  ;;  %690 = vmatpush.msrb.mxu2 %v471_v14 }
  0x51   :  { %v33_v16 = vld [vmem:[%s3867_s0] sm:$0xff]  ;;  %713 = vmatpush.msrb.mxu3 %v523_v15 }
  0x52   :  { %v331_v17 = vld [vmem:[%s3868_s1 + $0x940] sm:$0xff]  ;;  %547 = vst [vmem:[#allocation1] ss:$4 sm:$0xff] %v33_v16 }
  0x53   :  { %v395_v18 = vld [vmem:[%s3868_s1 + $0xb40] sm:$0xff]  ;;  %653 = vmatpush.msrb.mxu0 %v331_v17 }
  0x54   :  { %v467_v19 = vld [vmem:[%s3868_s1 + $0xd80] sm:$0xff]  ;;  %673 = vmatpush.msrb.mxu1 %v395_v18 }
  0x55   :  { %v519_v20 = vld [vmem:[%s3868_s1 + $0xf20] sm:$0xff]  ;;  %691 = vmatpush.msrb.mxu2 %v467_v19 }
  0x56   :  { %v327_v21 = vld [vmem:[%s3868_s1 + $0x920] sm:$0xff]  ;;  %714 = vmatpush.msrb.mxu3 %v519_v20 }
  0x57   :  { %v391_v22 = vld [vmem:[%s3868_s1 + $0xb20] sm:$0xff]  ;;  %654 = vmatpush.msrb.mxu0 %v327_v21 }
  0x58   :  { %v463_v23 = vld [vmem:[%s3868_s1 + $0xd60] sm:$0xff]  ;;  %674 = vmatpush.msrb.mxu1 %v391_v22 }
  0x59   :  { %v515_v24 = vld [vmem:[%s3868_s1 + $0xf00] sm:$0xff]  ;;  %692 = vmatpush.msrb.mxu2 %v463_v23  ;;  %v2118_v54 = vld.sshfl [vmem:[#allocation1 + $0x10] sm:$0xff pattern:$0x73625140] }
  0x5a   :  { %v323_v25 = vld [vmem:[%s3868_s1 + $0x900] sm:$0xff]  ;;  %715 = vmatpush.msrb.mxu3 %v515_v24  ;;  %v2134_v60 = vld.sshfl [vmem:[#allocation1 + $0x18] sm:$0xff pattern:$0x73625140]  ;;  %624 = vmatmul.f32.vlgmr.msra.gmra.mxu2 %v2118_v54 }
  0x5b   :  { %v387_v26 = vld [vmem:[%s3868_s1 + $0xb00] sm:$0xff]  ;;  %655 = vmatpush.msrb.mxu0 %v323_v25 }
  0x5c   :  { %v459_v27 = vld [vmem:[%s3868_s1 + $0xd40] sm:$0xff]  ;;  %675 = vmatpush.msrb.mxu1 %v387_v26 }
  0x5d   :  { %v511_v28 = vld [vmem:[%s3868_s1 + $0xee0] sm:$0xff]  ;;  %693 = vmatpush.msrb.mxu2 %v459_v27 }
  0x5e   :  { %v319_v30 = vld [vmem:[%s3868_s1 + $0x8e0] sm:$0xff]  ;;  %716 = vmatpush.msrb.mxu3 %v511_v28 }
  0x5f   :  { %v383_v31 = vld [vmem:[%s3868_s1 + $0xae0] sm:$0xff]  ;;  %656 = vmatpush.msrb.mxu0 %v319_v30 }
  0x60   :  { %v455_v32 = vld [vmem:[%s3868_s1 + $0xd20] sm:$0xff]  ;;  %676 = vmatpush.msrb.mxu1 %v383_v31 }
  0x61   :  { %v507_v33 = vld [vmem:[%s3868_s1 + $0xec0] sm:$0xff]  ;;  %694 = vmatpush.msrb.mxu2 %v455_v32 }
  0x62   :  { %v315_v34 = vld [vmem:[%s3868_s1 + $0x8c0] sm:$0xff]  ;;  %717 = vmatpush.msrb.mxu3 %v507_v33 }
  0x63   :  { %v379_v35 = vld [vmem:[%s3868_s1 + $0xac0] sm:$0xff]  ;;  %657 = vmatpush.msrb.mxu0 %v315_v34 }
  0x64   :  { %v451_v36 = vld [vmem:[%s3868_s1 + $0xd00] sm:$0xff]  ;;  %677 = vmatpush.msrb.mxu1 %v379_v35 }
  0x65   :  { %v503_v37 = vld [vmem:[%s3868_s1 + $0xea0] sm:$0xff]  ;;  %695 = vmatpush.msrb.mxu2 %v451_v36 }
  0x66   :  { %v311_v38 = vld [vmem:[%s3868_s1 + $0x8a0] sm:$0xff]  ;;  %718 = vmatpush.msrb.mxu3 %v503_v37 }
  0x67   :  { %v375_v39 = vld [vmem:[%s3868_s1 + $0xaa0] sm:$0xff]  ;;  %658 = vmatpush.msrb.mxu0 %v311_v38 }
  0x68   :  { %v447_v40 = vld [vmem:[%s3868_s1 + $0xce0] sm:$0xff]  ;;  %678 = vmatpush.msrb.mxu1 %v375_v39 }
  0x69   :  { %v499_v41 = vld [vmem:[%s3868_s1 + $0xe80] sm:$0xff]  ;;  %696 = vmatpush.msrb.mxu2 %v447_v40 }
  0x6a   :  { %v307_v42 = vld [vmem:[%s3868_s1 + $0x880] sm:$0xff]  ;;  %719 = vmatpush.msrb.mxu3 %v499_v41 }
  0x6b   :  { %v371_v43 = vld [vmem:[%s3868_s1 + $0xa80] sm:$0xff]  ;;  %659 = vmatpush.msrb.mxu0 %v307_v42 }
  0x6c   :  { %v443_v44 = vld [vmem:[%s3868_s1 + $0xcc0] sm:$0xff]  ;;  %679 = vmatpush.msrb.mxu1 %v371_v43 }
  0x6d   :  { %v495_v45 = vld [vmem:[%s3868_s1 + $0xe60] sm:$0xff]  ;;  %697 = vmatpush.msrb.mxu2 %v443_v44 }
  0x6e   :  { %v303_v46 = vld [vmem:[%s3868_s1 + $0x860] sm:$0xff]  ;;  %720 = vmatpush.msrb.mxu3 %v495_v45 }
  0x6f   :  { %v367_v47 = vld [vmem:[%s3868_s1 + $0xa60] sm:$0xff]  ;;  %660 = vmatpush.msrb.mxu0 %v303_v46 }
  0x70   :  { %v439_v48 = vld [vmem:[%s3868_s1 + $0xca0] sm:$0xff]  ;;  %680 = vmatpush.msrb.mxu1 %v367_v47 }
  0x71   :  { %v491_v49 = vld [vmem:[%s3868_s1 + $0xe40] sm:$0xff]  ;;  %698 = vmatpush.msrb.mxu2 %v439_v48 }
  0x72   :  { %v299_v50 = vld [vmem:[%s3868_s1 + $0x840] sm:$0xff]  ;;  %721 = vmatpush.msrb.mxu3 %v491_v49 }
  0x73   :  { %v363_v51 = vld [vmem:[%s3868_s1 + $0xa40] sm:$0xff]  ;;  %661 = vmatpush.msrb.mxu0 %v299_v50 }
  0x74   :  { %v435_v52 = vld [vmem:[%s3868_s1 + $0xc80] sm:$0xff]  ;;  %681 = vmatpush.msrb.mxu1 %v363_v51 }
  0x75   :  { %v487_v53 = vld [vmem:[%s3868_s1 + $0xe20] sm:$0xff]  ;;  %699 = vmatpush.msrb.mxu2 %v435_v52 }
  0x76   :  { %v295_v55 = vld [vmem:[%s3868_s1 + $0x820] sm:$0xff]  ;;  %722 = vmatpush.msrb.mxu3 %v487_v53 }
  0x77   :  { %v359_v56 = vld [vmem:[%s3868_s1 + $0xa20] sm:$0xff]  ;;  %662 = vmatpush.msrb.mxu0 %v295_v55 }
  0x78   :  { %v431_v57 = vld [vmem:[%s3868_s1 + $0xc60] sm:$0xff] }
  0x79   :  { %v2129_v58 = vld.sshfl [vmem:[#allocation1] sm:$0xff pattern:$0x73625140] }
  0x7a   :  { %v483_v59 = vld [vmem:[%s3868_s1 + $0xe00] sm:$0xff] }
  0x7b   :  { %v291_v61 = vld [vmem:[%s3868_s1 + $0x800] sm:$0xff] }
  0x7c   :  { %14 = vsyncpa [#allocation3], 0  ;;  %682 = vmatpush.msrb.mxu1 %v359_v56  ;;  %700 = vmatpush.msrb.mxu2 %v431_v57  ;;  %v96_v62 = vld [vmem:[%s3868_s1 + $0x1e8] sm:$0xff]  ;;  %v355_v63 = vld [vmem:[%s3868_s1 + $0xa00] sm:$0xff]  ;;  %vm565_vm0 = vcmask 850944   ;;  %vm1348_vm1 = vcmask 1043456  }
  0x7d   :  { %723 = vmatpush.msrb.mxu3 %v483_v59  ;;  %584 = vmatmul.f32.vlgmr.msra.gmra.mxu0 %v2129_v58  ;;  %v427_v0 = vld [vmem:[%s3868_s1 + $0xc40] sm:$0xff]  ;;  %v2150_v1 = vld.sshfl [vmem:[#allocation1 + $0x8] sm:$0xff pattern:$0x73625140]  ;;  %vm1344_vm2 = vcmask 949248   ;;  %vm1557_vm3 = vcmask 1041408  }
  0x7e   :  { %644 = vmatmul.f32.vlgmr.msra.gmra.mxu3 %v2134_v60  ;;  %663 = vmatpush.msrb.mxu0 %v291_v61  ;;  %v92_v2 = vld [vmem:[%s3868_s1 + $0x1c8] sm:$0xff]  ;;  %v423_v5 = vld [vmem:[%s3868_s1 + $0xc20] sm:$0xff]  ;;  %v2178_v10 = vld.sshfl [vmem:[#allocation1 + $0x30] sm:$0xff pattern:$0x73625140]  ;;  %vm1553_vm4 = vcmask 998400  }
  0x7f   :  { %v160_v3 = vld [vmem:[%s3868_s1 + $0x3e8] sm:$0xff]  ;;  %728 = vmatpush.msra.mxu3 %v96_v62  ;;  %683 = vmatpush.msrb.mxu1 %v355_v63  ;;  %v419_v9 = vld [vmem:[%s3868_s1 + $0xc00] sm:$0xff]  ;;  %v2191_v15 = vld.sshfl [vmem:[#allocation1 + $0x38] sm:$0xff pattern:$0x73625140]  ;;  %vm1619_vm5 = vcmask 818176  }
  0x80   :  { %v224_v4 = vld [vmem:[%s3868_s1 + $0x5e8] sm:$0xff]  ;;  %701 = vmatpush.msrb.mxu2 %v427_v0  ;;  %604 = vmatmul.f32.vlgmr.msra.gmra.mxu1 %v2150_v1  ;;  %v2189_v14 = vld.sshfl [vmem:[#allocation1 + $0x20] sm:$0xff pattern:$0x73625140]  ;;  %s1713_s15 = smov [#allocation2]   ;;  %vm1646_vm6 = vcmask 74752  }
  0x81   :  { %v88_v6 = vld [vmem:[%s3868_s1 + $0x1a8] sm:$0xff]  ;;  %729 = vmatpush.msra.mxu3 %v92_v2  ;;  %748 = vmatpush.msra.mxu0 %v160_v3  ;;  %s1653_s0 = sshll.u32 %s1713_s15, 4  ;;  %s1654_s0 = int_to_ptr.vmem [resolvable:$true] %s1653_s0 }
  0x82   :  { %v156_v7 = vld [vmem:[%s3868_s1 + $0x3c8] sm:$0xff]  ;;  %768 = vmatpush.msra.mxu1 %v224_v4  ;;  %702 = vmatpush.msrb.mxu2 %v423_v5 }
  0x83   :  { %v220_v8 = vld [vmem:[%s3868_s1 + $0x5c8] sm:$0xff]  ;;  %730 = vmatpush.msra.mxu3 %v88_v6  ;;  %749 = vmatpush.msra.mxu0 %v156_v7 }
  0x84   :  { %v84_v11 = vld [vmem:[%s3868_s1 + $0x188] sm:$0xff]  ;;  %769 = vmatpush.msra.mxu1 %v220_v8  ;;  %703 = vmatpush.msrb.mxu2 %v419_v9 }
  0x85   :  { %v152_v12 = vld [vmem:[%s3868_s1 + $0x3a8] sm:$0xff]  ;;  %704 = vmatmul.f32.vlgmr.msrb.gmra.mxu2 %v2178_v10  ;;  %731 = vmatpush.msra.mxu3 %v84_v11 }
  0x86   :  { %v216_v13 = vld [vmem:[%s3868_s1 + $0x5a8] sm:$0xff]  ;;  %750 = vmatpush.msra.mxu0 %v152_v12  ;;  %1664 = vmatmul.msk.f32.vlgmr.msrb.gmra.mxu3 %vm565_vm0, %v2191_v15 }
  0x87   :  { %v80_v16 = vld [vmem:[%s3868_s1 + $0x168] sm:$0xff]  ;;  %770 = vmatpush.msra.mxu1 %v216_v13  ;;  %664 = vmatmul.f32.vlgmr.msrb.gmra.mxu0 %v2189_v14 }
  0x88   :  { %v148_v17 = vld [vmem:[%s3868_s1 + $0x388] sm:$0xff]  ;;  %732 = vmatpush.msra.mxu3 %v80_v16 }
  0x89   :  { %v212_v18 = vld [vmem:[%s3868_s1 + $0x588] sm:$0xff]  ;;  %751 = vmatpush.msra.mxu0 %v148_v17 }
  0x8a   :  { %v288_v19 = vld [vmem:[%s3868_s1 + $0x7e8] sm:$0xff]  ;;  %771 = vmatpush.msra.mxu1 %v212_v18 }
  0x8b   :  { %v2209_v20 = vld.sshfl [vmem:[#allocation1 + $0x28] sm:$0xff pattern:$0x73625140]  ;;  %788 = vmatpush.msra.mxu2 %v288_v19 }
  0x8c   :  { %v76_v21 = vld [vmem:[%s3868_s1 + $0x148] sm:$0xff]  ;;  %684 = vmatmul.f32.vlgmr.msrb.gmra.mxu1 %v2209_v20 }
  0x8d   :  { %v144_v22 = vld [vmem:[%s3868_s1 + $0x368] sm:$0xff]  ;;  %733 = vmatpush.msra.mxu3 %v76_v21 }
  0x8e   :  { %v208_v23 = vld [vmem:[%s3868_s1 + $0x568] sm:$0xff]  ;;  %752 = vmatpush.msra.mxu0 %v144_v22 }
  0x8f   :  { %v72_v24 = vld [vmem:[%s3868_s1 + $0x128] sm:$0xff]  ;;  %772 = vmatpush.msra.mxu1 %v208_v23 }
  0x90   :  { %v284_v25 = vld [vmem:[%s3868_s1 + $0x7c8] sm:$0xff]  ;;  %734 = vmatpush.msra.mxu3 %v72_v24 }
  0x91   :  { %v140_v26 = vld [vmem:[%s3868_s1 + $0x348] sm:$0xff]  ;;  %789 = vmatpush.msra.mxu2 %v284_v25 }
  0x92   :  { %v204_v27 = vld [vmem:[%s3868_s1 + $0x548] sm:$0xff]  ;;  %753 = vmatpush.msra.mxu0 %v140_v26 }
  0x93   :  { %v68_v28 = vld [vmem:[%s3868_s1 + $0x108] sm:$0xff]  ;;  %773 = vmatpush.msra.mxu1 %v204_v27 }
  0x94   :  { %v280_v29 = vld [vmem:[%s3868_s1 + $0x7a8] sm:$0xff]  ;;  %735 = vmatpush.msra.mxu3 %v68_v28 }
  0x95   :  { %v136_v30 = vld [vmem:[%s3868_s1 + $0x328] sm:$0xff]  ;;  %790 = vmatpush.msra.mxu2 %v280_v29 }
  0x96   :  { %v200_v31 = vld [vmem:[%s3868_s1 + $0x528] sm:$0xff]  ;;  %754 = vmatpush.msra.mxu0 %v136_v30 }
  0x97   :  { %v64_v32 = vld [vmem:[%s3868_s1 + $0xe8] sm:$0xff]  ;;  %774 = vmatpush.msra.mxu1 %v200_v31 }
  0x98   :  { %v276_v33 = vld [vmem:[%s3868_s1 + $0x788] sm:$0xff]  ;;  %736 = vmatpush.msra.mxu3 %v64_v32 }
  0x99   :  { %v132_v34 = vld [vmem:[%s3868_s1 + $0x308] sm:$0xff]  ;;  %791 = vmatpush.msra.mxu2 %v276_v33 }
  0x9a   :  { %v196_v35 = vld [vmem:[%s3868_s1 + $0x508] sm:$0xff]  ;;  %755 = vmatpush.msra.mxu0 %v132_v34 }
  0x9b   :  { %v60_v36 = vld [vmem:[%s3868_s1 + $0xc8] sm:$0xff]  ;;  %775 = vmatpush.msra.mxu1 %v196_v35 }
  0x9c   :  { %v272_v37 = vld [vmem:[%s3868_s1 + $0x768] sm:$0xff]  ;;  %737 = vmatpush.msra.mxu3 %v60_v36 }
  0x9d   :  { %v128_v38 = vld [vmem:[%s3868_s1 + $0x2e8] sm:$0xff]  ;;  %792 = vmatpush.msra.mxu2 %v272_v37 }
  0x9e   :  { %v192_v39 = vld [vmem:[%s3868_s1 + $0x4e8] sm:$0xff]  ;;  %756 = vmatpush.msra.mxu0 %v128_v38 }
  0x9f   :  { %v56_v40 = vld [vmem:[%s3868_s1 + $0xa8] sm:$0xff]  ;;  %776 = vmatpush.msra.mxu1 %v192_v39 }
  0xa0   :  { %v268_v41 = vld [vmem:[%s3868_s1 + $0x748] sm:$0xff]  ;;  %738 = vmatpush.msra.mxu3 %v56_v40  ;;  %v97_v40 = vld [vmem:[%s3868_s1 + $0x1f0] sm:$0xff] }
  0xa1   :  { %v124_v42 = vld [vmem:[%s3868_s1 + $0x2c8] sm:$0xff]  ;;  %793 = vmatpush.msra.mxu2 %v268_v41 }
  0xa2   :  { %v188_v43 = vld [vmem:[%s3868_s1 + $0x4c8] sm:$0xff]  ;;  %757 = vmatpush.msra.mxu0 %v124_v42 }
  0xa3   :  { %v52_v44 = vld [vmem:[%s3868_s1 + $0x88] sm:$0xff]  ;;  %777 = vmatpush.msra.mxu1 %v188_v43  ;;  %v93_v43 = vld [vmem:[%s3868_s1 + $0x1d0] sm:$0xff] }
  0xa4   :  { %v264_v45 = vld [vmem:[%s3868_s1 + $0x728] sm:$0xff]  ;;  %739 = vmatpush.msra.mxu3 %v52_v44 }
  0xa5   :  { %v120_v46 = vld [vmem:[%s3868_s1 + $0x2a8] sm:$0xff]  ;;  %794 = vmatpush.msra.mxu2 %v264_v45 }
  0xa6   :  { %v184_v47 = vld [vmem:[%s3868_s1 + $0x4a8] sm:$0xff]  ;;  %758 = vmatpush.msra.mxu0 %v120_v46 }
  0xa7   :  { %v48_v48 = vld [vmem:[%s3868_s1 + $0x68] sm:$0xff]  ;;  %778 = vmatpush.msra.mxu1 %v184_v47  ;;  %v89_v47 = vld [vmem:[%s3868_s1 + $0x1b0] sm:$0xff] }
  0xa8   :  { %v260_v49 = vld [vmem:[%s3868_s1 + $0x708] sm:$0xff]  ;;  %740 = vmatpush.msra.mxu3 %v48_v48 }
  0xa9   :  { %v116_v50 = vld [vmem:[%s3868_s1 + $0x288] sm:$0xff]  ;;  %795 = vmatpush.msra.mxu2 %v260_v49 }
  0xaa   :  { %v180_v51 = vld [vmem:[%s3868_s1 + $0x488] sm:$0xff]  ;;  %759 = vmatpush.msra.mxu0 %v116_v50 }
  0xab   :  { %v44_v52 = vld [vmem:[%s3868_s1 + $0x48] sm:$0xff]  ;;  %779 = vmatpush.msra.mxu1 %v180_v51  ;;  %v85_v51 = vld [vmem:[%s3868_s1 + $0x190] sm:$0xff] }
  0xac   :  { %v256_v53 = vld [vmem:[%s3868_s1 + $0x6e8] sm:$0xff]  ;;  %741 = vmatpush.msra.mxu3 %v44_v52 }
  0xad   :  { %v112_v55 = vld [vmem:[%s3868_s1 + $0x268] sm:$0xff]  ;;  %796 = vmatpush.msra.mxu2 %v256_v53 }
  0xae   :  { %v176_v56 = vld [vmem:[%s3868_s1 + $0x468] sm:$0xff]  ;;  %760 = vmatpush.msra.mxu0 %v112_v55 }
  0xaf   :  { %v40_v57 = vld [vmem:[%s3868_s1 + $0x28] sm:$0xff]  ;;  %780 = vmatpush.msra.mxu1 %v176_v56  ;;  %v81_v56 = vld [vmem:[%s3868_s1 + $0x170] sm:$0xff] }
  0xb0   :  { %v252_v59 = vld [vmem:[%s3868_s1 + $0x6c8] sm:$0xff]  ;;  %742 = vmatpush.msra.mxu3 %v40_v57 }
  0xb1   :  { %v108_v61 = vld [vmem:[%s3868_s1 + $0x248] sm:$0xff]  ;;  %797 = vmatpush.msra.mxu2 %v252_v59 }
  0xb2   :  { %v172_v62 = vld [vmem:[%s3868_s1 + $0x448] sm:$0xff]  ;;  %761 = vmatpush.msra.mxu0 %v108_v61 }
  0xb3   :  { %v36_v63 = vld [vmem:[%s3868_s1 + $0x8] sm:$0xff]  ;;  %781 = vmatpush.msra.mxu1 %v172_v62  ;;  %v77_v62 = vld [vmem:[%s3868_s1 + $0x150] sm:$0xff] }
  0xb4   :  { %v248_v0 = vld [vmem:[%s3868_s1 + $0x6a8] sm:$0xff]  ;;  %743 = vmatpush.msra.mxu3 %v36_v63 }
  0xb5   :  { %v104_v2 = vld [vmem:[%s3868_s1 + $0x228] sm:$0xff]  ;;  %798 = vmatpush.msra.mxu2 %v248_v0  ;;  %744 = vmatmul.f32.vlgmr.msra.gmra.mxu3 %v2129_v58 }
  0xb6   :  { %v168_v3 = vld [vmem:[%s3868_s1 + $0x428] sm:$0xff]  ;;  %762 = vmatpush.msra.mxu0 %v104_v2 }
  0xb7   :  { %v352_v4 = vld [vmem:[%s3868_s1 + $0x9e8] sm:$0xff]  ;;  %782 = vmatpush.msra.mxu1 %v168_v3  ;;  %v73_v3 = vld [vmem:[%s3868_s1 + $0x130] sm:$0xff] }
  0xb8   :  { %v244_v5 = vld [vmem:[%s3868_s1 + $0x688] sm:$0xff]  ;;  %808 = vmatpush.msrb.mxu3 %v352_v4 }
  0xb9   :  { %v100_v6 = vld [vmem:[%s3868_s1 + $0x208] sm:$0xff]  ;;  %799 = vmatpush.msra.mxu2 %v244_v5 }
  0xba   :  { %v164_v7 = vld [vmem:[%s3868_s1 + $0x408] sm:$0xff]  ;;  %763 = vmatpush.msra.mxu0 %v100_v6 }
  0xbb   :  { %v348_v8 = vld [vmem:[%s3868_s1 + $0x9c8] sm:$0xff]  ;;  %783 = vmatpush.msra.mxu1 %v164_v7  ;;  %764 = vmatmul.f32.vlgmr.msra.gmra.mxu0 %v2150_v1 }
  0xbc   :  { %v416_v9 = vld [vmem:[%s3868_s1 + $0xbe8] sm:$0xff]  ;;  %809 = vmatpush.msrb.mxu3 %v348_v8  ;;  %784 = vmatmul.f32.vlgmr.msra.gmra.mxu1 %v2118_v54 }
  0xbd   :  { %v480_v11 = vld [vmem:[%s3868_s1 + $0xde8] sm:$0xff]  ;;  %828 = vmatpush.msrb.mxu0 %v416_v9  ;;  %v225_v9 = vld [vmem:[%s3868_s1 + $0x5f0] sm:$0xff] }
  0xbe   :  { %v240_v12 = vld [vmem:[%s3868_s1 + $0x668] sm:$0xff]  ;;  %848 = vmatpush.msrb.mxu1 %v480_v11 }
  0xbf   :  { %v344_v13 = vld [vmem:[%s3868_s1 + $0x9a8] sm:$0xff]  ;;  %800 = vmatpush.msra.mxu2 %v240_v12  ;;  %v221_v12 = vld [vmem:[%s3868_s1 + $0x5d0] sm:$0xff] }
  0xc0   :  { %v412_v16 = vld [vmem:[%s3868_s1 + $0xbc8] sm:$0xff]  ;;  %810 = vmatpush.msrb.mxu3 %v344_v13  ;;  %v161_v13 = vld [vmem:[%s3868_s1 + $0x3f0] sm:$0xff] }
  0xc1   :  { %v476_v17 = vld [vmem:[%s3868_s1 + $0xdc8] sm:$0xff]  ;;  %829 = vmatpush.msrb.mxu0 %v412_v16 }
  0xc2   :  { %v340_v18 = vld [vmem:[%s3868_s1 + $0x988] sm:$0xff]  ;;  %849 = vmatpush.msrb.mxu1 %v476_v17  ;;  %v69_v17 = vld [vmem:[%s3868_s1 + $0x110] sm:$0xff] }
  0xc3   :  { %v408_v19 = vld [vmem:[%s3868_s1 + $0xba8] sm:$0xff]  ;;  %811 = vmatpush.msrb.mxu3 %v340_v18  ;;  %v217_v18 = vld [vmem:[%s3868_s1 + $0x5b0] sm:$0xff] }
  0xc4   :  { %v472_v21 = vld [vmem:[%s3868_s1 + $0xda8] sm:$0xff]  ;;  %830 = vmatpush.msrb.mxu0 %v408_v19  ;;  %v157_v19 = vld [vmem:[%s3868_s1 + $0x3d0] sm:$0xff] }
  0xc5   :  { %v236_v22 = vld [vmem:[%s3868_s1 + $0x648] sm:$0xff]  ;;  %850 = vmatpush.msrb.mxu1 %v472_v21 }
  0xc6   :  { %v336_v23 = vld [vmem:[%s3868_s1 + $0x968] sm:$0xff]  ;;  %801 = vmatpush.msra.mxu2 %v236_v22  ;;  %v65_v22 = vld [vmem:[%s3868_s1 + $0xf0] sm:$0xff] }
  0xc7   :  { %v404_v24 = vld [vmem:[%s3868_s1 + $0xb88] sm:$0xff]  ;;  %812 = vmatpush.msrb.mxu3 %v336_v23  ;;  %v213_v23 = vld [vmem:[%s3868_s1 + $0x590] sm:$0xff] }
  0xc8   :  { %v468_v25 = vld [vmem:[%s3868_s1 + $0xd88] sm:$0xff]  ;;  %831 = vmatpush.msrb.mxu0 %v404_v24  ;;  %v153_v24 = vld [vmem:[%s3868_s1 + $0x3b0] sm:$0xff] }
  0xc9   :  { %v232_v26 = vld [vmem:[%s3868_s1 + $0x628] sm:$0xff]  ;;  %851 = vmatpush.msrb.mxu1 %v468_v25 }
  0xca   :  { %v332_v27 = vld [vmem:[%s3868_s1 + $0x948] sm:$0xff]  ;;  %802 = vmatpush.msra.mxu2 %v232_v26  ;;  %v61_v26 = vld [vmem:[%s3868_s1 + $0xd0] sm:$0xff] }
  0xcb   :  { %v400_v28 = vld [vmem:[%s3868_s1 + $0xb68] sm:$0xff]  ;;  %813 = vmatpush.msrb.mxu3 %v332_v27  ;;  %v209_v27 = vld [vmem:[%s3868_s1 + $0x570] sm:$0xff] }
  0xcc   :  { %v464_v29 = vld [vmem:[%s3868_s1 + $0xd68] sm:$0xff]  ;;  %832 = vmatpush.msrb.mxu0 %v400_v28 }
  0xcd   :  { %v228_v30 = vld [vmem:[%s3868_s1 + $0x608] sm:$0xff]  ;;  %852 = vmatpush.msrb.mxu1 %v464_v29  ;;  %v149_v29 = vld [vmem:[%s3868_s1 + $0x390] sm:$0xff] }
  0xce   :  { %v328_v31 = vld [vmem:[%s3868_s1 + $0x928] sm:$0xff]  ;;  %803 = vmatpush.msra.mxu2 %v228_v30  ;;  %v205_v30 = vld [vmem:[%s3868_s1 + $0x550] sm:$0xff] }
  0xcf   :  { %v396_v32 = vld [vmem:[%s3868_s1 + $0xb48] sm:$0xff]  ;;  %814 = vmatpush.msrb.mxu3 %v328_v31  ;;  %804 = vmatmul.f32.vlgmr.msra.gmra.mxu2 %v2134_v60  ;;  %v57_v31 = vld [vmem:[%s3868_s1 + $0xb0] sm:$0xff] }
  0xd0   :  { %v460_v33 = vld [vmem:[%s3868_s1 + $0xd48] sm:$0xff]  ;;  %833 = vmatpush.msrb.mxu0 %v396_v32  ;;  %888 = vmatpush.msrb.mxu2 %v97_v40  ;;  %v137_v40 = vld [vmem:[%s3868_s1 + $0x330] sm:$0xff] }
  0xd1   :  { %v324_v34 = vld [vmem:[%s3868_s1 + $0x908] sm:$0xff]  ;;  %853 = vmatpush.msrb.mxu1 %v460_v33  ;;  %v145_v33 = vld [vmem:[%s3868_s1 + $0x370] sm:$0xff] }
  0xd2   :  { %v392_v35 = vld [vmem:[%s3868_s1 + $0xb28] sm:$0xff]  ;;  %815 = vmatpush.msrb.mxu3 %v324_v34  ;;  %889 = vmatpush.msrb.mxu2 %v93_v43  ;;  %v201_v34 = vld [vmem:[%s3868_s1 + $0x530] sm:$0xff] }
  0xd3   :  { %v456_v36 = vld [vmem:[%s3868_s1 + $0xd28] sm:$0xff]  ;;  %834 = vmatpush.msrb.mxu0 %v392_v35  ;;  %v53_v35 = vld [vmem:[%s3868_s1 + $0x90] sm:$0xff] }
  0xd4   :  { %v320_v37 = vld [vmem:[%s3868_s1 + $0x8e8] sm:$0xff]  ;;  %854 = vmatpush.msrb.mxu1 %v456_v36  ;;  %890 = vmatpush.msrb.mxu2 %v89_v47  ;;  %v141_v36 = vld [vmem:[%s3868_s1 + $0x350] sm:$0xff] }
  0xd5   :  { %v388_v38 = vld [vmem:[%s3868_s1 + $0xb08] sm:$0xff]  ;;  %816 = vmatpush.msrb.mxu3 %v320_v37  ;;  %v197_v37 = vld [vmem:[%s3868_s1 + $0x510] sm:$0xff] }
  0xd6   :  { %v452_v39 = vld [vmem:[%s3868_s1 + $0xd08] sm:$0xff]  ;;  %835 = vmatpush.msrb.mxu0 %v388_v38  ;;  %891 = vmatpush.msrb.mxu2 %v85_v51  ;;  %v49_v38 = vld [vmem:[%s3868_s1 + $0x70] sm:$0xff] }
  0xd7   :  { %v316_v41 = vld [vmem:[%s3868_s1 + $0x8c8] sm:$0xff]  ;;  %855 = vmatpush.msrb.mxu1 %v452_v39  ;;  %v133_v43 = vld [vmem:[%s3868_s1 + $0x310] sm:$0xff] }
  0xd8   :  { %v384_v42 = vld [vmem:[%s3868_s1 + $0xae8] sm:$0xff]  ;;  %817 = vmatpush.msrb.mxu3 %v316_v41  ;;  %892 = vmatpush.msrb.mxu2 %v81_v56  ;;  %v193_v41 = vld [vmem:[%s3868_s1 + $0x4f0] sm:$0xff] }
  0xd9   :  { %v448_v60 = vld [vmem:[%s3868_s1 + $0xce8] sm:$0xff]  ;;  %836 = vmatpush.msrb.mxu0 %v384_v42  ;;  %v45_v42 = vld [vmem:[%s3868_s1 + $0x50] sm:$0xff] }
  0xda   :  { %v312_v44 = vld [vmem:[%s3868_s1 + $0x8a8] sm:$0xff]  ;;  %856 = vmatpush.msrb.mxu1 %v448_v60  ;;  %893 = vmatpush.msrb.mxu2 %v77_v62  ;;  %v129_v47 = vld [vmem:[%s3868_s1 + $0x2f0] sm:$0xff] }
  0xdb   :  { %v380_v45 = vld [vmem:[%s3868_s1 + $0xac8] sm:$0xff]  ;;  %818 = vmatpush.msrb.mxu3 %v312_v44  ;;  %v189_v44 = vld [vmem:[%s3868_s1 + $0x4d0] sm:$0xff] }
  0xdc   :  { %v444_v46 = vld [vmem:[%s3868_s1 + $0xcc8] sm:$0xff]  ;;  %837 = vmatpush.msrb.mxu0 %v380_v45  ;;  %894 = vmatpush.msrb.mxu2 %v73_v3  ;;  %v41_v45 = vld [vmem:[%s3868_s1 + $0x30] sm:$0xff] }
  0xdd   :  { %v308_v48 = vld [vmem:[%s3868_s1 + $0x888] sm:$0xff]  ;;  %857 = vmatpush.msrb.mxu1 %v444_v46  ;;  %v125_v51 = vld [vmem:[%s3868_s1 + $0x2d0] sm:$0xff] }
  0xde   :  { %v376_v49 = vld [vmem:[%s3868_s1 + $0xaa8] sm:$0xff]  ;;  %819 = vmatpush.msrb.mxu3 %v308_v48  ;;  %895 = vmatpush.msrb.mxu2 %v69_v17  ;;  %v185_v48 = vld [vmem:[%s3868_s1 + $0x4b0] sm:$0xff] }
  0xdf   :  { %v440_v50 = vld [vmem:[%s3868_s1 + $0xca8] sm:$0xff]  ;;  %838 = vmatpush.msrb.mxu0 %v376_v49  ;;  %v37_v49 = vld [vmem:[%s3868_s1 + $0x10] sm:$0xff] }
  0xe0   :  { %v304_v52 = vld [vmem:[%s3868_s1 + $0x868] sm:$0xff]  ;;  %858 = vmatpush.msrb.mxu1 %v440_v50  ;;  %896 = vmatpush.msrb.mxu2 %v65_v22  ;;  %v121_v56 = vld [vmem:[%s3868_s1 + $0x2b0] sm:$0xff] }
  0xe1   :  { %v372_v53 = vld [vmem:[%s3868_s1 + $0xa88] sm:$0xff]  ;;  %820 = vmatpush.msrb.mxu3 %v304_v52  ;;  %v181_v52 = vld [vmem:[%s3868_s1 + $0x490] sm:$0xff] }
  0xe2   :  { %v436_v55 = vld [vmem:[%s3868_s1 + $0xc88] sm:$0xff]  ;;  %839 = vmatpush.msrb.mxu0 %v372_v53  ;;  %897 = vmatpush.msrb.mxu2 %v61_v26  ;;  %v353_v53 = vld [vmem:[%s3868_s1 + $0x9f0] sm:$0xff] }
  0xe3   :  { %v300_v57 = vld [vmem:[%s3868_s1 + $0x848] sm:$0xff]  ;;  %859 = vmatpush.msrb.mxu1 %v436_v55  ;;  %v117_v62 = vld [vmem:[%s3868_s1 + $0x290] sm:$0xff] }
  0xe4   :  { %v368_v59 = vld [vmem:[%s3868_s1 + $0xa68] sm:$0xff]  ;;  %821 = vmatpush.msrb.mxu3 %v300_v57  ;;  %898 = vmatpush.msrb.mxu2 %v57_v31  ;;  %v177_v57 = vld [vmem:[%s3868_s1 + $0x470] sm:$0xff] }
  0xe5   :  { %v432_v61 = vld [vmem:[%s3868_s1 + $0xc68] sm:$0xff]  ;;  %840 = vmatpush.msrb.mxu0 %v368_v59  ;;  %v349_v59 = vld [vmem:[%s3868_s1 + $0x9d0] sm:$0xff] }
  0xe6   :  { %v296_v63 = vld [vmem:[%s3868_s1 + $0x828] sm:$0xff]  ;;  %860 = vmatpush.msrb.mxu1 %v432_v61  ;;  %899 = vmatpush.msrb.mxu2 %v53_v35  ;;  %v169_v3 = vld [vmem:[%s3868_s1 + $0x430] sm:$0xff] }
  0xe7   :  { %v364_v0 = vld [vmem:[%s3868_s1 + $0xa48] sm:$0xff]  ;;  %822 = vmatpush.msrb.mxu3 %v296_v63  ;;  %v173_v63 = vld [vmem:[%s3868_s1 + $0x450] sm:$0xff] }
  0xe8   :  { %v428_v2 = vld [vmem:[%s3868_s1 + $0xc48] sm:$0xff]  ;;  %841 = vmatpush.msrb.mxu0 %v364_v0  ;;  %900 = vmatpush.msrb.mxu2 %v49_v38  ;;  %v289_v0 = vld [vmem:[%s3868_s1 + $0x7f0] sm:$0xff] }
  0xe9   :  { %v292_v4 = vld [vmem:[%s3868_s1 + $0x808] sm:$0xff]  ;;  %861 = vmatpush.msrb.mxu1 %v428_v2  ;;  %v113_v2 = vld [vmem:[%s3868_s1 + $0x270] sm:$0xff] }
  0xea   :  { %v360_v5 = vld [vmem:[%s3868_s1 + $0xa28] sm:$0xff]  ;;  %823 = vmatpush.msrb.mxu3 %v292_v4  ;;  %901 = vmatpush.msrb.mxu2 %v45_v42  ;;  %v345_v4 = vld [vmem:[%s3868_s1 + $0x9b0] sm:$0xff] }
  0xeb   :  { %v424_v6 = vld [vmem:[%s3868_s1 + $0xc28] sm:$0xff]  ;;  %842 = vmatpush.msrb.mxu0 %v360_v5  ;;  %824 = vmatmul.f32.vlgmr.msrb.gmra.mxu3 %v2189_v14  ;;  %v285_v5 = vld [vmem:[%s3868_s1 + $0x7d0] sm:$0xff] }
  0xec   :  { %v356_v7 = vld [vmem:[%s3868_s1 + $0xa08] sm:$0xff]  ;;  %862 = vmatpush.msrb.mxu1 %v424_v6  ;;  %908 = vmatpush.msra.mxu3 %v161_v13  ;;  %v109_v6 = vld [vmem:[%s3868_s1 + $0x250] sm:$0xff] }
  0xed   :  { %v420_v8 = vld [vmem:[%s3868_s1 + $0xc08] sm:$0xff]  ;;  %843 = vmatpush.msrb.mxu0 %v356_v7  ;;  %902 = vmatpush.msrb.mxu2 %v41_v45  ;;  %v165_v7 = vld [vmem:[%s3868_s1 + $0x410] sm:$0xff] }
  0xee   :  { %v532_v11 = vld [vmem:[%s3868_s1 + $0xf88] sm:$0xff]  ;;  %863 = vmatpush.msrb.mxu1 %v420_v8  ;;  %844 = vmatmul.f32.vlgmr.msrb.gmra.mxu0 %v2209_v20  ;;  %v341_v8 = vld [vmem:[%s3868_s1 + $0x990] sm:$0xff] }
  0xef   :  { %928 = vmatpush.msra.mxu0 %v225_v9  ;;  %v528_v16 = vld [vmem:[%s3868_s1 + $0xf68] sm:$0xff]  ;;  %909 = vmatpush.msra.mxu3 %v157_v19  ;;  %v481_v9 = vld [vmem:[%s3868_s1 + $0xdf0] sm:$0xff] }
  0xf0   :  { %871 = vmatpush.msra.mxu1 %v532_v11  ;;  %v524_v21 = vld [vmem:[%s3868_s1 + $0xf48] sm:$0xff]  ;;  %903 = vmatpush.msrb.mxu2 %v37_v49  ;;  %v105_v11 = vld [vmem:[%s3868_s1 + $0x230] sm:$0xff] }
  0xf1   :  { %929 = vmatpush.msra.mxu0 %v221_v12  ;;  %v520_v25 = vld [vmem:[%s3868_s1 + $0xf28] sm:$0xff]  ;;  %910 = vmatpush.msra.mxu3 %v153_v24  ;;  %v337_v12 = vld [vmem:[%s3868_s1 + $0x970] sm:$0xff] }
  0xf2   :  { %872 = vmatpush.msra.mxu1 %v528_v16  ;;  %v516_v28 = vld [vmem:[%s3868_s1 + $0xf08] sm:$0xff]  ;;  %968 = vmatpush.msra.mxu2 %v353_v53  ;;  %v277_v13 = vld [vmem:[%s3868_s1 + $0x790] sm:$0xff] }
  0xf3   :  { %930 = vmatpush.msra.mxu0 %v217_v18  ;;  %864 = vmatmul.f32.vlgmr.msrb.gmra.mxu1 %v2178_v10  ;;  %v512_v32 = vld [vmem:[%s3868_s1 + $0xee8] sm:$0xff]  ;;  %v477_v16 = vld [vmem:[%s3868_s1 + $0xdd0] sm:$0xff] }
  0xf4   :  { %873 = vmatpush.msra.mxu1 %v524_v21  ;;  %911 = vmatpush.msra.mxu3 %v149_v29  ;;  %v508_v10 = vld [vmem:[%s3868_s1 + $0xec8] sm:$0xff]  ;;  %v101_v17 = vld [vmem:[%s3868_s1 + $0x210] sm:$0xff] }
  0xf5   :  { %931 = vmatpush.msra.mxu0 %v213_v23  ;;  %v504_v39 = vld [vmem:[%s3868_s1 + $0xea8] sm:$0xff]  ;;  %969 = vmatpush.msra.mxu2 %v349_v59  ;;  %v333_v18 = vld [vmem:[%s3868_s1 + $0x950] sm:$0xff] }
  0xf6   :  { %874 = vmatpush.msra.mxu1 %v520_v25  ;;  %912 = vmatpush.msra.mxu3 %v145_v33  ;;  %v500_v60 = vld [vmem:[%s3868_s1 + $0xe88] sm:$0xff]  ;;  %v273_v19 = vld [vmem:[%s3868_s1 + $0x770] sm:$0xff] }
  0xf7   :  { %932 = vmatpush.msra.mxu0 %v209_v27  ;;  %v496_v46 = vld [vmem:[%s3868_s1 + $0xe68] sm:$0xff]  ;;  %970 = vmatpush.msra.mxu2 %v345_v4  ;;  %v473_v21 = vld [vmem:[%s3868_s1 + $0xdb0] sm:$0xff] }
  0xf8   :  { %875 = vmatpush.msra.mxu1 %v516_v28  ;;  %913 = vmatpush.msra.mxu3 %v141_v36  ;;  %v492_v50 = vld [vmem:[%s3868_s1 + $0xe48] sm:$0xff]  ;;  %v417_v22 = vld [vmem:[%s3868_s1 + $0xbf0] sm:$0xff] }
  0xf9   :  { %933 = vmatpush.msra.mxu0 %v205_v30  ;;  %v488_v55 = vld [vmem:[%s3868_s1 + $0xe28] sm:$0xff]  ;;  %971 = vmatpush.msra.mxu2 %v341_v8  ;;  %v329_v23 = vld [vmem:[%s3868_s1 + $0x930] sm:$0xff]  ;;  %v290_v8 = vld [vmem:[%s3868_s1 + $0x7f8] sm:$0xff] }
  0xfa   :  { %876 = vmatpush.msra.mxu1 %v512_v32  ;;  %914 = vmatpush.msra.mxu3 %v137_v40  ;;  %v484_v61 = vld [vmem:[%s3868_s1 + $0xe08] sm:$0xff]  ;;  %v269_v24 = vld [vmem:[%s3868_s1 + $0x750] sm:$0xff] }
  0xfb   :  { %934 = vmatpush.msra.mxu0 %v201_v34  ;;  %972 = vmatpush.msra.mxu2 %v337_v12  ;;  %v469_v25 = vld [vmem:[%s3868_s1 + $0xd90] sm:$0xff] }
  0xfc   :  { %877 = vmatpush.msra.mxu1 %v508_v10  ;;  %915 = vmatpush.msra.mxu3 %v133_v43  ;;  %v413_v26 = vld [vmem:[%s3868_s1 + $0xbd0] sm:$0xff] }
  0xfd   :  { %935 = vmatpush.msra.mxu0 %v197_v37  ;;  %973 = vmatpush.msra.mxu2 %v333_v18  ;;  %v325_v27 = vld [vmem:[%s3868_s1 + $0x910] sm:$0xff] }
  0xfe   :  { %878 = vmatpush.msra.mxu1 %v504_v39  ;;  %916 = vmatpush.msra.mxu3 %v129_v47  ;;  %v265_v28 = vld [vmem:[%s3868_s1 + $0x730] sm:$0xff] }
  0xff   :  { %936 = vmatpush.msra.mxu0 %v193_v41  ;;  %v465_v29 = vld [vmem:[%s3868_s1 + $0xd70] sm:$0xff]  ;;  %974 = vmatpush.msra.mxu2 %v329_v23  ;;  %v158_v23 = vld [vmem:[%s3868_s1 + $0x3d8] sm:$0xff] }
 0x100   :  { %879 = vmatpush.msra.mxu1 %v500_v60  ;;  %917 = vmatpush.msra.mxu3 %v125_v51  ;;  %v409_v30 = vld [vmem:[%s3868_s1 + $0xbb0] sm:$0xff] }
 0x101   :  { %937 = vmatpush.msra.mxu0 %v189_v44  ;;  %v321_v31 = vld [vmem:[%s3868_s1 + $0x8f0] sm:$0xff]  ;;  %975 = vmatpush.msra.mxu2 %v325_v27 }
 0x102   :  { %880 = vmatpush.msra.mxu1 %v496_v46  ;;  %918 = vmatpush.msra.mxu3 %v121_v56  ;;  %v261_v32 = vld [vmem:[%s3868_s1 + $0x710] sm:$0xff] }
 0x103   :  { %938 = vmatpush.msra.mxu0 %v185_v48  ;;  %v461_v33 = vld [vmem:[%s3868_s1 + $0xd50] sm:$0xff]  ;;  %976 = vmatpush.msra.mxu2 %v321_v31  ;;  %v150_v31 = vld [vmem:[%s3868_s1 + $0x398] sm:$0xff] }
 0x104   :  { %881 = vmatpush.msra.mxu1 %v492_v50  ;;  %919 = vmatpush.msra.mxu3 %v117_v62  ;;  %v405_v34 = vld [vmem:[%s3868_s1 + $0xb90] sm:$0xff] }
 0x105   :  { %939 = vmatpush.msra.mxu0 %v181_v52  ;;  %v317_v35 = vld [vmem:[%s3868_s1 + $0x8d0] sm:$0xff]  ;;  %904 = vmatmul.f32.vlgmr.msrb.gmra.mxu2 %v2129_v58 }
 0x106   :  { %882 = vmatpush.msra.mxu1 %v488_v55  ;;  %920 = vmatpush.msra.mxu3 %v113_v2  ;;  %v257_v10 = vld [vmem:[%s3868_s1 + $0x6f0] sm:$0xff] }
 0x107   :  { %940 = vmatpush.msra.mxu0 %v177_v57  ;;  %v457_v36 = vld [vmem:[%s3868_s1 + $0xd30] sm:$0xff]  ;;  %977 = vmatpush.msra.mxu2 %v317_v35  ;;  %v146_v35 = vld [vmem:[%s3868_s1 + $0x378] sm:$0xff] }
 0x108   :  { %883 = vmatpush.msra.mxu1 %v484_v61  ;;  %921 = vmatpush.msra.mxu3 %v109_v6  ;;  %v401_v37 = vld [vmem:[%s3868_s1 + $0xb70] sm:$0xff] }
 0x109   :  { %1665 = vmatmul.msk.f32.vlgmr.msra.gmra.mxu1 %vm565_vm0, %v2191_v15  ;;  %941 = vmatpush.msra.mxu0 %v173_v63  ;;  %v281_v15 = vld [vmem:[%s3868_s1 + $0x7b0] sm:$0xff] }
 0x10a   :  { %948 = vmatpush.msrb.mxu1 %v289_v0  ;;  %922 = vmatpush.msra.mxu3 %v105_v11  ;;  %v313_v38 = vld [vmem:[%s3868_s1 + $0x8b0] sm:$0xff]  ;;  %v286_v11 = vld [vmem:[%s3868_s1 + $0x7d8] sm:$0xff] }
 0x10b   :  { %942 = vmatpush.msra.mxu0 %v169_v3  ;;  %v253_v39 = vld [vmem:[%s3868_s1 + $0x6d0] sm:$0xff]  ;;  %978 = vmatpush.msra.mxu2 %v313_v38  ;;  %v142_v38 = vld [vmem:[%s3868_s1 + $0x358] sm:$0xff] }
 0x10c   :  { %949 = vmatpush.msrb.mxu1 %v285_v5  ;;  %923 = vmatpush.msra.mxu3 %v101_v17  ;;  %v453_v40 = vld [vmem:[%s3868_s1 + $0xd10] sm:$0xff]  ;;  %v162_v17 = vld [vmem:[%s3868_s1 + $0x3f8] sm:$0xff] }
 0x10d   :  { %943 = vmatpush.msra.mxu0 %v165_v7  ;;  %v397_v41 = vld [vmem:[%s3868_s1 + $0xb50] sm:$0xff]  ;;  %924 = vmatmul.f32.vlgmr.msra.gmra.mxu3 %v2150_v1 }
 0x10e   :  { %950 = vmatpush.msrb.mxu1 %v281_v15  ;;  %988 = vmatpush.msrb.mxu3 %v417_v22  ;;  %v309_v42 = vld [vmem:[%s3868_s1 + $0x890] sm:$0xff]  ;;  %v274_v22 = vld [vmem:[%s3868_s1 + $0x778] sm:$0xff] }
 0x10f   :  { %1008 = vmatpush.msrb.mxu0 %v481_v9  ;;  %v249_v60 = vld [vmem:[%s3868_s1 + $0x6b0] sm:$0xff]  ;;  %979 = vmatpush.msra.mxu2 %v309_v42  ;;  %v138_v42 = vld [vmem:[%s3868_s1 + $0x338] sm:$0xff] }
 0x110   :  { %951 = vmatpush.msrb.mxu1 %v277_v13  ;;  %989 = vmatpush.msrb.mxu3 %v413_v26  ;;  %v449_v43 = vld [vmem:[%s3868_s1 + $0xcf0] sm:$0xff]  ;;  %v282_v13 = vld [vmem:[%s3868_s1 + $0x7b8] sm:$0xff] }
 0x111   :  { %1009 = vmatpush.msrb.mxu0 %v477_v16  ;;  %v393_v44 = vld [vmem:[%s3868_s1 + $0xb30] sm:$0xff]  ;;  %v270_v26 = vld [vmem:[%s3868_s1 + $0x758] sm:$0xff] }
 0x112   :  { %952 = vmatpush.msrb.mxu1 %v273_v19  ;;  %990 = vmatpush.msrb.mxu3 %v409_v30  ;;  %v245_v45 = vld [vmem:[%s3868_s1 + $0x690] sm:$0xff]  ;;  %v278_v19 = vld [vmem:[%s3868_s1 + $0x798] sm:$0xff] }
 0x113   :  { %1010 = vmatpush.msrb.mxu0 %v473_v21  ;;  %v445_v46 = vld [vmem:[%s3868_s1 + $0xcd0] sm:$0xff]  ;;  %v266_v30 = vld [vmem:[%s3868_s1 + $0x738] sm:$0xff] }
 0x114   :  { %953 = vmatpush.msrb.mxu1 %v269_v24  ;;  %991 = vmatpush.msrb.mxu3 %v405_v34  ;;  %v389_v47 = vld [vmem:[%s3868_s1 + $0xb10] sm:$0xff]  ;;  %v226_v24 = vld [vmem:[%s3868_s1 + $0x5f8] sm:$0xff] }
 0x115   :  { %1011 = vmatpush.msrb.mxu0 %v469_v25  ;;  %v241_v48 = vld [vmem:[%s3868_s1 + $0x670] sm:$0xff]  ;;  %v262_v34 = vld [vmem:[%s3868_s1 + $0x718] sm:$0xff] }
 0x116   :  { %954 = vmatpush.msrb.mxu1 %v265_v28  ;;  %992 = vmatpush.msrb.mxu3 %v401_v37  ;;  %v441_v49 = vld [vmem:[%s3868_s1 + $0xcb0] sm:$0xff]  ;;  %v154_v28 = vld [vmem:[%s3868_s1 + $0x3b8] sm:$0xff] }
 0x117   :  { %1012 = vmatpush.msrb.mxu0 %v465_v29  ;;  %v385_v50 = vld [vmem:[%s3868_s1 + $0xaf0] sm:$0xff]  ;;  %v222_v29 = vld [vmem:[%s3868_s1 + $0x5d8] sm:$0xff] }
 0x118   :  { %955 = vmatpush.msrb.mxu1 %v261_v32  ;;  %993 = vmatpush.msrb.mxu3 %v397_v41  ;;  %v305_v51 = vld [vmem:[%s3868_s1 + $0x870] sm:$0xff]  ;;  %v218_v32 = vld [vmem:[%s3868_s1 + $0x5b8] sm:$0xff] }
 0x119   :  { %1013 = vmatpush.msrb.mxu0 %v461_v33  ;;  %v237_v52 = vld [vmem:[%s3868_s1 + $0x650] sm:$0xff]  ;;  %980 = vmatpush.msra.mxu2 %v305_v51  ;;  %v258_v37 = vld [vmem:[%s3868_s1 + $0x6f8] sm:$0xff] }
 0x11a   :  { %956 = vmatpush.msrb.mxu1 %v257_v10  ;;  %994 = vmatpush.msrb.mxu3 %v393_v44  ;;  %v437_v53 = vld [vmem:[%s3868_s1 + $0xc90] sm:$0xff]  ;;  %v214_v10 = vld [vmem:[%s3868_s1 + $0x598] sm:$0xff] }
 0x11b   :  { %1014 = vmatpush.msrb.mxu0 %v457_v36  ;;  %v381_v58 = vld [vmem:[%s3868_s1 + $0xad0] sm:$0xff]  ;;  %v254_v41 = vld [vmem:[%s3868_s1 + $0x6d8] sm:$0xff] }
 0x11c   :  { %957 = vmatpush.msrb.mxu1 %v253_v39  ;;  %995 = vmatpush.msrb.mxu3 %v389_v47  ;;  %v301_v55 = vld [vmem:[%s3868_s1 + $0x850] sm:$0xff]  ;;  %v210_v39 = vld [vmem:[%s3868_s1 + $0x578] sm:$0xff] }
 0x11d   :  { %1015 = vmatpush.msrb.mxu0 %v453_v40  ;;  %v233_v56 = vld [vmem:[%s3868_s1 + $0x630] sm:$0xff]  ;;  %981 = vmatpush.msra.mxu2 %v301_v55  ;;  %v250_v44 = vld [vmem:[%s3868_s1 + $0x6b8] sm:$0xff] }
 0x11e   :  { %958 = vmatpush.msrb.mxu1 %v249_v60  ;;  %944 = vmatmul.f32.vlgmr.msra.gmra.mxu0 %v2118_v54  ;;  %v433_v57 = vld [vmem:[%s3868_s1 + $0xc70] sm:$0xff]  ;;  %v206_v60 = vld [vmem:[%s3868_s1 + $0x558] sm:$0xff] }
 0x11f   :  { %1016 = vmatpush.msrb.mxu0 %v449_v43  ;;  %996 = vmatpush.msrb.mxu3 %v385_v50  ;;  %v377_v54 = vld [vmem:[%s3868_s1 + $0xab0] sm:$0xff]  ;;  %v246_v47 = vld [vmem:[%s3868_s1 + $0x698] sm:$0xff] }
 0x120   :  { %959 = vmatpush.msrb.mxu1 %v245_v45  ;;  %v297_v59 = vld [vmem:[%s3868_s1 + $0x830] sm:$0xff]  ;;  %v134_v45 = vld [vmem:[%s3868_s1 + $0x318] sm:$0xff] }
 0x121   :  { %1017 = vmatpush.msrb.mxu0 %v445_v46  ;;  %v229_v61 = vld [vmem:[%s3868_s1 + $0x610] sm:$0xff]  ;;  %997 = vmatpush.msrb.mxu3 %v381_v58  ;;  %v98_v46 = vld [vmem:[%s3868_s1 + $0x1f8] sm:$0xff] }
 0x122   :  { %960 = vmatpush.msrb.mxu1 %v241_v48  ;;  %v429_v62 = vld [vmem:[%s3868_s1 + $0xc50] sm:$0xff]  ;;  %982 = vmatpush.msra.mxu2 %v297_v59  ;;  %v202_v48 = vld [vmem:[%s3868_s1 + $0x538] sm:$0xff] }
 0x123   :  { %1018 = vmatpush.msrb.mxu0 %v441_v49  ;;  %v533_v63 = vld [vmem:[%s3868_s1 + $0xf90] sm:$0xff]  ;;  %998 = vmatpush.msrb.mxu3 %v377_v54  ;;  %v130_v49 = vld [vmem:[%s3868_s1 + $0x2f8] sm:$0xff] }
 0x124   :  { %961 = vmatpush.msrb.mxu1 %v237_v52  ;;  %v373_v0 = vld [vmem:[%s3868_s1 + $0xa90] sm:$0xff]  ;;  %v3027_v50 = vld.sshfl [vmem:[#allocation1 + $0x38] sm:$0xff pattern:$0x73625140] }
 0x125   :  { %1019 = vmatpush.msrb.mxu0 %v437_v53  ;;  %v425_v2 = vld [vmem:[%s3868_s1 + $0xc30] sm:$0xff]  ;;  %999 = vmatpush.msrb.mxu3 %v373_v0  ;;  %v94_v51 = vld [vmem:[%s3868_s1 + $0x1d8] sm:$0xff] }
 0x126   :  { %962 = vmatpush.msrb.mxu1 %v233_v56  ;;  %v529_v3 = vld [vmem:[%s3868_s1 + $0xf70] sm:$0xff]  ;;  %v242_v52 = vld [vmem:[%s3868_s1 + $0x678] sm:$0xff] }
 0x127   :  { %1020 = vmatpush.msrb.mxu0 %v433_v57  ;;  %v369_v4 = vld [vmem:[%s3868_s1 + $0xa70] sm:$0xff]  ;;  %v198_v53 = vld [vmem:[%s3868_s1 + $0x518] sm:$0xff] }
 0x128   :  { %963 = vmatpush.msrb.mxu1 %v229_v61  ;;  %v421_v5 = vld [vmem:[%s3868_s1 + $0xc10] sm:$0xff]  ;;  %1000 = vmatpush.msrb.mxu3 %v369_v4  ;;  %v126_v58 = vld [vmem:[%s3868_s1 + $0x2d8] sm:$0xff] }
 0x129   :  { %1021 = vmatpush.msrb.mxu0 %v429_v62  ;;  %v293_v6 = vld [vmem:[%s3868_s1 + $0x810] sm:$0xff]  ;;  %v90_v55 = vld [vmem:[%s3868_s1 + $0x1b8] sm:$0xff] }
 0x12a   :  { %1031 = vmatpush.msra.mxu1 %v533_v63  ;;  %v525_v7 = vld [vmem:[%s3868_s1 + $0xf50] sm:$0xff]  ;;  %983 = vmatpush.msra.mxu2 %v293_v6  ;;  %v238_v56 = vld [vmem:[%s3868_s1 + $0x658] sm:$0xff] }
 0x12b   :  { %1022 = vmatpush.msrb.mxu0 %v425_v2  ;;  %v365_v15 = vld [vmem:[%s3868_s1 + $0xa50] sm:$0xff]  ;;  %984 = vmatmul.f32.vlgmr.msra.gmra.mxu2 %v2189_v14  ;;  %v2927_v14 = vld.sshfl [vmem:[#allocation1 + $0x18] sm:$0xff pattern:$0x73625140] }
 0x12c   :  { %1032 = vmatpush.msra.mxu1 %v529_v3  ;;  %v521_v9 = vld [vmem:[%s3868_s1 + $0xf30] sm:$0xff]  ;;  %1001 = vmatpush.msrb.mxu3 %v365_v15  ;;  %v194_v57 = vld [vmem:[%s3868_s1 + $0x4f8] sm:$0xff] }
 0x12d   :  { %1023 = vmatpush.msrb.mxu0 %v421_v5  ;;  %v361_v1 = vld [vmem:[%s3868_s1 + $0xa30] sm:$0xff]  ;;  %964 = vmatmul.f32.vlgmr.msrb.gmra.mxu1 %v2927_v14  ;;  %v122_v54 = vld [vmem:[%s3868_s1 + $0x2b8] sm:$0xff] }
 0x12e   :  { %1033 = vmatpush.msra.mxu1 %v525_v7  ;;  %v517_v12 = vld [vmem:[%s3868_s1 + $0xf10] sm:$0xff]  ;;  %1002 = vmatpush.msrb.mxu3 %v361_v1  ;;  %v86_v59 = vld [vmem:[%s3868_s1 + $0x198] sm:$0xff] }
 0x12f   :  { %1108 = vmatpush.msra.mxu0 %v290_v8  ;;  %v357_v16 = vld [vmem:[%s3868_s1 + $0xa10] sm:$0xff]  ;;  %1068 = vmatpush.msrb.mxu2 %v162_v17  ;;  %v234_v61 = vld [vmem:[%s3868_s1 + $0x638] sm:$0xff] }
 0x130   :  { %1034 = vmatpush.msra.mxu1 %v521_v9  ;;  %v513_v18 = vld [vmem:[%s3868_s1 + $0xef0] sm:$0xff]  ;;  %1003 = vmatpush.msrb.mxu3 %v357_v16  ;;  %v190_v62 = vld [vmem:[%s3868_s1 + $0x4d8] sm:$0xff] }
 0x131   :  { %1109 = vmatpush.msra.mxu0 %v286_v11  ;;  %v509_v21 = vld [vmem:[%s3868_s1 + $0xed0] sm:$0xff]  ;;  %1004 = vmatmul.f32.vlgmr.msrb.gmra.mxu3 %v2209_v20  ;;  %v118_v63 = vld [vmem:[%s3868_s1 + $0x298] sm:$0xff] }
 0x132   :  { %1035 = vmatpush.msra.mxu1 %v517_v12  ;;  %v505_v25 = vld [vmem:[%s3868_s1 + $0xeb0] sm:$0xff]  ;;  %1069 = vmatpush.msrb.mxu2 %v158_v23  ;;  %v82_v0 = vld [vmem:[%s3868_s1 + $0x178] sm:$0xff] }
 0x133   :  { %1110 = vmatpush.msra.mxu0 %v282_v13  ;;  %v2949_v27 = vld.sshfl [vmem:[#allocation1 + $0x30] sm:$0xff pattern:$0x73625140]  ;;  %1088 = vmatpush.msra.mxu3 %v226_v24  ;;  %v230_v2 = vld [vmem:[%s3868_s1 + $0x618] sm:$0xff] }
 0x134   :  { %1036 = vmatpush.msra.mxu1 %v513_v18  ;;  %1024 = vmatmul.f32.vlgmr.msrb.gmra.mxu0 %v2949_v27  ;;  %v501_v20 = vld [vmem:[%s3868_s1 + $0xe90] sm:$0xff]  ;;  %v534_v3 = vld [vmem:[%s3868_s1 + $0xf98] sm:$0xff] }
 0x135   :  { %1111 = vmatpush.msra.mxu0 %v278_v19  ;;  %v497_v33 = vld [vmem:[%s3868_s1 + $0xe70] sm:$0xff]  ;;  %1070 = vmatpush.msrb.mxu2 %v154_v28  ;;  %v186_v4 = vld [vmem:[%s3868_s1 + $0x4b8] sm:$0xff] }
 0x136   :  { %1037 = vmatpush.msra.mxu1 %v509_v21  ;;  %1089 = vmatpush.msra.mxu3 %v222_v29  ;;  %v493_v36 = vld [vmem:[%s3868_s1 + $0xe50] sm:$0xff]  ;;  %v78_v5 = vld [vmem:[%s3868_s1 + $0x158] sm:$0xff] }
 0x137   :  { %1112 = vmatpush.msra.mxu0 %v274_v22  ;;  %1071 = vmatpush.msrb.mxu2 %v150_v31  ;;  %v489_v40 = vld [vmem:[%s3868_s1 + $0xe30] sm:$0xff]  ;;  %v114_v6 = vld [vmem:[%s3868_s1 + $0x278] sm:$0xff] }
 0x138   :  { %1038 = vmatpush.msra.mxu1 %v505_v25  ;;  %1090 = vmatpush.msra.mxu3 %v218_v32  ;;  %v485_v43 = vld [vmem:[%s3868_s1 + $0xe10] sm:$0xff]  ;;  %v530_v7 = vld [vmem:[%s3868_s1 + $0xf78] sm:$0xff] }
 0x139   :  { %1113 = vmatpush.msra.mxu0 %v270_v26  ;;  %1072 = vmatpush.msrb.mxu2 %v146_v35  ;;  %v182_v8 = vld [vmem:[%s3868_s1 + $0x498] sm:$0xff] }
 0x13a   :  { %1039 = vmatpush.msra.mxu1 %v501_v20  ;;  %1091 = vmatpush.msra.mxu3 %v214_v10  ;;  %v74_v15 = vld [vmem:[%s3868_s1 + $0x138] sm:$0xff] }
 0x13b   :  { %1114 = vmatpush.msra.mxu0 %v266_v30  ;;  %1073 = vmatpush.msrb.mxu2 %v142_v38  ;;  %v110_v9 = vld [vmem:[%s3868_s1 + $0x258] sm:$0xff] }
 0x13c   :  { %1040 = vmatpush.msra.mxu1 %v497_v33  ;;  %1092 = vmatpush.msra.mxu3 %v210_v39  ;;  %v526_v11 = vld [vmem:[%s3868_s1 + $0xf58] sm:$0xff] }
 0x13d   :  { %1115 = vmatpush.msra.mxu0 %v262_v34  ;;  %1074 = vmatpush.msrb.mxu2 %v138_v42  ;;  %v178_v1 = vld [vmem:[%s3868_s1 + $0x478] sm:$0xff]  ;;  %v3190_v42 = vld [vmem:[%s3869_s2] sm:$0xf] }
 0x13e   :  { %1041 = vmatpush.msra.mxu1 %v493_v36  ;;  %1093 = vmatpush.msra.mxu3 %v206_v60  ;;  %v70_v12 = vld [vmem:[%s3868_s1 + $0x118] sm:$0xff] }
 0x13f   :  { %1116 = vmatpush.msra.mxu0 %v258_v37  ;;  %1075 = vmatpush.msrb.mxu2 %v134_v45  ;;  %v106_v13 = vld [vmem:[%s3868_s1 + $0x238] sm:$0xff] }
 0x140   :  { %1042 = vmatpush.msra.mxu1 %v489_v40  ;;  %1094 = vmatpush.msra.mxu3 %v202_v48  ;;  %v522_v16 = vld [vmem:[%s3868_s1 + $0xf38] sm:$0xff] }
 0x141   :  { %1117 = vmatpush.msra.mxu0 %v254_v41  ;;  %1076 = vmatpush.msrb.mxu2 %v130_v49  ;;  %v174_v17 = vld [vmem:[%s3868_s1 + $0x458] sm:$0xff] }
 0x142   :  { %1043 = vmatpush.msra.mxu1 %v485_v43  ;;  %1095 = vmatpush.msra.mxu3 %v198_v53  ;;  %v66_v18 = vld [vmem:[%s3868_s1 + $0xf8] sm:$0xff] }
 0x143   :  { %1118 = vmatpush.msra.mxu0 %v250_v44  ;;  %1666 = vmatmul.msk.f32.vlgmr.msra.gmra.mxu1 %vm565_vm0, %v3027_v50  ;;  %v102_v19 = vld [vmem:[%s3868_s1 + $0x218] sm:$0xff] }
 0x144   :  { %1048 = vmatpush.msrb.mxu1 %v98_v46  ;;  %1077 = vmatpush.msrb.mxu2 %v126_v58  ;;  %v518_v21 = vld [vmem:[%s3868_s1 + $0xf18] sm:$0xff] }
 0x145   :  { %1119 = vmatpush.msra.mxu0 %v246_v47  ;;  %1096 = vmatpush.msra.mxu3 %v194_v57  ;;  %v170_v22 = vld [vmem:[%s3868_s1 + $0x438] sm:$0xff]  ;;  %v537_v47 = vperm.slane %v3190_v42, 0 }
 0x146   :  { %1049 = vmatpush.msrb.mxu1 %v94_v51  ;;  %1078 = vmatpush.msrb.mxu2 %v122_v54  ;;  %v62_v23 = vld [vmem:[%s3868_s1 + $0xd8] sm:$0xff]  ;;  %v585_v51 = vpop.f32.mrf.mxu0 }
 0x147   :  { %1120 = vmatpush.msra.mxu0 %v242_v52  ;;  %1097 = vmatpush.msra.mxu3 %v190_v62  ;;  %v418_v24 = vld [vmem:[%s3868_s1 + $0xbf8] sm:$0xff]  ;;  %v586_v57 = vadd.f32 %v585_v51, %v537_v47  ;;  %v1240_v62 = vld [vmem:[%s3870_s3 + $0xe0] sm:$0xff] }
 0x148   :  { %1050 = vmatpush.msrb.mxu1 %v90_v55  ;;  %1079 = vmatpush.msrb.mxu2 %v118_v63  ;;  %v514_v25 = vld [vmem:[%s3868_s1 + $0xef8] sm:$0xff]  ;;  %v1242_v55 = vld [vmem:[%s3870_s3 + $0xf0] sm:$0xff] }
 0x149   :  { %1121 = vmatpush.msra.mxu0 %v238_v56  ;;  %1098 = vmatpush.msra.mxu3 %v186_v4  ;;  %v166_v26 = vld [vmem:[%s3868_s1 + $0x418] sm:$0xff] }
 0x14a   :  { %1051 = vmatpush.msrb.mxu1 %v86_v59  ;;  %1080 = vmatpush.msrb.mxu2 %v114_v6  ;;  %v58_v28 = vld [vmem:[%s3868_s1 + $0xb8] sm:$0xff] }
 0x14b   :  { %1122 = vmatpush.msra.mxu0 %v234_v61  ;;  %1099 = vmatpush.msra.mxu3 %v182_v8  ;;  %v414_v29 = vld [vmem:[%s3868_s1 + $0xbd8] sm:$0xff]  ;;  %v605_v61 = vpop.f32.mrf.mxu1  ;;  %v625_v8 = vpop.f32.mrf.mxu2 }
 0x14c   :  { %1052 = vmatpush.msrb.mxu1 %v82_v0  ;;  %1081 = vmatpush.msrb.mxu2 %v110_v9  ;;  %v510_v20 = vld [vmem:[%s3868_s1 + $0xed8] sm:$0xff] }
 0x14d   :  { %1123 = vmatpush.msra.mxu0 %v230_v2  ;;  %1100 = vmatpush.msra.mxu3 %v178_v1  ;;  %v482_v30 = vld [vmem:[%s3868_s1 + $0xdf8] sm:$0xff] }
 0x14e   :  { %1053 = vmatpush.msrb.mxu1 %v78_v5  ;;  %1082 = vmatpush.msrb.mxu2 %v106_v13  ;;  %v54_v31 = vld [vmem:[%s3868_s1 + $0x98] sm:$0xff]  ;;  %v606_v5 = vadd.f32 %v605_v61, %v586_v57  ;;  %v538_v57 = vperm.slane %v3190_v42, 1 }
 0x14f   :  { %1191 = vmatpush.msrb.mxu0 %v534_v3  ;;  %1101 = vmatpush.msra.mxu3 %v174_v17  ;;  %v410_v32 = vld [vmem:[%s3868_s1 + $0xbb8] sm:$0xff]  ;;  %v1238_v3 = vld [vmem:[%s3870_s3 + $0xd0] sm:$0xff] }
 0x150   :  { %1054 = vmatpush.msrb.mxu1 %v74_v15  ;;  %1083 = vmatpush.msrb.mxu2 %v102_v19  ;;  %v506_v33 = vld [vmem:[%s3868_s1 + $0xeb8] sm:$0xff]  ;;  %v1236_v15 = vld [vmem:[%s3870_s3 + $0xc0] sm:$0xff]  ;;  %v645_v19 = vpop.f32.mrf.mxu3 }
 0x151   :  { %1192 = vmatpush.msrb.mxu0 %v530_v7  ;;  %1102 = vmatpush.msra.mxu3 %v170_v22  ;;  %v478_v34 = vld [vmem:[%s3868_s1 + $0xdd8] sm:$0xff] }
 0x152   :  { %1055 = vmatpush.msrb.mxu1 %v70_v12  ;;  %1148 = vmatpush.msra.mxu2 %v418_v24  ;;  %v50_v35 = vld [vmem:[%s3868_s1 + $0x78] sm:$0xff]  ;;  %v1234_v12 = vld [vmem:[%s3870_s3 + $0xb0] sm:$0xff] }
 0x153   :  { %1193 = vmatpush.msrb.mxu0 %v526_v11  ;;  %1103 = vmatpush.msra.mxu3 %v166_v26  ;;  %v406_v10 = vld [vmem:[%s3868_s1 + $0xb98] sm:$0xff]  ;;  %v1230_v24 = vld [vmem:[%s3870_s3 + $0x90] sm:$0xff] }
 0x154   :  { %1056 = vmatpush.msrb.mxu1 %v66_v18  ;;  %1149 = vmatpush.msra.mxu2 %v414_v29  ;;  %v502_v36 = vld [vmem:[%s3868_s1 + $0xe98] sm:$0xff]  ;;  %v1682_v29 = vld.sshfl [vmem:[#allocation1 + $0x8] sm:$0xff pattern:$0x73625140] }
 0x155   :  { %1194 = vmatpush.msrb.mxu0 %v522_v16  ;;  %1168 = vmatpush.msrb.mxu3 %v482_v30  ;;  %v474_v37 = vld [vmem:[%s3868_s1 + $0xdb8] sm:$0xff]  ;;  %v626_v16 = vadd.f32 %v625_v8, %v606_v5  ;;  %v1228_v30 = vld [vmem:[%s3870_s3 + $0x80] sm:$0xff]  ;;  %v1306_v8 = vld [vmem:[%s3870_s3 + $0x2f0] sm:$0xff] }
 0x156   :  { %1057 = vmatpush.msrb.mxu1 %v62_v23  ;;  %1150 = vmatpush.msra.mxu2 %v410_v32  ;;  %v46_v38 = vld [vmem:[%s3868_s1 + $0x58] sm:$0xff] }
 0x157   :  { %1195 = vmatpush.msrb.mxu0 %v518_v21  ;;  %1169 = vmatpush.msrb.mxu3 %v478_v34  ;;  %v402_v39 = vld [vmem:[%s3868_s1 + $0xb78] sm:$0xff]  ;;  %v1232_v21 = vld [vmem:[%s3870_s3 + $0xa0] sm:$0xff]  ;;  %v646_v26 = vadd.f32 %v645_v19, %v626_v16  ;;  %v1683_v34 = vld.sshfl [vmem:[#allocation1 + $0x10] sm:$0xff pattern:$0x73625140] }
 0x158   :  { %1058 = vmatpush.msrb.mxu1 %v58_v28  ;;  %v498_v40 = vld [vmem:[%s3868_s1 + $0xe78] sm:$0xff]  ;;  %1151 = vmatpush.msra.mxu2 %v406_v10  ;;  %v1266_v16 = vld [vmem:[%s3870_s3 + $0x1b0] sm:$0xff] }
 0x159   :  { %1196 = vmatpush.msrb.mxu0 %v514_v25  ;;  %v470_v41 = vld [vmem:[%s3868_s1 + $0xd98] sm:$0xff]  ;;  %1170 = vmatpush.msrb.mxu3 %v474_v37 }
 0x15a   :  { %1059 = vmatpush.msrb.mxu1 %v54_v31  ;;  %v42_v60 = vld [vmem:[%s3868_s1 + $0x38] sm:$0xff]  ;;  %1152 = vmatpush.msra.mxu2 %v402_v39 }
 0x15b   :  { %1197 = vmatpush.msrb.mxu0 %v510_v20  ;;  %v494_v43 = vld [vmem:[%s3868_s1 + $0xe58] sm:$0xff]  ;;  %1171 = vmatpush.msrb.mxu3 %v470_v41  ;;  %v665_v20 = vpop.f32.mrf.mxu0 }
 0x15c   :  { %1060 = vmatpush.msrb.mxu1 %v50_v35  ;;  %v398_v44 = vld [vmem:[%s3868_s1 + $0xb58] sm:$0xff]  ;;  %1124 = vmatmul.f32.vlgmr.msra.gmra.mxu0 %v2927_v14  ;;  %v1226_v35 = vld [vmem:[%s3870_s3 + $0x70] sm:$0xff]  ;;  %v666_v10 = vadd.f32 %v665_v20, %v646_v26  ;;  %v1260_v20 = vld [vmem:[%s3870_s3 + $0x180] sm:$0xff] }
 0x15d   :  { %1198 = vmatpush.msrb.mxu0 %v506_v33  ;;  %v38_v45 = vld [vmem:[%s3868_s1 + $0x18] sm:$0xff]  ;;  %1153 = vmatpush.msra.mxu2 %v398_v44  ;;  %v725_v44 = vpop.f32.mrf.mxu3 }
 0x15e   :  { %1061 = vmatpush.msrb.mxu1 %v46_v38  ;;  %v466_v46 = vld [vmem:[%s3868_s1 + $0xd78] sm:$0xff]  ;;  %1084 = vmatmul.f32.vlgmr.msrb.gmra.mxu2 %v1682_v29  ;;  %v685_v38 = vpop.f32.mrf.mxu1 }
 0x15f   :  { %1199 = vmatpush.msrb.mxu0 %v502_v36  ;;  %v354_v48 = vld [vmem:[%s3868_s1 + $0x9f8] sm:$0xff]  ;;  %1172 = vmatpush.msrb.mxu3 %v466_v46  ;;  %v1222_v46 = vld [vmem:[%s3870_s3 + $0x50] sm:$0xff]  ;;  %v686_v47 = vadd.f32 %v685_v38, %v666_v10  ;;  %v1292_v10 = vld [vmem:[%s3870_s3 + $0x280] sm:$0xff] }
 0x160   :  { %1062 = vmatpush.msrb.mxu1 %v42_v60  ;;  %v490_v49 = vld [vmem:[%s3868_s1 + $0xe38] sm:$0xff]  ;;  %1104 = vmatmul.f32.vlgmr.msra.gmra.mxu3 %v1683_v34  ;;  %v1684_v60 = vld.sshfl [vmem:[#allocation1] sm:$0xff pattern:$0x73625140]  ;;  %v1261_v38 = vld [vmem:[%s3870_s3 + $0x188] sm:$0xff] }
 0x161   :  { %1200 = vmatpush.msrb.mxu0 %v498_v40  ;;  %v394_v52 = vld [vmem:[%s3868_s1 + $0xb38] sm:$0xff]  ;;  %v1224_v40 = vld [vmem:[%s3870_s3 + $0x60] sm:$0xff] }
 0x162   :  { %v462_v53 = vld [vmem:[%s3868_s1 + $0xd58] sm:$0xff]  ;;  %1063 = vmatpush.msrb.mxu1 %v38_v45  ;;  %1154 = vmatpush.msra.mxu2 %v394_v52  ;;  %v1220_v52 = vld [vmem:[%s3870_s3 + $0x40] sm:$0xff] }
 0x163   :  { %1201 = vmatpush.msrb.mxu0 %v494_v43  ;;  %v350_v58 = vld [vmem:[%s3868_s1 + $0x9d8] sm:$0xff]  ;;  %1173 = vmatpush.msrb.mxu3 %v462_v53 }
 0x164   :  { %v486_v14 = vld [vmem:[%s3868_s1 + $0xe18] sm:$0xff]  ;;  %1128 = vmatpush.msra.mxu1 %v354_v48 }
 0x165   :  { %1202 = vmatpush.msrb.mxu0 %v490_v49  ;;  %v390_v56 = vld [vmem:[%s3868_s1 + $0xb18] sm:$0xff]  ;;  %1064 = vmatmul.f32.vlgmr.msrb.gmra.mxu1 %v1684_v60  ;;  %v705_v49 = vpop.f32.mrf.mxu2  ;;  %v745_v61 = vpop.f32.mrf.mxu3 }
 0x166   :  { %v346_v54 = vld [vmem:[%s3868_s1 + $0x9b8] sm:$0xff]  ;;  %1129 = vmatpush.msra.mxu1 %v350_v58  ;;  %1155 = vmatpush.msra.mxu2 %v390_v56  ;;  %v1685_v58 = vld.sshfl [vmem:[#allocation1 + $0x28] sm:$0xff pattern:$0x73625140]  ;;  %v1218_v56 = vld [vmem:[%s3870_s3 + $0x30] sm:$0xff] }
 0x167   :  { %v458_v59 = vld [vmem:[%s3868_s1 + $0xd38] sm:$0xff]  ;;  %1203 = vmatpush.msrb.mxu0 %v486_v14  ;;  %v706_v14 = vadd.f32 %v705_v49, %v686_v47  ;;  %v1286_v47 = vld [vmem:[%s3870_s3 + $0x250] sm:$0xff] }
 0x168   :  { %v386_v63 = vld [vmem:[%s3868_s1 + $0xaf8] sm:$0xff]  ;;  %1130 = vmatpush.msra.mxu1 %v346_v54  ;;  %1174 = vmatpush.msrb.mxu3 %v458_v59  ;;  %v1216_v59 = vld [vmem:[%s3870_s3 + $0x20] sm:$0xff] }
 0x169   :  { %v342_v0 = vld [vmem:[%s3868_s1 + $0x998] sm:$0xff]  ;;  %1355 = vmatpush.msra.mxu0 %v1242_v55  ;;  %1156 = vmatpush.msra.mxu2 %v386_v63  ;;  %v746_v63 = vadd.f32 %v745_v61, %v538_v57  ;;  %v1246_v57 = vld [vmem:[%s3870_s3 + $0x110] sm:$0xff]  ;;  %v1249_v61 = vld [vmem:[%s3870_s3 + $0x128] sm:$0xff] }
 0x16a   :  { %v454_v2 = vld [vmem:[%s3868_s1 + $0xd18] sm:$0xff]  ;;  %1131 = vmatpush.msra.mxu1 %v342_v0  ;;  %1667 = vmatmul.msk.f32.vlgmr.msrb.gmra.mxu0 %vm565_vm0, %v3027_v50  ;;  %v1214_v50 = vld [vmem:[%s3870_s3 + $0x10] sm:$0xff]  ;;  %v1686_v0 = vld.sshfl [vmem:[#allocation1 + $0x20] sm:$0xff pattern:$0x73625140] }
 0x16b   :  { %v382_v4 = vld [vmem:[%s3868_s1 + $0xad8] sm:$0xff]  ;;  %1356 = vmatpush.msra.mxu0 %v1240_v62  ;;  %1175 = vmatpush.msrb.mxu3 %v454_v2  ;;  %v3372_v62 = vadd.f32 %v725_v44, %v706_v14  ;;  %v1272_v2 = vld [vmem:[%s3870_s3 + $0x1e0] sm:$0xff]  ;;  %v1253_v14 = vld [vmem:[%s3870_s3 + $0x148] sm:$0xff] }
 0x16c   :  { %v338_v6 = vld [vmem:[%s3868_s1 + $0x978] sm:$0xff]  ;;  %1157 = vmatpush.msra.mxu2 %v382_v4  ;;  %v765_v4 = vpop.f32.mrf.mxu0 }
 0x16d   :  { %v450_v7 = vld [vmem:[%s3868_s1 + $0xcf8] sm:$0xff]  ;;  %1357 = vmatpush.msra.mxu0 %v1238_v3  ;;  %1132 = vmatpush.msra.mxu1 %v338_v6  ;;  %v1212_v3 = vld [vmem:[%s3870_s3] sm:$0xff]  ;;  %v1208_v5 = vmax.f32 %v3372_v62, 0.0  ;;  %v1270_v6 = vld [vmem:[%s3870_s3 + $0x1d0] sm:$0xff] }
 0x16e   :  { %v378_v9 = vld [vmem:[%s3868_s1 + $0xab8] sm:$0xff]  ;;  %1176 = vmatpush.msrb.mxu3 %v450_v7  ;;  %v1547_v62 = vld [vmem:[%s3872_s5 + $0xf0] sm:$0xff] }
 0x16f   :  { %v334_v11 = vld [vmem:[%s3868_s1 + $0x958] sm:$0xff]  ;;  %1358 = vmatpush.msra.mxu0 %v1236_v15  ;;  %1158 = vmatpush.msra.mxu2 %v378_v9  ;;  %v766_v15 = vadd.f32 %v765_v4, %v746_v63  ;;  %v1268_v9 = vld [vmem:[%s3870_s3 + $0x1c0] sm:$0xff]  ;;  %v1278_v4 = vld [vmem:[%s3870_s3 + $0x210] sm:$0xff] }
 0x170   :  { %v446_v1 = vld [vmem:[%s3868_s1 + $0xcd8] sm:$0xff]  ;;  %1133 = vmatpush.msra.mxu1 %v334_v11  ;;  %v1273_v11 = vld [vmem:[%s3870_s3 + $0x1e8] sm:$0xff] }
 0x171   :  { %v374_v13 = vld [vmem:[%s3868_s1 + $0xa98] sm:$0xff]  ;;  %1177 = vmatpush.msrb.mxu3 %v446_v1  ;;  %1359 = vmatpush.msra.mxu0 %v1234_v12  ;;  %v1304_v1 = vld [vmem:[%s3870_s3 + $0x2e0] sm:$0xff]  ;;  %v785_v12 = vpop.f32.mrf.mxu1 }
 0x172   :  { %v330_v17 = vld [vmem:[%s3868_s1 + $0x938] sm:$0xff]  ;;  %1159 = vmatpush.msra.mxu2 %v374_v13  ;;  %v1302_v13 = vld [vmem:[%s3870_s3 + $0x2d0] sm:$0xff]  ;;  %v786_v19 = vadd.f32 %v785_v12, %v766_v15  ;;  %v1336_v15 = vld [vmem:[%s3870_s3 + $0x3e0] sm:$0xf] }
 0x173   :  { %v442_v18 = vld [vmem:[%s3868_s1 + $0xcb8] sm:$0xff]  ;;  %1134 = vmatpush.msra.mxu1 %v330_v17  ;;  %1360 = vmatpush.msra.mxu0 %v1232_v21  ;;  %v1264_v21 = vld [vmem:[%s3870_s3 + $0x1a0] sm:$0xff] }
 0x174   :  { %v326_v22 = vld [vmem:[%s3868_s1 + $0x918] sm:$0xff]  ;;  %1178 = vmatpush.msrb.mxu3 %v442_v18  ;;  %v1300_v18 = vld [vmem:[%s3870_s3 + $0x2c0] sm:$0xff] }
 0x175   :  { %v370_v23 = vld [vmem:[%s3868_s1 + $0xa78] sm:$0xff]  ;;  %1135 = vmatpush.msra.mxu1 %v326_v22  ;;  %1361 = vmatpush.msra.mxu0 %v1230_v24  ;;  %v1269_v22 = vld [vmem:[%s3870_s3 + $0x1c8] sm:$0xff]  ;;  %v1298_v24 = vld [vmem:[%s3870_s3 + $0x2b0] sm:$0xff] }
 0x176   :  { %v438_v25 = vld [vmem:[%s3868_s1 + $0xc98] sm:$0xff]  ;;  %1160 = vmatpush.msra.mxu2 %v370_v23  ;;  %v805_v23 = vpop.f32.mrf.mxu2 }
 0x177   :  { %v322_v28 = vld [vmem:[%s3868_s1 + $0x8f8] sm:$0xff]  ;;  %1179 = vmatpush.msrb.mxu3 %v438_v25  ;;  %1362 = vmatpush.msra.mxu0 %v1228_v30  ;;  %v1262_v25 = vld [vmem:[%s3870_s3 + $0x190] sm:$0xff]  ;;  %v806_v29 = vadd.f32 %v805_v23, %v786_v19  ;;  %v1265_v30 = vld [vmem:[%s3870_s3 + $0x1a8] sm:$0xff] }
 0x178   :  { %v366_v31 = vld [vmem:[%s3868_s1 + $0xa58] sm:$0xff]  ;;  %1136 = vmatpush.msra.mxu1 %v322_v28  ;;  %v1296_v28 = vld [vmem:[%s3870_s3 + $0x2a0] sm:$0xff] }
 0x179   :  { %v318_v32 = vld [vmem:[%s3868_s1 + $0x8d8] sm:$0xff]  ;;  %1161 = vmatpush.msra.mxu2 %v366_v31  ;;  %1363 = vmatpush.msra.mxu0 %v1226_v35  ;;  %v825_v31 = vpop.f32.mrf.mxu3  ;;  %v865_v35 = vpop.f32.mrf.mxu1  ;;  %v1328_v23 = vld [vmem:[%s3870_s3 + $0x3a0] sm:$0xff] }
 0x17a   :  { %v434_v33 = vld [vmem:[%s3868_s1 + $0xc78] sm:$0xff]  ;;  %1137 = vmatpush.msra.mxu1 %v318_v32  ;;  %v1294_v32 = vld [vmem:[%s3870_s3 + $0x290] sm:$0xff] }
 0x17b   :  { %v314_v36 = vld [vmem:[%s3868_s1 + $0x8b8] sm:$0xff]  ;;  %1180 = vmatpush.msrb.mxu3 %v434_v33  ;;  %1364 = vmatpush.msra.mxu0 %v1224_v40  ;;  %v1258_v33 = vld [vmem:[%s3870_s3 + $0x170] sm:$0xff] }
 0x17c   :  { %v362_v37 = vld [vmem:[%s3868_s1 + $0xa38] sm:$0xff]  ;;  %1138 = vmatpush.msra.mxu1 %v314_v36  ;;  %v826_v36 = vadd.f32 %v825_v31, %v806_v29  ;;  %v1290_v40 = vld [vmem:[%s3870_s3 + $0x270] sm:$0xff] }
 0x17d   :  { %v430_v39 = vld [vmem:[%s3868_s1 + $0xc58] sm:$0xff]  ;;  %1162 = vmatpush.msra.mxu2 %v362_v37  ;;  %1365 = vmatpush.msra.mxu0 %v1222_v46  ;;  %v1256_v37 = vld [vmem:[%s3870_s3 + $0x160] sm:$0xff]  ;;  %v1257_v46 = vld [vmem:[%s3870_s3 + $0x168] sm:$0xff] }
 0x17e   :  { %v310_v41 = vld [vmem:[%s3868_s1 + $0x898] sm:$0xff]  ;;  %1181 = vmatpush.msrb.mxu3 %v430_v39  ;;  %v845_v39 = vpop.f32.mrf.mxu0  ;;  %v1326_v29 = vld [vmem:[%s3870_s3 + $0x390] sm:$0xff] }
 0x17f   :  { %v358_v43 = vld [vmem:[%s3868_s1 + $0xa18] sm:$0xff]  ;;  %1139 = vmatpush.msra.mxu1 %v310_v41  ;;  %1366 = vmatpush.msra.mxu0 %v1220_v52  ;;  %v1254_v41 = vld [vmem:[%s3870_s3 + $0x150] sm:$0xff]  ;;  %v846_v44 = vadd.f32 %v845_v39, %v826_v36  ;;  %v1284_v52 = vld [vmem:[%s3870_s3 + $0x240] sm:$0xff] }
 0x180   :  { %v426_v45 = vld [vmem:[%s3868_s1 + $0xc38] sm:$0xff]  ;;  %1163 = vmatpush.msra.mxu2 %v358_v43  ;;  %v1288_v43 = vld [vmem:[%s3870_s3 + $0x260] sm:$0xff]  ;;  %v1322_v36 = vld [vmem:[%s3870_s3 + $0x370] sm:$0xff] }
 0x181   :  { %v306_v48 = vld [vmem:[%s3868_s1 + $0x878] sm:$0xff]  ;;  %1182 = vmatpush.msrb.mxu3 %v426_v45  ;;  %1164 = vmatmul.f32.vlgmr.msra.gmra.mxu2 %v1685_v58  ;;  %v1252_v45 = vld [vmem:[%s3870_s3 + $0x140] sm:$0xff] }
 0x182   :  { %v422_v51 = vld [vmem:[%s3868_s1 + $0xc18] sm:$0xff]  ;;  %1140 = vmatpush.msra.mxu1 %v306_v48  ;;  %1367 = vmatpush.msra.mxu0 %v1218_v56  ;;  %v1250_v48 = vld [vmem:[%s3870_s3 + $0x130] sm:$0xff]  ;;  %v1248_v58 = vld [vmem:[%s3870_s3 + $0x120] sm:$0xff] }
 0x183   :  { %v302_v53 = vld [vmem:[%s3868_s1 + $0x858] sm:$0xff]  ;;  %1183 = vmatpush.msrb.mxu3 %v422_v51  ;;  %1395 = vmatpush.msrb.mxu2 %v1306_v8  ;;  %v1301_v8 = vld [vmem:[%s3870_s3 + $0x2c8] sm:$0xff]  ;;  %v1320_v39 = vld [vmem:[%s3870_s3 + $0x360] sm:$0xff] }
 0x184   :  { %v298_v55 = vld [vmem:[%s3868_s1 + $0x838] sm:$0xff]  ;;  %1141 = vmatpush.msra.mxu1 %v302_v53  ;;  %1184 = vmatmul.f32.vlgmr.msrb.gmra.mxu3 %v2949_v27  ;;  %v1274_v27 = vld [vmem:[%s3870_s3 + $0x1f0] sm:$0xff]  ;;  %v866_v53 = vadd.f32 %v865_v35, %v846_v44 }
 0x185   :  { %v294_v54 = vld [vmem:[%s3868_s1 + $0x818] sm:$0xff]  ;;  %1368 = vmatpush.msra.mxu0 %v1216_v59  ;;  %1396 = vmatpush.msrb.mxu2 %v1304_v1  ;;  %v1244_v59 = vld [vmem:[%s3870_s3 + $0x100] sm:$0xff] }
 0x186   :  { %1142 = vmatpush.msra.mxu1 %v298_v55  ;;  %v1275_v7 = vld [vmem:[%s3870_s3 + $0x1f8] sm:$0xff]  ;;  %v885_v51 = vpop.f32.mrf.mxu1  ;;  %v1282_v55 = vld [vmem:[%s3870_s3 + $0x230] sm:$0xff]  ;;  %1668 = vmatpush.msk.msra.mxu3 %vm1348_vm1, %v1336_v15 }
 0x187   :  { %1369 = vmatpush.msra.mxu0 %v1214_v50  ;;  %v1271_v17 = vld [vmem:[%s3870_s3 + $0x1d8] sm:$0xff]  ;;  %1397 = vmatpush.msrb.mxu2 %v1302_v13  ;;  %v886_v56 = vadd.f32 %v885_v51, %v866_v53  ;;  %v1332_v13 = vld [vmem:[%s3870_s3 + $0x3c0] sm:$0xff] }
 0x188   :  { %1143 = vmatpush.msra.mxu1 %v294_v54  ;;  %v1267_v26 = vld [vmem:[%s3870_s3 + $0x1b8] sm:$0xff]  ;;  %v905_v1 = vpop.f32.mrf.mxu2 }
 0x189   :  { %1144 = vmatmul.f32.vlgmr.msra.gmra.mxu1 %v1686_v0  ;;  %1370 = vmatpush.msra.mxu0 %v1212_v3  ;;  %v1263_v34 = vld [vmem:[%s3870_s3 + $0x198] sm:$0xff]  ;;  %v1280_v0 = vld [vmem:[%s3870_s3 + $0x220] sm:$0xff]  ;;  %v1305_v3 = vld [vmem:[%s3870_s3 + $0x2e8] sm:$0xff] }
 0x18a   :  { %1375 = vmatpush.msrb.mxu1 %v1274_v27  ;;  %1371 = vmatmul.f32.vlgmr.msra.gmra.mxu0 %v1208_v5  ;;  %v1259_v60 = vld [vmem:[%s3870_s3 + $0x178] sm:$0xff]  ;;  %v1209_v27 = vmax.f32 %v886_v56, 0.0 }
 0x18b   :  { %1455 = vmatpush.msrb.mxu0 %v1275_v7  ;;  %1398 = vmatpush.msrb.mxu2 %v1300_v18  ;;  %v1255_v49 = vld [vmem:[%s3870_s3 + $0x158] sm:$0xff]  ;;  %v1337_v18 = vld [vmem:[%s3870_s3 + $0x3e8] sm:$0xf] }
 0x18c   :  { %1376 = vmatpush.msrb.mxu1 %v1272_v2  ;;  %v1251_v54 = vld [vmem:[%s3870_s3 + $0x138] sm:$0xff]  ;;  %v1245_v2 = vld [vmem:[%s3870_s3 + $0x108] sm:$0xff] }
 0x18d   :  { %1456 = vmatpush.msrb.mxu0 %v1273_v11  ;;  %1399 = vmatpush.msrb.mxu2 %v1298_v24  ;;  %v1247_v50 = vld [vmem:[%s3870_s3 + $0x118] sm:$0xff]  ;;  %v539_v11 = vperm.slane %v3190_v42, 2  ;;  %v1333_v24 = vld [vmem:[%s3870_s3 + $0x3c8] sm:$0xff] }
 0x18e   :  { %1377 = vmatpush.msrb.mxu1 %v1270_v6  ;;  %v1307_v63 = vld [vmem:[%s3870_s3 + $0x2f8] sm:$0xff]  ;;  %v1276_v6 = vld [vmem:[%s3870_s3 + $0x200] sm:$0xff] }
 0x18f   :  { %1457 = vmatpush.msrb.mxu0 %v1271_v17  ;;  %1400 = vmatpush.msrb.mxu2 %v1296_v28  ;;  %v1303_v7 = vld [vmem:[%s3870_s3 + $0x2d8] sm:$0xff]  ;;  %v1330_v17 = vld [vmem:[%s3870_s3 + $0x3b0] sm:$0xff]  ;;  %v906_v19 = vadd.f32 %v905_v1, %v539_v11  ;;  %v1293_v28 = vld [vmem:[%s3870_s3 + $0x288] sm:$0xff] }
 0x190   :  { %1378 = vmatpush.msrb.mxu1 %v1268_v9  ;;  %v1334_v9 = vld [vmem:[%s3870_s3 + $0x3d0] sm:$0xff]  ;;  %v1299_v12 = vld [vmem:[%s3870_s3 + $0x2b8] sm:$0xff]  ;;  %v1317_v11 = vld [vmem:[%s3870_s3 + $0x348] sm:$0xff] }
 0x191   :  { %1458 = vmatpush.msrb.mxu0 %v1269_v22  ;;  %1401 = vmatpush.msrb.mxu2 %v1294_v32  ;;  %v1295_v22 = vld [vmem:[%s3870_s3 + $0x298] sm:$0xff] }
 0x192   :  { %1379 = vmatpush.msrb.mxu1 %v1266_v16  ;;  %1417 = vmatpush.msra.mxu3 %v1334_v9  ;;  %v1297_v16 = vld [vmem:[%s3870_s3 + $0x2a8] sm:$0xff]  ;;  %v1291_v32 = vld [vmem:[%s3870_s3 + $0x278] sm:$0xff] }
 0x193   :  { %1459 = vmatpush.msrb.mxu0 %v1267_v26  ;;  %1402 = vmatpush.msrb.mxu2 %v1292_v10  ;;  %v1289_v10 = vld [vmem:[%s3870_s3 + $0x268] sm:$0xff]  ;;  %v1283_v44 = vld [vmem:[%s3870_s3 + $0x238] sm:$0xff] }
 0x194   :  { %1380 = vmatpush.msrb.mxu1 %v1264_v21  ;;  %1418 = vmatpush.msra.mxu3 %v1332_v13  ;;  %v1335_v21 = vld [vmem:[%s3870_s3 + $0x3d8] sm:$0xff]  ;;  %v1229_v9 = vld [vmem:[%s3870_s3 + $0x88] sm:$0xff] }
 0x195   :  { %1460 = vmatpush.msrb.mxu0 %v1265_v30  ;;  %1403 = vmatpush.msrb.mxu2 %v1290_v40  ;;  %v1331_v30 = vld [vmem:[%s3870_s3 + $0x3b8] sm:$0xff]  ;;  %v1225_v13 = vld [vmem:[%s3870_s3 + $0x68] sm:$0xff] }
 0x196   :  { %1381 = vmatpush.msrb.mxu1 %v1262_v25  ;;  %1419 = vmatpush.msra.mxu3 %v1330_v17  ;;  %v925_v25 = vpop.f32.mrf.mxu3  ;;  %v1279_v51 = vld [vmem:[%s3870_s3 + $0x218] sm:$0xff] }
 0x197   :  { %1461 = vmatpush.msrb.mxu0 %v1263_v34  ;;  %1404 = vmatpush.msrb.mxu2 %v1288_v43  ;;  %v1319_v15 = vld [vmem:[%s3870_s3 + $0x358] sm:$0xff] }
 0x198   :  { %1382 = vmatpush.msrb.mxu1 %v1260_v20  ;;  %v926_v20 = vadd.f32 %v925_v25, %v906_v19  ;;  %1420 = vmatpush.msra.mxu3 %v1328_v23  ;;  %v1227_v1 = vld [vmem:[%s3870_s3 + $0x78] sm:$0xff]  ;;  %v1221_v19 = vld [vmem:[%s3870_s3 + $0x48] sm:$0xff] }
 0x199   :  { %1462 = vmatpush.msrb.mxu0 %v1261_v38  ;;  %1405 = vmatpush.msrb.mxu2 %v1286_v47  ;;  %v1287_v38 = vld [vmem:[%s3870_s3 + $0x258] sm:$0xff]  ;;  %v1217_v23 = vld [vmem:[%s3870_s3 + $0x28] sm:$0xff] }
 0x19a   :  { %1383 = vmatpush.msrb.mxu1 %v1258_v33  ;;  %v1324_v33 = vld [vmem:[%s3870_s3 + $0x380] sm:$0xff]  ;;  %1421 = vmatpush.msra.mxu3 %v1326_v29  ;;  %v1223_v17 = vld [vmem:[%s3870_s3 + $0x58] sm:$0xff]  ;;  %v1213_v25 = vld [vmem:[%s3870_s3 + $0x8] sm:$0xff] }
 0x19b   :  { %1463 = vmatpush.msrb.mxu0 %v1259_v60  ;;  %1406 = vmatpush.msrb.mxu2 %v1284_v52  ;;  %v945_v26 = vpop.f32.mrf.mxu0  ;;  %v1318_v60 = vld [vmem:[%s3870_s3 + $0x350] sm:$0xff]  ;;  %v1312_v52 = vld [vmem:[%s3870_s3 + $0x320] sm:$0xff] }
 0x19c   :  { %1384 = vmatpush.msrb.mxu1 %v1256_v37  ;;  %v946_v34 = vadd.f32 %v945_v26, %v926_v20  ;;  %1422 = vmatpush.msra.mxu3 %v1324_v33  ;;  %v540_v26 = vperm.slane %v3190_v42, 3 }
 0x19d   :  { %1464 = vmatpush.msrb.mxu0 %v1257_v46  ;;  %1407 = vmatpush.msrb.mxu2 %v1282_v55  ;;  %v1310_v55 = vld [vmem:[%s3870_s3 + $0x310] sm:$0xff] }
 0x19e   :  { %1385 = vmatpush.msrb.mxu1 %v1254_v41  ;;  %1423 = vmatpush.msra.mxu3 %v1322_v36  ;;  %v1285_v41 = vld [vmem:[%s3870_s3 + $0x248] sm:$0xff] }
 0x19f   :  { %1465 = vmatpush.msrb.mxu0 %v1255_v49  ;;  %1408 = vmatpush.msrb.mxu2 %v1280_v0  ;;  %v1314_v49 = vld [vmem:[%s3870_s3 + $0x330] sm:$0xff]  ;;  %v1237_v0 = vld [vmem:[%s3870_s3 + $0xc8] sm:$0xff] }
 0x1a0   :  { %1386 = vmatpush.msrb.mxu1 %v1252_v45  ;;  %1424 = vmatpush.msra.mxu3 %v1320_v39  ;;  %v1316_v45 = vld [vmem:[%s3870_s3 + $0x340] sm:$0xff] }
 0x1a1   :  { %1466 = vmatpush.msrb.mxu0 %v1253_v14  ;;  %1409 = vmatpush.msrb.mxu2 %v1278_v4  ;;  %v1277_v14 = vld [vmem:[%s3870_s3 + $0x208] sm:$0xff]  ;;  %v1323_v4 = vld [vmem:[%s3870_s3 + $0x378] sm:$0xff] }
 0x1a2   :  { %1387 = vmatpush.msrb.mxu1 %v1250_v48  ;;  %1425 = vmatpush.msra.mxu3 %v1318_v60  ;;  %v1281_v48 = vld [vmem:[%s3870_s3 + $0x228] sm:$0xff]  ;;  %v1532_v60 = vld [vmem:[%s3872_s5 + $0x78] sm:$0xff] }
 0x1a3   :  { %1467 = vmatpush.msrb.mxu0 %v1251_v54  ;;  %1410 = vmatpush.msrb.mxu2 %v1276_v6  ;;  %v1233_v6 = vld [vmem:[%s3870_s3 + $0xa8] sm:$0xff] }
 0x1a4   :  { %1388 = vmatpush.msrb.mxu1 %v1248_v58  ;;  %1426 = vmatpush.msra.mxu3 %v1316_v45  ;;  %v1329_v58 = vld [vmem:[%s3870_s3 + $0x3a8] sm:$0xff]  ;;  %v1548_v45 = vld [vmem:[%s3872_s5 + $0xf8] sm:$0x3] }
 0x1a5   :  { %1468 = vmatpush.msrb.mxu0 %v1249_v61  ;;  %1670 = vmatpush.msk.msra.mxu2 %vm1348_vm1, %v1337_v18  ;;  %v1311_v18 = vld [vmem:[%s3870_s3 + $0x318] sm:$0xff] }
 0x1a6   :  { %1389 = vmatpush.msrb.mxu1 %v1246_v57  ;;  %1427 = vmatpush.msra.mxu3 %v1314_v49  ;;  %v1308_v57 = vld [vmem:[%s3870_s3 + $0x300] sm:$0xff]  ;;  %v1527_v49 = vld [vmem:[%s3872_s5 + $0x50] sm:$0xff] }
 0x1a7   :  { %1469 = vmatpush.msrb.mxu0 %v1247_v50  ;;  %1497 = vmatpush.msra.mxu2 %v1335_v21  ;;  %v1239_v50 = vld [vmem:[%s3870_s3 + $0xd8] sm:$0xff]  ;;  %v1309_v21 = vld [vmem:[%s3870_s3 + $0x308] sm:$0xff] }
 0x1a8   :  { %1390 = vmatpush.msrb.mxu1 %v1244_v59  ;;  %1428 = vmatpush.msra.mxu3 %v1312_v52  ;;  %v1243_v59 = vld [vmem:[%s3870_s3 + $0xf8] sm:$0xff]  ;;  %v1526_v52 = vld [vmem:[%s3872_s5 + $0x48] sm:$0xff] }
 0x1a9   :  { %1391 = vmatmul.f32.vlgmr.msrb.gmra.mxu1 %v1209_v27  ;;  %1470 = vmatpush.msrb.mxu0 %v1245_v2  ;;  %v1325_v2 = vld [vmem:[%s3870_s3 + $0x388] sm:$0xff] }
 0x1aa   :  { %1475 = vmatpush.msra.mxu1 %v1307_v63  ;;  %1471 = vmatmul.f32.vlgmr.msrb.gmra.mxu0 %v1209_v27  ;;  %v965_v31 = vpop.f32.mrf.mxu1  ;;  %v1241_v27 = vld [vmem:[%s3870_s3 + $0xe8] sm:$0xff]  ;;  %v1327_v63 = vld [vmem:[%s3870_s3 + $0x398] sm:$0xff] }
 0x1ab   :  { %1498 = vmatpush.msra.mxu2 %v1333_v24  ;;  %v966_v37 = vadd.f32 %v965_v31, %v946_v34  ;;  %1429 = vmatpush.msra.mxu3 %v1310_v55  ;;  %v1215_v24 = vld [vmem:[%s3870_s3 + $0x18] sm:$0xff]  ;;  %v1523_v55 = vld [vmem:[%s3872_s5 + $0x30] sm:$0xff] }
 0x1ac   :  { %1476 = vmatpush.msra.mxu1 %v1305_v3  ;;  %v1235_v3 = vld [vmem:[%s3870_s3 + $0xb8] sm:$0xff] }
 0x1ad   :  { %1499 = vmatpush.msra.mxu2 %v1331_v30  ;;  %1430 = vmatpush.msra.mxu3 %v1308_v57  ;;  %v1521_v57 = vld [vmem:[%s3872_s5 + $0x20] sm:$0xff] }
 0x1ae   :  { %1477 = vmatpush.msra.mxu1 %v1303_v7  ;;  %v985_v35 = vpop.f32.mrf.mxu2  ;;  %v1321_v7 = vld [vmem:[%s3870_s3 + $0x368] sm:$0xff] }
 0x1af   :  { %v986_v40 = vadd.f32 %v985_v35, %v966_v37  ;;  %1500 = vmatpush.msra.mxu2 %v1329_v58  ;;  %1435 = vmatpush.msrb.mxu3 %v1243_v59  ;;  %v1525_v58 = vld [vmem:[%s3872_s5 + $0x40] sm:$0xff]  ;;  %v1519_v59 = vld [vmem:[%s3872_s5 + $0x10] sm:$0xff] }
 0x1b0   :  { %1478 = vmatpush.msra.mxu1 %v1301_v8  ;;  %v1231_v8 = vld [vmem:[%s3870_s3 + $0x98] sm:$0xff] }
 0x1b1   :  { %v1025_v47 = vpop.f32.mrf.mxu0  ;;  %1436 = vmatpush.msrb.mxu3 %v1241_v27  ;;  %1501 = vmatpush.msra.mxu2 %v1327_v63  ;;  %v1518_v27 = vld [vmem:[%s3872_s5 + $0x8] sm:$0xff]  ;;  %v1517_v63 = vld [vmem:[%s3872_s5] sm:$0xff] }
 0x1b2   :  { %1479 = vmatpush.msra.mxu1 %v1299_v12  ;;  %v1315_v12 = vld [vmem:[%s3870_s3 + $0x338] sm:$0xff] }
 0x1b3   :  { %1437 = vmatpush.msrb.mxu3 %v1239_v50  ;;  %1502 = vmatpush.msra.mxu2 %v1325_v2  ;;  %v1541_v50 = vld [vmem:[%s3872_s5 + $0xc0] sm:$0xff]  ;;  %v1539_v2 = vld [vmem:[%s3872_s5 + $0xb0] sm:$0xff] }
 0x1b4   :  { %1480 = vmatpush.msra.mxu1 %v1297_v16  ;;  %v1005_v43 = vpop.f32.mrf.mxu3  ;;  %v1313_v16 = vld [vmem:[%s3870_s3 + $0x328] sm:$0xff] }
 0x1b5   :  { %v1006_v46 = vadd.f32 %v1005_v43, %v986_v40  ;;  %1438 = vmatpush.msrb.mxu3 %v1237_v0  ;;  %1503 = vmatpush.msra.mxu2 %v1323_v4  ;;  %v1531_v43 = vld [vmem:[%s3872_s5 + $0x70] sm:$0xff]  ;;  %v1540_v0 = vld [vmem:[%s3872_s5 + $0xb8] sm:$0xff]  ;;  %v1537_v4 = vld [vmem:[%s3872_s5 + $0xa0] sm:$0xff] }
 0x1b6   :  { %1481 = vmatpush.msra.mxu1 %v1295_v22  ;;  %v1219_v22 = vld [vmem:[%s3870_s3 + $0x38] sm:$0xff] }
 0x1b7   :  { %v1026_v53 = vadd.f32 %v1025_v47, %v1006_v46  ;;  %1439 = vmatpush.msrb.mxu3 %v1235_v3  ;;  %1504 = vmatpush.msra.mxu2 %v1321_v7  ;;  %v1546_v46 = vld [vmem:[%s3872_s5 + $0xe8] sm:$0xff]  ;;  %v1528_v47 = vld [vmem:[%s3872_s5 + $0x58] sm:$0xff]  ;;  %v1535_v7 = vld [vmem:[%s3872_s5 + $0x90] sm:$0xff] }
 0x1b8   :  { %1482 = vmatpush.msra.mxu1 %v1293_v28  ;;  %v1538_v3 = vld [vmem:[%s3872_s5 + $0xa8] sm:$0xff] }
 0x1b9   :  { %1440 = vmatpush.msrb.mxu3 %v1233_v6  ;;  %1505 = vmatpush.msra.mxu2 %v1319_v15  ;;  %v1536_v6 = vld [vmem:[%s3872_s5 + $0x98] sm:$0xff]  ;;  %v1533_v15 = vld [vmem:[%s3872_s5 + $0x80] sm:$0xff] }
 0x1ba   :  { %1483 = vmatpush.msra.mxu1 %v1291_v32 }
 0x1bb   :  { %1441 = vmatpush.msrb.mxu3 %v1231_v8  ;;  %1506 = vmatpush.msra.mxu2 %v1317_v11  ;;  %v1534_v8 = vld [vmem:[%s3872_s5 + $0x88] sm:$0xff]  ;;  %v1613_v11 = vld [vmem:[%s3874_s7 + $0x58] sm:$0xff] }
 0x1bc   :  { %1484 = vmatpush.msra.mxu1 %v1289_v10 }
 0x1bd   :  { %1442 = vmatpush.msrb.mxu3 %v1229_v9  ;;  %1507 = vmatpush.msra.mxu2 %v1315_v12  ;;  %v1614_v9 = vld [vmem:[%s3874_s7 + $0x60] sm:$0xf]  ;;  %v1612_v12 = vld [vmem:[%s3874_s7 + $0x50] sm:$0xff] }
 0x1be   :  { %1485 = vmatpush.msra.mxu1 %v1287_v38  ;;  %1674 = vmatpush.msk.msra.mxu0 %vm1348_vm1, %v1614_v9 }
 0x1bf   :  { %1443 = vmatpush.msrb.mxu3 %v1227_v1  ;;  %1508 = vmatpush.msra.mxu2 %v1313_v16  ;;  %v1338_v1 = vld [vmem:[%s3871_s4] sm:$0x3]  ;;  %s1655_s4 = sshll.u32 %s3876_s9, 4  ;;  %s1656_s4 = int_to_ptr.hbm [resolvable:$true] %s1655_s4 }
 0x1c0   :  { %1486 = vmatpush.msra.mxu1 %v1285_v41  ;;  %v1045_v56 = vpop.f32.mrf.mxu1  ;;  %1630 = vmatpush.msra.mxu0 %v1613_v11 }
 0x1c1   :  { %v1046_v54 = vadd.f32 %v1045_v56, %v1026_v53  ;;  %1444 = vmatpush.msrb.mxu3 %v1225_v13  ;;  %1509 = vmatpush.msra.mxu2 %v1311_v18  ;;  %v1543_v53 = vld [vmem:[%s3872_s5 + $0xd0] sm:$0xff]  ;;  %v1522_v56 = vld [vmem:[%s3872_s5 + $0x28] sm:$0xff]  ;;  %v1340_v13 = vperm.slane %v1338_v1, 0 }
 0x1c2   :  { %1487 = vmatpush.msra.mxu1 %v1283_v44  ;;  %v1530_v44 = vld [vmem:[%s3872_s5 + $0x68] sm:$0xff]  ;;  %1631 = vmatpush.msra.mxu0 %v1612_v12 }
 0x1c3   :  { %v1210_v61 = vmax.f32 %v1046_v54, 0.0  ;;  %1445 = vmatpush.msrb.mxu3 %v1223_v17  ;;  %1510 = vmatpush.msra.mxu2 %v1309_v21  ;;  %v1520_v54 = vld [vmem:[%s3872_s5 + $0x18] sm:$0xff] }
 0x1c4   :  { %1488 = vmatpush.msra.mxu1 %v1281_v48  ;;  %v1545_v48 = vld [vmem:[%s3872_s5 + $0xe0] sm:$0xff] }
 0x1c5   :  { %1411 = vmatmul.f32.vlgmr.msrb.gmra.mxu2 %v1210_v61  ;;  %1446 = vmatpush.msrb.mxu3 %v1221_v19 }
 0x1c6   :  { %1489 = vmatpush.msra.mxu1 %v1279_v51  ;;  %1561 = vmatpush.msrb.mxu2 %v1532_v60  ;;  %v1544_v51 = vld [vmem:[%s3872_s5 + $0xd8] sm:$0xff]  ;;  %v1603_v60 = vld [vmem:[%s3874_s7 + $0x8] sm:$0xff] }
 0x1c7   :  { %1447 = vmatpush.msrb.mxu3 %v1219_v22 }
 0x1c8   :  { %1490 = vmatpush.msra.mxu1 %v1277_v14  ;;  %1562 = vmatpush.msrb.mxu2 %v1531_v43  ;;  %v1524_v14 = vld [vmem:[%s3872_s5 + $0x38] sm:$0xff]  ;;  %v1602_v43 = vld [vmem:[%s3874_s7] sm:$0xff] }
 0x1c9   :  { %1491 = vmatmul.f32.vlgmr.msra.gmra.mxu1 %v1210_v61  ;;  %1448 = vmatpush.msrb.mxu3 %v1217_v23  ;;  %v1542_v61 = vld [vmem:[%s3872_s5 + $0xc8] sm:$0xff] }
 0x1ca   :  { %1563 = vmatpush.msrb.mxu2 %v1530_v44  ;;  %v1677_v44 = vld [vmem:[%s3873_s6] ss:$0 sm:$0xff] }
 0x1cb   :  { %1449 = vmatpush.msrb.mxu3 %v1215_v24 }
 0x1cd   :  { %1450 = vmatpush.msrb.mxu3 %v1213_v25 }
 0x1d9   :  { %v1125_v33 = vpop.f32.mrf.mxu0 }
 0x1e1   :  { %v1085_v29 = vpop.f32.mrf.mxu2 }
 0x1e2   :  { %v1065_v28 = vpop.f32.mrf.mxu1 }
 0x1e3   :  { %v1066_v20 = vadd.f32 %v1065_v28, %v540_v26  ;;  %v1105_v31 = vpop.f32.mrf.mxu3  ;;  %v1341_v26 = vperm.slane %v1338_v1, 1 }
 0x1e5   :  { %v1086_v30 = vadd.f32 %v1085_v29, %v1066_v20 }
 0x1e7   :  { %v1106_v32 = vadd.f32 %v1105_v31, %v1086_v30  ;;  %v1205_v40 = vpop.f32.mrf.mxu0 }
 0x1e9   :  { %v1126_v34 = vadd.f32 %v1125_v33, %v1106_v32 }
 0x204   :  { %v1165_v10 = vpop.f32.mrf.mxu2 }
 0x206   :  { %v1145_v35 = vpop.f32.mrf.mxu1 }
 0x207   :  { %v1146_v36 = vadd.f32 %v1145_v35, %v1126_v34  ;;  %v1185_v37 = vpop.f32.mrf.mxu3  ;;  %v1372_v16 = vpop.f32.mrf.mxu0 }
 0x208   :  { %v1373_v18 = vadd.f32 %v1372_v16, %v1340_v13 }
 0x209   :  { %v1166_v38 = vadd.f32 %v1165_v10, %v1146_v36  ;;  %v1611_v10 = vld [vmem:[%s3874_s7 + $0x48] sm:$0xff]  ;;  %v1610_v36 = vld [vmem:[%s3874_s7 + $0x40] sm:$0xff] }
 0x20a   :  { %1632 = vmatpush.msra.mxu0 %v1611_v10 }
 0x20b   :  { %v1186_v39 = vadd.f32 %v1185_v37, %v1166_v38  ;;  %v1609_v37 = vld [vmem:[%s3874_s7 + $0x38] sm:$0xff]  ;;  %v1608_v38 = vld [vmem:[%s3874_s7 + $0x30] sm:$0xff] }
 0x20c   :  { %1633 = vmatpush.msra.mxu0 %v1610_v36 }
 0x20d   :  { %v1206_v41 = vadd.f32 %v1205_v40, %v1186_v39  ;;  %v1607_v39 = vld [vmem:[%s3874_s7 + $0x28] sm:$0xff]  ;;  %v1606_v40 = vld [vmem:[%s3874_s7 + $0x20] sm:$0xff] }
 0x20e   :  { %1634 = vmatpush.msra.mxu0 %v1609_v37 }
 0x20f   :  { %v1211_v42 = vmax.f32 %v1206_v41, 0.0  ;;  %v1605_v41 = vld [vmem:[%s3874_s7 + $0x18] sm:$0xff] }
 0x210   :  { %1635 = vmatpush.msra.mxu0 %v1608_v38 }
 0x211   :  { %1669 = vmatmul.msk.f32.vlgmr.msra.gmra.mxu3 %vm1344_vm2, %v1211_v42  ;;  %1671 = vmatmul.msk.f32.vlgmr.msra.gmra.mxu2 %vm1344_vm2, %v1211_v42  ;;  %v1604_v42 = vld [vmem:[%s3874_s7 + $0x10] sm:$0xff] }
 0x212   :  { %1672 = vmatpush.msk.msra.mxu3 %vm1557_vm3, %v1548_v45  ;;  %1636 = vmatpush.msra.mxu0 %v1607_v39 }
 0x214   :  { %1582 = vmatpush.msra.mxu3 %v1547_v62  ;;  %1637 = vmatpush.msra.mxu0 %v1606_v40 }
 0x216   :  { %1583 = vmatpush.msra.mxu3 %v1546_v46  ;;  %1638 = vmatpush.msra.mxu0 %v1605_v41 }
 0x218   :  { %1584 = vmatpush.msra.mxu3 %v1545_v48  ;;  %1639 = vmatpush.msra.mxu0 %v1604_v42  ;;  %v1678_v48 = vld [vmem:[%s3875_s8] ss:$0 sm:$0xff] }
 0x219   :  { %1451 = vmatmul.f32.vlgmr.msrb.gmra.mxu3 %v1208_v5  ;;  %v1529_v5 = vld [vmem:[%s3872_s5 + $0x60] sm:$0xff] }
 0x21a   :  { %1564 = vmatpush.msrb.mxu2 %v1529_v5  ;;  %1585 = vmatpush.msra.mxu3 %v1544_v51 }
 0x21b   :  { %1640 = vmatpush.msra.mxu0 %v1603_v60 }
 0x21c   :  { %1565 = vmatpush.msrb.mxu2 %v1528_v47  ;;  %1586 = vmatpush.msra.mxu3 %v1543_v53 }
 0x21d   :  { %1641 = vmatpush.msra.mxu0 %v1602_v43 }
 0x21e   :  { %1566 = vmatpush.msrb.mxu2 %v1527_v49  ;;  %1587 = vmatpush.msra.mxu3 %v1542_v61 }
 0x220   :  { %1567 = vmatpush.msrb.mxu2 %v1526_v52  ;;  %1588 = vmatpush.msra.mxu3 %v1541_v50 }
 0x222   :  { %1568 = vmatpush.msrb.mxu2 %v1525_v58  ;;  %1589 = vmatpush.msra.mxu3 %v1540_v0 }
 0x224   :  { %1569 = vmatpush.msrb.mxu2 %v1524_v14  ;;  %1590 = vmatpush.msra.mxu3 %v1539_v2 }
 0x226   :  { %1570 = vmatpush.msrb.mxu2 %v1523_v55  ;;  %1591 = vmatpush.msra.mxu3 %v1538_v3  ;;  %v1392_v17 = vpop.f32.mrf.mxu1 }
 0x227   :  { %v1393_v21 = vadd.f32 %v1392_v17, %v1373_v18  ;;  %v1472_v20 = vpop.f32.mrf.mxu0 }
 0x228   :  { %1571 = vmatpush.msrb.mxu2 %v1522_v56  ;;  %1592 = vmatpush.msra.mxu3 %v1537_v4 }
 0x22a   :  { %1572 = vmatpush.msrb.mxu2 %v1521_v57  ;;  %1593 = vmatpush.msra.mxu3 %v1536_v6 }
 0x22c   :  { %1573 = vmatpush.msrb.mxu2 %v1520_v54  ;;  %1594 = vmatpush.msra.mxu3 %v1535_v7 }
 0x22e   :  { %1574 = vmatpush.msrb.mxu2 %v1519_v59  ;;  %1595 = vmatpush.msra.mxu3 %v1534_v8 }
 0x230   :  { %1575 = vmatpush.msrb.mxu2 %v1518_v27  ;;  %1596 = vmatpush.msra.mxu3 %v1533_v15 }
 0x232   :  { %1576 = vmatpush.msrb.mxu2 %v1517_v63 }
 0x246   :  { %v1492_v31 = vpop.f32.mrf.mxu1 }
 0x248   :  { %v1412_v19 = vpop.f32.mrf.mxu2 }
 0x249   :  { %v1413_v22 = vadd.f32 %v1412_v19, %v1393_v21 }
 0x294   :  { %v1432_v23 = vpop.f32.mrf.mxu3  ;;  %v1512_v33 = vpop.f32.mrf.mxu2 }
 0x295   :  { %v1433_v24 = vadd.f32 %v1432_v23, %v1413_v22 }
 0x297   :  { %v1515_v25 = vmax.f32 %v1433_v24, 0.0 }
 0x299   :  { %1577 = vmatmul.f32.vlgmr.msrb.gmra.mxu2 %v1515_v25 }
 0x29c   :  { %v1452_v28 = vpop.f32.mrf.mxu3 }
 0x29d   :  { %v1453_v29 = vadd.f32 %v1452_v28, %v1341_v26 }
 0x29f   :  { %v1473_v30 = vadd.f32 %v1472_v20, %v1453_v29 }
 0x2a1   :  { %v1493_v32 = vadd.f32 %v1492_v31, %v1473_v30 }
 0x2a3   :  { %v1513_v34 = vadd.f32 %v1512_v33, %v1493_v32 }
 0x2a5   :  { %v1516_v35 = vmax.f32 %v1513_v34, 0.0 }
 0x2a7   :  { %1673 = vmatmul.msk.f32.vlgmr.msra.gmra.mxu3 %vm1553_vm4, %v1516_v35 }
 0x31c   :  { %v1578_v45 = vpop.f32.mrf.mxu2 }
 0x31d   :  { %v1579_v62 = vadd.f32 %v1677_v44, %v1578_v45 }
 0x32a   :  { %v1598_v5 = vpop.f32.mrf.mxu3 }
 0x32b   :  { %v1599_v46 = vadd.f32 %v1598_v5, %v1579_v62 }
 0x32d   :  { %v1601_v47 = vmax.f32 %v1599_v46, 0.0 }
 0x32f   :  { %1675 = vmatmul.msk.f32.vlgmr.msra.gmra.mxu0 %vm1619_vm5, %v1601_v47 }
 0x3ac   :  { %v1643_v49 = vpop.f32.mrf.mxu0 }
 0x3ad   :  { %v1644_v51 = vadd.f32 %v1678_v48, %v1643_v49 }
 0x3af   :  { %1647 = vst.msk [vmem:[#allocation2] sm:$0x3] %vm1646_vm6, %v1644_v51 }
 0x3b0   :  { %1658 = dma.vmem_to_hbm [thread:$0]  %s1654_s0, 32, %s1656_s4, [#allocation3]  }
 0x3b1   :  { %1711 = dma.done.wait [#allocation3], 32  }
 0x3b2   :  { %1712 = vsyncadd [#allocation3], 4294967264 }
 0x3b3   :  { %1663 = vsyncpa [#allocation3], 1 }

</bundles_post_ra>
